<compile_context>
chip_gen: v5e
topology: v5e:2x2
jax: 0.10.0
libtpu: 0.0.40
codegen_flags: <defaults>
</compile_context>

<pallas_src>
import functools

import jax
import jax.numpy as jnp
from jax import lax
from jax.experimental import pallas as pl
from jax.experimental.pallas import tpu as pltpu


def _down_kernel(x_ref, w1_ref, b1_ref, w2_ref, b2_ref, o_ref,
                 pad1_ref, pad2_ref, *, Hp, Wp, Cin, Cmid, Cout):
    """MaxPool2d(2) -> (conv3x3 + folded-BN + ReLU) x2 for one batch element.

    x_ref:    (1, 2*Hp, 2*Wp, Cin)  compute-dtype input tile (real channels)
    w1_ref:   (9*Cin, Cmid)         layer-1 weights, row = (ky*3+kx)*Cin + ci
    b1_ref:   (1, Cmid)  f32        layer-1 folded bias
    w2_ref:   (9*Cmid, Cout)        layer-2 weights
    b2_ref:   (1, Cout)  f32        layer-2 folded bias
    o_ref:    (1, Hp, Wp, Cout)
    pad1_ref: (Hp+2, Wp+9, Cin)     VMEM scratch: zero-halo'd pooled input
    pad2_ref: (Hp+2, Wp+9, Cmid)    VMEM scratch: zero-halo'd layer-1 act

    The W halo is 8 columns wide on the left so the interior starts at sublane
    offset 8 (aligned store); only column 7 is the logical left pad pixel.
    """
    cdt = pad1_ref.dtype

    def zero_border(pad_ref, c):
        # only the 1-pixel halo (plus the dead left columns) is zeroed; the
        # interior is fully overwritten below, so no full-buffer zero pass.
        row = jnp.zeros((1, Wp + 9, c), cdt)
        pad_ref[0:1, :, :] = row                                    # top pad row
        pad_ref[Hp + 1:Hp + 2, :, :] = row                          # bottom pad row
        pad_ref[1:Hp + 1, 0:8, :] = jnp.zeros((Hp, 8, c), cdt)      # left halo (aligned)
        pad_ref[1:Hp + 1, 8 + Wp:9 + Wp, :] = jnp.zeros((Hp, 1, c), cdt)  # right pad

    def conv_bn_relu(pad_ref, w_ref, b_ref, cin, cout):
        xp = pad_ref[...]                                   # (Hp+2, Wp+9, cin)
        # all 9 taps packed into ONE matmul: K = 9*cin (real channels only)
        taps = [xp[ky:ky + Hp, 7 + kx:7 + kx + Wp, :]
                for ky in range(3) for kx in range(3)]
        lhs = jnp.concatenate(taps, axis=-1).reshape(Hp * Wp, 9 * cin)
        acc = jnp.dot(lhs, w_ref[...], preferred_element_type=jnp.float32)
        # BN scale already folded into weights; f32 epilogue = bias + ReLU
        return jnp.maximum(acc + b_ref[...], 0.0)           # (Hp*Wp, cout) f32

    # ---- MaxPool2d(2): stays in vregs / VMEM, never written to HBM ----
    x = x_ref[0]                                            # (2Hp, 2Wp, Cin)
    x = jnp.max(x.reshape(Hp, 2, 2 * Wp, Cin), axis=1)      # row pairs
    pooled = jnp.max(x.reshape(Hp, Wp, 2, Cin), axis=2)     # col pairs (Hp,Wp,Cin)

    zero_border(pad1_ref, Cin)
    pad1_ref[1:Hp + 1, 8:8 + Wp, :] = pooled                # aligned interior store
    h1 = conv_bn_relu(pad1_ref, w1_ref, b1_ref, Cin, Cmid)  # (Hp*Wp, Cmid) f32

    zero_border(pad2_ref, Cmid)
    pad2_ref[1:Hp + 1, 8:8 + Wp, :] = h1.reshape(Hp, Wp, Cmid).astype(cdt)
    h2 = conv_bn_relu(pad2_ref, w2_ref, b2_ref, Cmid, Cout)

    o_ref[...] = h2.reshape(1, Hp, Wp, Cout).astype(o_ref.dtype)


def fold_bn(w_hwio, conv_b, gamma, beta, mean, var, eps=1e-5):
    """Fold eval-mode BatchNorm into the conv weights / bias."""
    scale = gamma / jnp.sqrt(var + eps)                     # (Cout,)
    return w_hwio * scale[None, None, None, :], beta + (conv_b - mean) * scale


def _vmem_cap_bytes():
    try:
        cap = getattr(pltpu.get_tpu_info(), "vmem_capacity_bytes", None)
        if cap:
            return int(cap)
    except Exception:
        pass
    return 64 * 1024 * 1024       # conservative default (v7x physical size)


def down_forward_nhwc(x_nhwc, layer1, layer2, *,
                      compute_dtype=jnp.bfloat16, out_dtype=jnp.float32,
                      eps=1e-5):
    """Down block (MaxPool2d(2) -> DoubleConv) on an NHWC input, one pallas_call.

    layer_i = (w_hwio[3,3,ci,co], conv_bias[co], gamma[co], beta[co],
               running_mean[co], running_var[co])    -- eval-mode BatchNorm.
    """
    N, H, W, Cin = x_nhwc.shape
    Hp, Wp = H // 2, W // 2                  # MaxPool2d(2) floors odd extents
    w1, cb1, g1, be1, m1, v1 = layer1
    w2, cb2, g2, be2, m2, v2 = layer2
    Cmid, Cout = w1.shape[-1], w2.shape[-1]

    x = x_nhwc[:, :2 * Hp, :2 * Wp, :].astype(compute_dtype)

    w1e, b1e = fold_bn(w1, cb1, g1, be1, m1, v1, eps)
    w2e, b2e = fold_bn(w2, cb2, g2, be2, m2, v2, eps)
    # HWIO (3,3,ci,co) -> (9*ci, co); row (ky*3+kx)*ci + c matches kernel im2col
    w1e = w1e.reshape(9 * Cin, Cmid).astype(compute_dtype)
    w2e = w2e.reshape(9 * Cmid, Cout).astype(compute_dtype)
    b1e = b1e.reshape(1, Cmid).astype(jnp.float32)
    b2e = b2e.reshape(1, Cout).astype(jnp.float32)

    kernel = functools.partial(_down_kernel, Hp=Hp, Wp=Wp,
                               Cin=Cin, Cmid=Cmid, Cout=Cout)

    csz = jnp.dtype(compute_dtype).itemsize
    osz = jnp.dtype(out_dtype).itemsize
    blk_in = 4 * Hp * Wp * Cin * csz
    blk_out = Hp * Wp * Cout * osz
    wts = (9 * Cin * Cmid + 9 * Cmid * Cout) * csz + (Cmid + Cout) * 4
    scratch = (Hp + 2) * (Wp + 9) * (Cin + Cmid) * csz
    transient = Hp * Wp * 9 * (Cin + Cmid) * csz + Hp * Wp * (Cmid + Cout) * 4
    vmem_limit = min(int(_vmem_cap_bytes() * 3 // 4),
                     max(32 * 1024 * 1024,
                         2 * (blk_in + blk_out + wts) + scratch
                         + 3 * transient + (4 << 20)))

    flops = 2 * N * Hp * Wp * 9 * (Cin * Cmid + Cmid * Cout)
    bytes_accessed = (x.size * csz + (w1e.size + w2e.size) * csz
                      + (b1e.size + b2e.size) * 4 + N * Hp * Wp * Cout * osz)

    return pl.pallas_call(
        kernel,
        out_shape=jax.ShapeDtypeStruct((N, Hp, Wp, Cout), out_dtype),
        grid=(N,),
        in_specs=[
            pl.BlockSpec((1, 2 * Hp, 2 * Wp, Cin), lambda n: (n, 0, 0, 0)),
            pl.BlockSpec((9 * Cin, Cmid), lambda n: (0, 0)),
            pl.BlockSpec((1, Cmid), lambda n: (0, 0)),
            pl.BlockSpec((9 * Cmid, Cout), lambda n: (0, 0)),
            pl.BlockSpec((1, Cout), lambda n: (0, 0)),
        ],
        out_specs=pl.BlockSpec((1, Hp, Wp, Cout), lambda n: (n, 0, 0, 0)),
        scratch_shapes=[
            pltpu.VMEM((Hp + 2, Wp + 9, Cin), compute_dtype),
            pltpu.VMEM((Hp + 2, Wp + 9, Cmid), compute_dtype),
        ],
        compiler_params=pltpu.CompilerParams(
            dimension_semantics=("parallel",),
            vmem_limit_bytes=int(vmem_limit),
        ),
        cost_estimate=pl.CostEstimate(flops=flops, transcendentals=0,
                                      bytes_accessed=int(bytes_accessed)),
    )(x, w1e, b1e, w2e, b2e)


def down_forward(x_nchw, layer1, layer2, *,
                 compute_dtype=jnp.bfloat16, out_dtype=jnp.float32, eps=1e-5):
    """PyTorch-layout (NCHW) wrapper around down_forward_nhwc.

    Prefer chaining blocks with down_forward_nhwc (and bf16 outputs) in a real
    model: the transposes here are full-tensor HBM round trips.
    """
    x = jnp.transpose(x_nchw, (0, 2, 3, 1))
    out = down_forward_nhwc(x, layer1, layer2, compute_dtype=compute_dtype,
                            out_dtype=out_dtype, eps=eps)
    return jnp.transpose(out, (0, 3, 1, 2))


# -------- pure-JAX reference (eval-mode PyTorch semantics, f32) --------
def _ref_down(x_nchw, layer1, layer2, eps=1e-5):
    x = jnp.transpose(x_nchw, (0, 2, 3, 1))
    N, H, W, C = x.shape
    Hp, Wp = H // 2, W // 2
    x = x[:, :2 * Hp, :2 * Wp, :].reshape(N, Hp, 2, Wp, 2, C).max(axis=(2, 4))
    for (w, b, g, be, m, v) in (layer1, layer2):
        y = lax.conv_general_dilated(x, w, (1, 1), ((1, 1), (1, 1)),
                                     dimension_numbers=("NHWC", "HWIO", "NHWC"))
        y = y + b[None, None, None, :]
        y = (y - m) / jnp.sqrt(v + eps) * g + be
        x = jnp.maximum(y, 0.0)
    return jnp.transpose(x, (0, 3, 1, 2))


if __name__ == "__main__":
    key = jax.random.PRNGKey(0)
    N, in_ch, out_ch, H, W = 2, 4, 8, 16, 16
    keys = jax.random.split(key, 13)
    x = jax.random.normal(keys[0], (N, in_ch, H, W), jnp.float32)

    def make_layer(ks, ci, co):
        w = 0.1 * jax.random.normal(ks[0], (3, 3, ci, co), jnp.float32)   # HWIO
        b = 0.1 * jax.random.normal(ks[1], (co,), jnp.float32)
        g = 1.0 + 0.1 * jax.random.normal(ks[2], (co,), jnp.float32)
        be = 0.1 * jax.random.normal(ks[3], (co,), jnp.float32)
        m = 0.1 * jax.random.normal(ks[4], (co,), jnp.float32)
        v = 1.0 + 0.1 * jax.random.uniform(ks[5], (co,), jnp.float32)
        return (w, b, g, be, m, v)

    layer1 = make_layer(keys[1:7], in_ch, out_ch)     # Conv(in_ch -> out_ch) + BN
    layer2 = make_layer(keys[7:13], out_ch, out_ch)   # Conv(out_ch -> out_ch) + BN

    ref = jax.block_until_ready(_ref_down(x, layer1, layer2))

    # default bf16 compute path (MXU-native); accumulation / epilogue in f32
    out_bf16 = jax.block_until_ready(down_forward(x, layer1, layer2))
    assert out_bf16.shape == (N, out_ch, H // 2, W // 2), out_bf16.shape
    err_bf16 = float(jnp.max(jnp.abs(out_bf16 - ref)))
    assert jnp.allclose(out_bf16, ref, atol=1e-1, rtol=1e-1), err_bf16

    # f32 compute path: tight numerical check of the fused algorithm
    out_f32 = jax.block_until_ready(
        down_forward(x, layer1, layer2, compute_dtype=jnp.float32))
    err_f32 = float(jnp.max(jnp.abs(out_f32 - ref)))
    assert jnp.allclose(out_f32, ref, atol=2e-3, rtol=2e-3), err_f32

    print("KERNEL_OK")
</pallas_src>

<mosaic_0001>
module attributes {stable_mosaic.version = 11 : i64} {
  func.func @_down_kernel(%arg0: i32, %arg1: memref<1x16x16x4xbf16, #tpu.memory_space<vmem>>, %arg2: memref<36x8xbf16, #tpu.memory_space<vmem>>, %arg3: memref<1x8xf32, #tpu.memory_space<vmem>>, %arg4: memref<72x8xbf16, #tpu.memory_space<vmem>>, %arg5: memref<1x8xf32, #tpu.memory_space<vmem>>, %arg6: memref<1x8x8x8xf32, #tpu.memory_space<vmem>>, %arg7: memref<10x17x4xbf16, #tpu.memory_space<vmem>>, %arg8: memref<10x17x8xbf16, #tpu.memory_space<vmem>>) attributes {dimension_semantics = [#tpu.dimension_semantics<parallel>], iteration_bounds = array<i64: 2>, scalar_prefetch = 0 : i64, scratch_operands = 2 : i64, tpu.core_type = #tpu.core_type<tc>, window_params = [{transform_indices = @transform_0, window_bounds = array<i64: 1, 16, 16, 4>}, {pipeline_mode = #tpu.pipeline_mode<synchronous>, transform_indices = @transform_1, window_bounds = array<i64: 36, 8>}, {pipeline_mode = #tpu.pipeline_mode<synchronous>, transform_indices = @transform_2, window_bounds = array<i64: 1, 8>}, {pipeline_mode = #tpu.pipeline_mode<synchronous>, transform_indices = @transform_3, window_bounds = array<i64: 72, 8>}, {pipeline_mode = #tpu.pipeline_mode<synchronous>, transform_indices = @transform_4, window_bounds = array<i64: 1, 8>}, {transform_indices = @transform_5, window_bounds = array<i64: 1, 8, 8, 8>}]} {
    %c0 = arith.constant 0 : index
    %c0_0 = arith.constant 0 : index
    %c0_1 = arith.constant 0 : index
    %c0_2 = arith.constant 0 : index
    %0 = vector.load %arg1[%c0, %c0_0, %c0_1, %c0_2] : memref<1x16x16x4xbf16, #tpu.memory_space<vmem>>, vector<1x16x16x4xbf16>
    %1 = vector.shape_cast %0 : vector<1x16x16x4xbf16> to vector<16x16x4xbf16>
    %2 = vector.shape_cast %1 : vector<16x16x4xbf16> to vector<8x2x16x4xbf16>
    %cst = arith.constant dense<0xFF80> : vector<8x16x4xbf16>
    %3 = vector.multi_reduction <maximumf>, %2, %cst [1] : vector<8x2x16x4xbf16> to vector<8x16x4xbf16>
    %4 = vector.shape_cast %3 : vector<8x16x4xbf16> to vector<8x8x2x4xbf16>
    %cst_3 = arith.constant dense<0xFF80> : vector<8x8x4xbf16>
    %5 = vector.multi_reduction <maximumf>, %4, %cst_3 [2] : vector<8x8x2x4xbf16> to vector<8x8x4xbf16>
    %cst_4 = arith.constant 0.000000e+00 : bf16
    %6 = vector.broadcast %cst_4 : bf16 to vector<1x17x4xbf16>
    %c0_5 = arith.constant 0 : index
    %c0_6 = arith.constant 0 : index
    %c0_7 = arith.constant 0 : index
    %7 = vector.load %arg7[%c0_5, %c0_6, %c0_7] : memref<10x17x4xbf16, #tpu.memory_space<vmem>>, vector<1x17x4xbf16>
    tpu.vector_store %arg7[%c0_5, %c0_6, %c0_7], %6 {strides = array<i32>} : memref<10x17x4xbf16, #tpu.memory_space<vmem>>, vector<1x17x4xbf16>,
    %c9 = arith.constant 9 : index
    %c0_8 = arith.constant 0 : index
    %c0_9 = arith.constant 0 : index
    %8 = vector.load %arg7[%c9, %c0_8, %c0_9] : memref<10x17x4xbf16, #tpu.memory_space<vmem>>, vector<1x17x4xbf16>
    tpu.vector_store %arg7[%c9, %c0_8, %c0_9], %6 {strides = array<i32>} : memref<10x17x4xbf16, #tpu.memory_space<vmem>>, vector<1x17x4xbf16>,
    %cst_10 = arith.constant 0.000000e+00 : bf16
    %9 = vector.broadcast %cst_10 : bf16 to vector<8x8x4xbf16>
    %c1 = arith.constant 1 : index
    %c0_11 = arith.constant 0 : index
    %c0_12 = arith.constant 0 : index
    %10 = vector.load %arg7[%c1, %c0_11, %c0_12] : memref<10x17x4xbf16, #tpu.memory_space<vmem>>, vector<8x8x4xbf16>
    tpu.vector_store %arg7[%c1, %c0_11, %c0_12], %9 {strides = array<i32>} : memref<10x17x4xbf16, #tpu.memory_space<vmem>>, vector<8x8x4xbf16>,
    %cst_13 = arith.constant 0.000000e+00 : bf16
    %11 = vector.broadcast %cst_13 : bf16 to vector<8x1x4xbf16>
    %c1_14 = arith.constant 1 : index
    %c16 = arith.constant 16 : index
    %c0_15 = arith.constant 0 : index
    %12 = vector.load %arg7[%c1_14, %c16, %c0_15] : memref<10x17x4xbf16, #tpu.memory_space<vmem>>, vector<8x1x4xbf16>
    tpu.vector_store %arg7[%c1_14, %c16, %c0_15], %11 {strides = array<i32>} : memref<10x17x4xbf16, #tpu.memory_space<vmem>>, vector<8x1x4xbf16>,
    %c1_16 = arith.constant 1 : index
    %c8 = arith.constant 8 : index
    %c0_17 = arith.constant 0 : index
    %13 = vector.load %arg7[%c1_16, %c8, %c0_17] : memref<10x17x4xbf16, #tpu.memory_space<vmem>>, vector<8x8x4xbf16>
    tpu.vector_store %arg7[%c1_16, %c8, %c0_17], %5 {strides = array<i32>} : memref<10x17x4xbf16, #tpu.memory_space<vmem>>, vector<8x8x4xbf16>,
    %c0_18 = arith.constant 0 : index
    %c0_19 = arith.constant 0 : index
    %c0_20 = arith.constant 0 : index
    %14 = vector.load %arg7[%c0_18, %c0_19, %c0_20] : memref<10x17x4xbf16, #tpu.memory_space<vmem>>, vector<10x17x4xbf16>
    %15 = vector.extract_strided_slice %14 {offsets = [0, 7, 0], sizes = [8, 8, 4], strides = [1, 1, 1]} : vector<10x17x4xbf16> to vector<8x8x4xbf16>
    %16 = vector.extract_strided_slice %14 {offsets = [0, 8, 0], sizes = [8, 8, 4], strides = [1, 1, 1]} : vector<10x17x4xbf16> to vector<8x8x4xbf16>
    %17 = vector.extract_strided_slice %14 {offsets = [0, 9, 0], sizes = [8, 8, 4], strides = [1, 1, 1]} : vector<10x17x4xbf16> to vector<8x8x4xbf16>
    %18 = vector.extract_strided_slice %14 {offsets = [1, 7, 0], sizes = [8, 8, 4], strides = [1, 1, 1]} : vector<10x17x4xbf16> to vector<8x8x4xbf16>
    %19 = vector.extract_strided_slice %14 {offsets = [1, 8, 0], sizes = [8, 8, 4], strides = [1, 1, 1]} : vector<10x17x4xbf16> to vector<8x8x4xbf16>
    %20 = vector.extract_strided_slice %14 {offsets = [1, 9, 0], sizes = [8, 8, 4], strides = [1, 1, 1]} : vector<10x17x4xbf16> to vector<8x8x4xbf16>
    %21 = vector.extract_strided_slice %14 {offsets = [2, 7, 0], sizes = [8, 8, 4], strides = [1, 1, 1]} : vector<10x17x4xbf16> to vector<8x8x4xbf16>
    %22 = vector.extract_strided_slice %14 {offsets = [2, 8, 0], sizes = [8, 8, 4], strides = [1, 1, 1]} : vector<10x17x4xbf16> to vector<8x8x4xbf16>
    %23 = vector.extract_strided_slice %14 {offsets = [2, 9, 0], sizes = [8, 8, 4], strides = [1, 1, 1]} : vector<10x17x4xbf16> to vector<8x8x4xbf16>
    %24 = tpu.concatenate %15, %16, %17, %18, %19, %20, %21, %22, %23 in 2 : vector<8x8x4xbf16>, vector<8x8x4xbf16>, vector<8x8x4xbf16>, vector<8x8x4xbf16>, vector<8x8x4xbf16>, vector<8x8x4xbf16>, vector<8x8x4xbf16>, vector<8x8x4xbf16>, vector<8x8x4xbf16> -> vector<8x8x36xbf16>
    %25 = vector.shape_cast %24 : vector<8x8x36xbf16> to vector<64x36xbf16>
    %c0_21 = arith.constant 0 : index
    %c0_22 = arith.constant 0 : index
    %26 = vector.load %arg2[%c0_21, %c0_22] : memref<36x8xbf16, #tpu.memory_space<vmem>>, vector<36x8xbf16>
    %cst_23 = arith.constant dense<0.000000e+00> : vector<64x8xf32>
    %27 = tpu.matmul %25, %26, %cst_23 {dimension_numbers = #tpu.dot_dimension_numbers<[1], [0], [0], [1], [0, 0, 1, 1], [], []>} : vector<64x36xbf16>, vector<36x8xbf16>, vector<64x8xf32> -> vector<64x8xf32>
    %c0_24 = arith.constant 0 : index
    %c0_25 = arith.constant 0 : index
    %28 = vector.load %arg3[%c0_24, %c0_25] : memref<1x8xf32, #tpu.memory_space<vmem>>, vector<1x8xf32>
    %29 = vector.broadcast %28 : vector<1x8xf32> to vector<64x8xf32>
    %30 = arith.addf %27, %29 : vector<64x8xf32>
    %cst_26 = arith.constant 0.000000e+00 : f32
    %31 = vector.broadcast %cst_26 : f32 to vector<64x8xf32>
    %32 = arith.maximumf %30, %31 : vector<64x8xf32>
    %cst_27 = arith.constant 0.000000e+00 : bf16
    %33 = vector.broadcast %cst_27 : bf16 to vector<1x17x8xbf16>
    %c0_28 = arith.constant 0 : index
    %c0_29 = arith.constant 0 : index
    %c0_30 = arith.constant 0 : index
    %34 = vector.load %arg8[%c0_28, %c0_29, %c0_30] : memref<10x17x8xbf16, #tpu.memory_space<vmem>>, vector<1x17x8xbf16>
    tpu.vector_store %arg8[%c0_28, %c0_29, %c0_30], %33 {strides = array<i32>} : memref<10x17x8xbf16, #tpu.memory_space<vmem>>, vector<1x17x8xbf16>,
    %c9_31 = arith.constant 9 : index
    %c0_32 = arith.constant 0 : index
    %c0_33 = arith.constant 0 : index
    %35 = vector.load %arg8[%c9_31, %c0_32, %c0_33] : memref<10x17x8xbf16, #tpu.memory_space<vmem>>, vector<1x17x8xbf16>
    tpu.vector_store %arg8[%c9_31, %c0_32, %c0_33], %33 {strides = array<i32>} : memref<10x17x8xbf16, #tpu.memory_space<vmem>>, vector<1x17x8xbf16>,
    %cst_34 = arith.constant 0.000000e+00 : bf16
    %36 = vector.broadcast %cst_34 : bf16 to vector<8x8x8xbf16>
    %c1_35 = arith.constant 1 : index
    %c0_36 = arith.constant 0 : index
    %c0_37 = arith.constant 0 : index
    %37 = vector.load %arg8[%c1_35, %c0_36, %c0_37] : memref<10x17x8xbf16, #tpu.memory_space<vmem>>, vector<8x8x8xbf16>
    tpu.vector_store %arg8[%c1_35, %c0_36, %c0_37], %36 {strides = array<i32>} : memref<10x17x8xbf16, #tpu.memory_space<vmem>>, vector<8x8x8xbf16>,
    %cst_38 = arith.constant 0.000000e+00 : bf16
    %38 = vector.broadcast %cst_38 : bf16 to vector<8x1x8xbf16>
    %c1_39 = arith.constant 1 : index
    %c16_40 = arith.constant 16 : index
    %c0_41 = arith.constant 0 : index
    %39 = vector.load %arg8[%c1_39, %c16_40, %c0_41] : memref<10x17x8xbf16, #tpu.memory_space<vmem>>, vector<8x1x8xbf16>
    tpu.vector_store %arg8[%c1_39, %c16_40, %c0_41], %38 {strides = array<i32>} : memref<10x17x8xbf16, #tpu.memory_space<vmem>>, vector<8x1x8xbf16>,
    %40 = vector.shape_cast %32 : vector<64x8xf32> to vector<8x8x8xf32>
    %41 = arith.truncf %40 : vector<8x8x8xf32> to vector<8x8x8xbf16>
    %c1_42 = arith.constant 1 : index
    %c8_43 = arith.constant 8 : index
    %c0_44 = arith.constant 0 : index
    %42 = vector.load %arg8[%c1_42, %c8_43, %c0_44] : memref<10x17x8xbf16, #tpu.memory_space<vmem>>, vector<8x8x8xbf16>
    tpu.vector_store %arg8[%c1_42, %c8_43, %c0_44], %41 {strides = array<i32>} : memref<10x17x8xbf16, #tpu.memory_space<vmem>>, vector<8x8x8xbf16>,
    %c0_45 = arith.constant 0 : index
    %c0_46 = arith.constant 0 : index
    %c0_47 = arith.constant 0 : index
    %43 = vector.load %arg8[%c0_45, %c0_46, %c0_47] : memref<10x17x8xbf16, #tpu.memory_space<vmem>>, vector<10x17x8xbf16>
    %44 = vector.extract_strided_slice %43 {offsets = [0, 7, 0], sizes = [8, 8, 8], strides = [1, 1, 1]} : vector<10x17x8xbf16> to vector<8x8x8xbf16>
    %45 = vector.extract_strided_slice %43 {offsets = [0, 8, 0], sizes = [8, 8, 8], strides = [1, 1, 1]} : vector<10x17x8xbf16> to vector<8x8x8xbf16>
    %46 = vector.extract_strided_slice %43 {offsets = [0, 9, 0], sizes = [8, 8, 8], strides = [1, 1, 1]} : vector<10x17x8xbf16> to vector<8x8x8xbf16>
    %47 = vector.extract_strided_slice %43 {offsets = [1, 7, 0], sizes = [8, 8, 8], strides = [1, 1, 1]} : vector<10x17x8xbf16> to vector<8x8x8xbf16>
    %48 = vector.extract_strided_slice %43 {offsets = [1, 8, 0], sizes = [8, 8, 8], strides = [1, 1, 1]} : vector<10x17x8xbf16> to vector<8x8x8xbf16>
    %49 = vector.extract_strided_slice %43 {offsets = [1, 9, 0], sizes = [8, 8, 8], strides = [1, 1, 1]} : vector<10x17x8xbf16> to vector<8x8x8xbf16>
    %50 = vector.extract_strided_slice %43 {offsets = [2, 7, 0], sizes = [8, 8, 8], strides = [1, 1, 1]} : vector<10x17x8xbf16> to vector<8x8x8xbf16>
    %51 = vector.extract_strided_slice %43 {offsets = [2, 8, 0], sizes = [8, 8, 8], strides = [1, 1, 1]} : vector<10x17x8xbf16> to vector<8x8x8xbf16>
    %52 = vector.extract_strided_slice %43 {offsets = [2, 9, 0], sizes = [8, 8, 8], strides = [1, 1, 1]} : vector<10x17x8xbf16> to vector<8x8x8xbf16>
    %53 = tpu.concatenate %44, %45, %46, %47, %48, %49, %50, %51, %52 in 2 : vector<8x8x8xbf16>, vector<8x8x8xbf16>, vector<8x8x8xbf16>, vector<8x8x8xbf16>, vector<8x8x8xbf16>, vector<8x8x8xbf16>, vector<8x8x8xbf16>, vector<8x8x8xbf16>, vector<8x8x8xbf16> -> vector<8x8x72xbf16>
    %54 = vector.shape_cast %53 : vector<8x8x72xbf16> to vector<64x72xbf16>
    %c0_48 = arith.constant 0 : index
    %c0_49 = arith.constant 0 : index
    %55 = vector.load %arg4[%c0_48, %c0_49] : memref<72x8xbf16, #tpu.memory_space<vmem>>, vector<72x8xbf16>
    %cst_50 = arith.constant dense<0.000000e+00> : vector<64x8xf32>
    %56 = tpu.matmul %54, %55, %cst_50 {dimension_numbers = #tpu.dot_dimension_numbers<[1], [0], [0], [1], [0, 0, 1, 1], [], []>} : vector<64x72xbf16>, vector<72x8xbf16>, vector<64x8xf32> -> vector<64x8xf32>
    %c0_51 = arith.constant 0 : index
    %c0_52 = arith.constant 0 : index
    %57 = vector.load %arg5[%c0_51, %c0_52] : memref<1x8xf32, #tpu.memory_space<vmem>>, vector<1x8xf32>
    %58 = vector.broadcast %57 : vector<1x8xf32> to vector<64x8xf32>
    %59 = arith.addf %56, %58 : vector<64x8xf32>
    %cst_53 = arith.constant 0.000000e+00 : f32
    %60 = vector.broadcast %cst_53 : f32 to vector<64x8xf32>
    %61 = arith.maximumf %59, %60 : vector<64x8xf32>
    %62 = vector.shape_cast %61 : vector<64x8xf32> to vector<1x8x8x8xf32>
    %c0_54 = arith.constant 0 : index
    %c0_55 = arith.constant 0 : index
    %c0_56 = arith.constant 0 : index
    %c0_57 = arith.constant 0 : index
    %63 = vector.load %arg6[%c0_54, %c0_55, %c0_56, %c0_57] : memref<1x8x8x8xf32, #tpu.memory_space<vmem>>, vector<1x8x8x8xf32>
    tpu.vector_store %arg6[%c0_54, %c0_55, %c0_56, %c0_57], %62 {strides = array<i32>} : memref<1x8x8x8xf32, #tpu.memory_space<vmem>>, vector<1x8x8x8xf32>,
    return
  }
  func.func @transform_0(%arg0: i32) -> (i32, i32, i32, i32) {
    %c0_i32 = arith.constant 0 : i32
    %c0_i32_0 = arith.constant 0 : i32
    %c0_i32_1 = arith.constant 0 : i32
    %c0_i32_2 = arith.constant 0 : i32
    return %arg0, %c0_i32, %c0_i32_0, %c0_i32_1 : i32, i32, i32, i32
  }
  func.func @transform_1(%arg0: i32) -> (i32, i32) {
    %c0_i32 = arith.constant 0 : i32
    %c0_i32_0 = arith.constant 0 : i32
    %c0_i32_1 = arith.constant 0 : i32
    return %c0_i32, %c0_i32_0 : i32, i32
  }
  func.func @transform_2(%arg0: i32) -> (i32, i32) {
    %c0_i32 = arith.constant 0 : i32
    %c0_i32_0 = arith.constant 0 : i32
    %c0_i32_1 = arith.constant 0 : i32
    return %c0_i32, %c0_i32_0 : i32, i32
  }
  func.func @transform_3(%arg0: i32) -> (i32, i32) {
    %c0_i32 = arith.constant 0 : i32
    %c0_i32_0 = arith.constant 0 : i32
    %c0_i32_1 = arith.constant 0 : i32
    return %c0_i32, %c0_i32_0 : i32, i32
  }
  func.func @transform_4(%arg0: i32) -> (i32, i32) {
    %c0_i32 = arith.constant 0 : i32
    %c0_i32_0 = arith.constant 0 : i32
    %c0_i32_1 = arith.constant 0 : i32
    return %c0_i32, %c0_i32_0 : i32, i32
  }
  func.func @transform_5(%arg0: i32) -> (i32, i32, i32, i32) {
    %c0_i32 = arith.constant 0 : i32
    %c0_i32_0 = arith.constant 0 : i32
    %c0_i32_1 = arith.constant 0 : i32
    %c0_i32_2 = arith.constant 0 : i32
    return %arg0, %c0_i32, %c0_i32_0, %c0_i32_1 : i32, i32, i32, i32
  }
}

</mosaic_0001>

<bundles_post_ra>
// kernel: tpu_custom_call.1
= control target key start
LH: loop header
LB: loop body
LE: loop exit
PB: predicated region body
PF: predicated region fallthrough
CT: control target
= control target key end

     0   :  { %10 = vsyncpa [#allocation5], 0  ;;  %s4672_s0 = inlined_call_operand.vmem [shape: bf16[2,16,16,4], index: 0, kind: input, shape index: {}]   ;;  %s4673_s1 = inlined_call_operand.vmem [shape: bf16[36,8], index: 1, kind: input, shape index: {}]   ;;  %s4674_s2 = inlined_call_operand.vmem [shape: f32[1,8], index: 2, kind: input, shape index: {}]   ;;  %s4675_s3 = inlined_call_operand.vmem [shape: bf16[72,8], index: 3, kind: input, shape index: {}]   ;;  %s4676_s4 = inlined_call_operand.vmem [shape: f32[1,8], index: 4, kind: input, shape index: {}]   ;;  %s4677_s5 = inlined_call_operand.hbm [shape: f32[2,8,8,8], index: 5, kind: output, shape index: {}]  }
   0x1   :  { %12 = vsyncpa [#allocation5 + $0x1], 0  ;;  %s3445_s18 = smov 0   ;;  %s3447_s19 = smov 0  }
   0x2   :  { %s3449_s20 = smov 0   ;;  %s3451_s21 = smov 0  }
   0x3 LB: > { %s3466_s22 = sadd.s32 4294967295, %s3399_s21   ;;  %s3076_s23 = sadd.s32 4294967294, %s3399_s21   ;;  %s3399_s21 = sphi %s3451_s21, %s4689_s21   ;;  %s3395_s20 = sphi %s3449_s20, %s4688_s20   ;;  %s3391_s19 = sphi %s3447_s19, %s4687_s19   ;;  %s3387_s18 = sphi %s3445_s18, %s4686_s18  }
   0x4   : > { %s3470_s24 = sadd.s32 1, %s3399_s21   ;;  %s135_s25 = sadd.s32 1, %s3395_s20 }
   0x5   : > { %s132_s26 = ssub.s32 %s3399_s21, %s3470_s24  ;;  %p145_p0 = scmp.ne.s32.totalorder %s3395_s20, %s3391_s19 }
   0x6   : > { %p133_p1 = scmp.eq.s32.totalorder %s132_s26, 0  ;;  %p146_p2 = scmp.eq.s32.totalorder %s3466_s22, 1 }
   0x7   : > { %p151_p3 = scmp.ne.s32.totalorder %s3391_s19, %s3387_s18  ;;  %p152_p4 = scmp.eq.s32.totalorder %s3076_s23, 1 }
   0x8   : > { %s3481_s27 = scalar_select %p133_p1, %s3395_s20, %s135_s25  }
   0x9   : > { %p3483_p5 = por %p146_p2, %p145_p0  ;;  %p3487_p6 = por %p152_p4, %p151_p3 }
   0xa   : > { %p3079_p7 = scmp.ge.s32.totalorder %s3399_s21, 1  ;;  %p190_p8 = scmp.lt.s32.totalorder %s3399_s21, 3 }
   0xc   : > { %p191_p9 = pnand %p3079_p7, %p190_p8 }
   0xd   : > { %p218_p10 = scmp.lt.s32.totalorder (!%p191_p9), %s3466_s22, 1  ;;  %s3402_s10 = smov (!%p191_p9), 12  }
   0xe   : > { %194 = sbr.rel (%p191_p9) target bundleno = 1056 (0x420), region = 40  ;;  %s3403_s11 = smov (!%p191_p9), 24  }
   0xf   : > { %s3404_s12 = smov (!%p191_p9), 20   ;;  %s3405_s13 = smov (!%p191_p9), 8  }
  0x10   : > { %s3406_s14 = smov (!%p191_p9), 32   ;;  %s3407_s15 = smov (!%p191_p9), 4  }
  0x11   : > { %s3408_s16 = smov (!%p191_p9), 16   ;;  %s3409_s17 = smov (!%p191_p9), 28  }
  0x12   : > { %s3143_s23 = sshll.u32 (!%p191_p9), %s3466_s22, 6 }
  0x13   : > { %s219_s30 = scalar_select %p218_p10, %s3466_s22, 1  ;;  %vm288_vm0 = vcmask 31744   ;;  %vm385_vm1 = vcmask 1040384   ;;  %vm389_vm2 = vcmask 1041409   ;;  %vm1222_vm3 = vcmask 27648  }
  0x14   : > { %v3401_v6 = vmov 0   ;;  %vm393_vm4 = vcmask 1042434   ;;  %vm397_vm5 = vcmask 1043459   ;;  %vm709_vm6 = vcmask 25600   ;;  %s3010_s26 = scalar_lea.hbm %s4677_s5, %s3143_s23 }
  0x15   : > { %s3136_s6 = sshll.u32 %s219_s30, 7  ;;  %1243 = vst.msk [vmem:[#allocation2 + $0x48] sm:$0xf] %vm1222_vm3, %v3401_v6  ;;  %vm1401_vm7 = vcmask 1044484   ;;  %vm1403_vm8 = vcmask 1045509   ;;  %vm1405_vm9 = vcmask 1046534  }
  0x16   : > { %s3498_s9 = scalar_lea.vmem %s4672_s0, %s3136_s6  ;;  %1223 = vst.msk [vmem:[#allocation2] sm:$0xf] %vm1222_vm3, %v3401_v6  ;;  %vm1407_vm10 = vcmask 1047559   ;;  %vm1225_vm11 = vcmask 24576   ;;  %vm1226_vm12 = vsmask.f32 256 }
  0x17   : > { %v3257_v0 = vld [vmem:[%s3498_s9 + $0x50] sm:$0xff]   ;;  %v3258_v1 = vld [vmem:[%s3498_s9 + $0x58] sm:$0xff]   ;;  %1224 = vst.msk [vmem:[#allocation2 + $0x4] sm:$0xf] %vm1222_vm3, %v3401_v6  ;;  %vm3610_vm13 = vmand %vm1225_vm11, %vm1226_vm12  ;;  %vm1844_vm14 = vcmask 64512   ;;  %vm1861_vm15 = vcmask 97280  }
  0x18   : > { %v3186_v2 = vunpack.c.l.bf16 %v3257_v0  ;;  %v3187_v3 = vunpack.c.h.bf16 %v3257_v0  ;;  %v3190_v4 = vunpack.c.l.bf16 %v3258_v1  ;;  %v3191_v5 = vunpack.c.h.bf16 %v3258_v1  ;;  %v3253_v7 = vld [vmem:[%s3498_s9 + $0x30] sm:$0xff]   ;;  %v3254_v8 = vld [vmem:[%s3498_s9 + $0x38] sm:$0xff]   ;;  %1232 = vst.msk [vmem:[#allocation2 + $0x6c] sm:$0xf] %vm1222_vm3, %v3401_v6  ;;  %s3013_s6 = sshll.u32 %s3010_s26, 4  ;;  %s3014_s6 = int_to_ptr.hbm [resolvable:$true] %s3013_s6 }
  0x19   : > { %v3249_v9 = vld [vmem:[%s3498_s9 + $0x10] sm:$0xff]   ;;  %v3170_v16 = vunpack.c.l.bf16 %v3253_v7  ;;  %v3171_v17 = vunpack.c.h.bf16 %v3253_v7  ;;  %v3250_v18 = vld [vmem:[%s3498_s9 + $0x18] sm:$0xff]   ;;  %1233 = vst.msk [vmem:[#allocation2 + $0x70] sm:$0xf] %vm1222_vm3, %v3401_v6  ;;  %v3174_v19 = vunpack.c.l.bf16 %v3254_v8  ;;  %v3175_v20 = vunpack.c.h.bf16 %v3254_v8 }
  0x1a   : > { %v319_v10 = vsel %vm288_vm0, %v3186_v2, -inf  ;;  %v320_v11 = vsel %vm288_vm0, %v3190_v4, -inf  ;;  %v322_v12 = vsel %vm288_vm0, %v3187_v3, -inf  ;;  %v323_v13 = vsel %vm288_vm0, %v3191_v5, -inf  ;;  %1238 = vst.msk [vmem:[#allocation2 + $0xc] sm:$0xf] %vm1222_vm3, %v3401_v6 }
  0x1b   : > { %v321_v14 = vmax.f32 %v319_v10, %v320_v11  ;;  %v324_v15 = vmax.f32 %v322_v12, %v323_v13  ;;  %v3154_v21 = vunpack.c.l.bf16 %v3249_v9  ;;  %v3155_v22 = vunpack.c.h.bf16 %v3249_v9  ;;  %1239 = vst.msk [vmem:[#allocation2 + $0x18] sm:$0xf] %vm1222_vm3, %v3401_v6 }
  0x1c   : > { %v307_v25 = vsel %vm288_vm0, %v3170_v16, -inf  ;;  %v310_v26 = vsel %vm288_vm0, %v3171_v17, -inf  ;;  %v308_v27 = vsel %vm288_vm0, %v3174_v19, -inf  ;;  %v311_v28 = vsel %vm288_vm0, %v3175_v20, -inf  ;;  %1240 = vst.msk [vmem:[#allocation2 + $0x24] sm:$0xf] %vm1222_vm3, %v3401_v6 }
  0x1d   : > { %v347_v23 = vpack.c.bf16 %v321_v14, %v321_v14  ;;  %v348_v24 = vpack.c.bf16 %v324_v15, %v324_v15  ;;  %v3158_v29 = vunpack.c.l.bf16 %v3250_v18  ;;  %v3159_v30 = vunpack.c.h.bf16 %v3250_v18  ;;  %1241 = vst.msk [vmem:[#allocation2 + $0x30] sm:$0xf] %vm1222_vm3, %v3401_v6 }
  0x1e   : > { %v3530_v33 = vmax.f32 %v307_v25, %v308_v27  ;;  %v3532_v34 = vmax.f32 %v310_v26, %v311_v28  ;;  %v3537_v35 = vsel %vm288_vm0, %v3154_v21, -inf  ;;  %v3543_v37 = vsel %vm288_vm0, %v3155_v22, -inf  ;;  %1242 = vst.msk [vmem:[#allocation2 + $0x3c] sm:$0xf] %vm1222_vm3, %v3401_v6 }
  0x1f   : > { %v379_v31 = vrot.slane %v347_v23, 3  ;;  %v380_v32 = vrot.slane %v348_v24, 3  ;;  %v3540_v36 = vsel %vm288_vm0, %v3158_v29, -inf  ;;  %v3546_v38 = vsel %vm288_vm0, %v3159_v30, -inf  ;;  %1244 = vst.msk [vmem:[#allocation2 + $0x54] sm:$0xf] %vm1222_vm3, %v3401_v6 }
  0x20   : > { %1245 = vst.msk [vmem:[#allocation2 + $0x60] sm:$0xf] %vm1222_vm3, %v3401_v6 }
  0x21   : > { %v511_v39 = vsel %vm385_vm1, %v347_v23, %v379_v31  ;;  %v512_v40 = vsel %vm389_vm2, %v347_v23, %v379_v31  ;;  %v515_v41 = vsel %vm393_vm4, %v347_v23, %v379_v31  ;;  %v518_v42 = vsel %vm397_vm5, %v347_v23, %v379_v31 }
  0x22   : > { %v514_v43 = vrot.slane %v512_v40, 1  ;;  %v517_v44 = vrot.slane %v515_v41, 2  ;;  %v520_v45 = vrot.slane %v518_v42, 3  ;;  %v523_v46 = vsel %vm385_vm1, %v348_v24, %v380_v32 }
  0x23   : > { %v524_v47 = vsel %vm389_vm2, %v348_v24, %v380_v32  ;;  %v527_v48 = vsel %vm393_vm4, %v348_v24, %v380_v32  ;;  %v530_v49 = vsel %vm397_vm5, %v348_v24, %v380_v32  ;;  %v685_v50 = vunpack.c.l.bf16 %v511_v39 }
  0x24   : > { %v526_v51 = vrot.slane %v524_v47, 1  ;;  %v529_v52 = vrot.slane %v527_v48, 2  ;;  %v532_v53 = vrot.slane %v530_v49, 3  ;;  %v686_v54 = vunpack.c.l.bf16 %v514_v43 }
  0x25   : > { %v687_v55 = vunpack.c.l.bf16 %v517_v44  ;;  %v688_v56 = vunpack.c.l.bf16 %v520_v45  ;;  %v689_v57 = vunpack.c.l.bf16 %v523_v46  ;;  %v990_v58 = vsel %vm709_vm6, %v685_v50, -inf }
  0x26   : > { %v690_v59 = vunpack.c.l.bf16 %v526_v51  ;;  %v691_v60 = vunpack.c.l.bf16 %v529_v52  ;;  %v692_v61 = vunpack.c.l.bf16 %v532_v53  ;;  %v991_v62 = vrot.slane %v990_v58, 4 }
  0x27   : > { %v997_v63 = vsel %vm709_vm6, %v686_v54, -inf  ;;  %v1004_v0 = vsel %vm709_vm6, %v687_v55, -inf  ;;  %v1011_v1 = vsel %vm709_vm6, %v688_v56, -inf  ;;  %v1018_v2 = vsel %vm709_vm6, %v689_v57, -inf }
  0x28   : > { %v992_v3 = vmax.f32 %v990_v58, %v991_v62  ;;  %v998_v4 = vrot.slane %v997_v63, 4  ;;  %v1005_v5 = vrot.slane %v1004_v0, 4  ;;  %v1012_v7 = vrot.slane %v1011_v1, 4 }
  0x29   : > { %v1019_v8 = vrot.slane %v1018_v2, 4  ;;  %v1025_v9 = vsel %vm709_vm6, %v690_v59, -inf  ;;  %v1032_v10 = vsel %vm709_vm6, %v691_v60, -inf  ;;  %v1039_v11 = vsel %vm709_vm6, %v692_v61, -inf }
  0x2a   : > { %v993_v12 = vrot.slane %v992_v3, 2  ;;  %v999_v13 = vmax.f32 %v997_v63, %v998_v4  ;;  %v1006_v14 = vmax.f32 %v1004_v0, %v1005_v5  ;;  %v1013_v15 = vmax.f32 %v1011_v1, %v1012_v7 }
  0x2b   : > { %v1020_v16 = vmax.f32 %v1018_v2, %v1019_v8  ;;  %v1026_v17 = vrot.slane %v1025_v9, 4  ;;  %v1033_v18 = vrot.slane %v1032_v10, 4  ;;  %v1040_v19 = vrot.slane %v1039_v11, 4 }
  0x2c   : > { %v994_v20 = vmax.f32 %v992_v3, %v993_v12  ;;  %v1000_v21 = vrot.slane %v999_v13, 2  ;;  %v1007_v22 = vrot.slane %v1006_v14, 2  ;;  %v1014_v23 = vrot.slane %v1013_v15, 2 }
  0x2d   : > { %v1021_v24 = vrot.slane %v1020_v16, 2  ;;  %v1027_v25 = vmax.f32 %v1025_v9, %v1026_v17  ;;  %v1034_v26 = vmax.f32 %v1032_v10, %v1033_v18  ;;  %v1041_v27 = vmax.f32 %v1039_v11, %v1040_v19 }
  0x2e   : > { %v995_v28 = vrot.slane %v994_v20, 1  ;;  %v1001_v29 = vmax.f32 %v999_v13, %v1000_v21  ;;  %v1008_v30 = vmax.f32 %v1006_v14, %v1007_v22  ;;  %v1015_v31 = vmax.f32 %v1013_v15, %v1014_v23 }
  0x2f   : > { %v1022_v32 = vmax.f32 %v1020_v16, %v1021_v24  ;;  %v1028_v39 = vrot.slane %v1027_v25, 2  ;;  %v1035_v40 = vrot.slane %v1034_v26, 2  ;;  %v1042_v41 = vrot.slane %v1041_v27, 2 }
  0x30   : > { %v996_v42 = vmax.f32 %v994_v20, %v995_v28  ;;  %v1002_v43 = vrot.slane %v1001_v29, 1  ;;  %v1009_v44 = vrot.slane %v1008_v30, 1  ;;  %v1016_v45 = vrot.slane %v1015_v31, 1 }
  0x31   : > { %v1023_v46 = vrot.slane %v1022_v32, 1  ;;  %v1029_v47 = vmax.f32 %v1027_v25, %v1028_v39  ;;  %v1036_v48 = vmax.f32 %v1034_v26, %v1035_v40  ;;  %v1043_v49 = vmax.f32 %v1041_v27, %v1042_v41 }
  0x32   : > { %v1003_v50 = vmax.f32 %v1001_v29, %v1002_v43  ;;  %v1010_v51 = vmax.f32 %v1008_v30, %v1009_v44  ;;  %v1017_v52 = vmax.f32 %v1015_v31, %v1016_v45  ;;  %v1198_v53 = vpack.c.bf16 %v996_v42, %v996_v42 }
  0x33   : > { %v1024_v54 = vmax.f32 %v1022_v32, %v1023_v46  ;;  %v1030_v55 = vrot.slane %v1029_v47, 1  ;;  %v1037_v56 = vrot.slane %v1036_v48, 1  ;;  %v1044_v57 = vrot.slane %v1043_v49, 1 }
  0x34   : > { %v1199_v58 = vpack.c.bf16 %v1003_v50, %v1003_v50  ;;  %v1200_v59 = vpack.c.bf16 %v1010_v51, %v1010_v51  ;;  %v1201_v60 = vpack.c.bf16 %v1017_v52, %v1017_v52  ;;  %v1374_v61 = vunpack.c.l.b16 %v1198_v53 }
  0x35   : > { %v1031_v62 = vmax.f32 %v1029_v47, %v1030_v55  ;;  %v1038_v63 = vmax.f32 %v1036_v48, %v1037_v56  ;;  %v1045_v0 = vmax.f32 %v1043_v49, %v1044_v57  ;;  %v1202_v1 = vpack.c.bf16 %v1024_v54, %v1024_v54 }
  0x36   : > { %v1375_v2 = vunpack.c.l.b16 %v1199_v58  ;;  %v1376_v3 = vunpack.c.l.b16 %v1200_v59  ;;  %v1377_v4 = vunpack.c.l.b16 %v1201_v60  ;;  %v343_v5 = vpack.c.bf16 %v3530_v33, %v3530_v33 }
  0x37   : > { %v1203_v7 = vpack.c.bf16 %v1031_v62, %v1031_v62  ;;  %v1204_v8 = vpack.c.bf16 %v1038_v63, %v1038_v63  ;;  %v1205_v9 = vpack.c.bf16 %v1045_v0, %v1045_v0  ;;  %v1378_v10 = vunpack.c.l.b16 %v1202_v1 }
  0x38   : > { %v1437_v11 = vsel %vm389_vm2, %v1375_v2, %v1374_v61  ;;  %v344_v12 = vpack.c.bf16 %v3532_v34, %v3532_v34  ;;  %v375_v13 = vrot.slane %v343_v5, 3  ;;  %v3577_v14 = vmax.f32 %v3537_v35, %v3540_v36 }
  0x39   : > { %v1379_v15 = vunpack.c.l.b16 %v1203_v7  ;;  %v1380_v16 = vunpack.c.l.b16 %v1204_v8  ;;  %v1381_v17 = vunpack.c.l.b16 %v1205_v9  ;;  %v1438_v18 = vsel %vm393_vm4, %v1376_v3, %v1437_v11 }
  0x3a   : > { %v1439_v33 = vsel %vm397_vm5, %v1377_v4, %v1438_v18  ;;  %v376_v19 = vrot.slane %v344_v12, 3  ;;  %v463_v20 = vsel %vm385_vm1, %v343_v5, %v375_v13  ;;  %v464_v21 = vsel %vm389_vm2, %v343_v5, %v375_v13 }
  0x3b   : > { %v1440_v22 = vsel %vm1401_vm7, %v1378_v10, %v1439_v33  ;;  %v466_v34 = vrot.slane %v464_v21, 1  ;;  %v467_v23 = vsel %vm393_vm4, %v343_v5, %v375_v13  ;;  %v470_v35 = vsel %vm397_vm5, %v343_v5, %v375_v13 }
  0x3c   : > { %v1441_v36 = vsel %vm1403_vm8, %v1379_v15, %v1440_v22  ;;  %v469_v24 = vrot.slane %v467_v23, 2  ;;  %v472_v25 = vrot.slane %v470_v35, 3  ;;  %v475_v26 = vsel %vm385_vm1, %v344_v12, %v376_v19 }
  0x3d   : > { %v1442_v27 = vsel %vm1405_vm9, %v1380_v16, %v1441_v36  ;;  %v476_v28 = vsel %vm389_vm2, %v344_v12, %v376_v19  ;;  %v479_v29 = vsel %vm393_vm4, %v344_v12, %v376_v19  ;;  %v482_v30 = vsel %vm397_vm5, %v344_v12, %v376_v19 }
  0x3e   : > { %v1443_v31 = vsel %vm1407_vm10, %v1381_v17, %v1442_v27  ;;  %v478_v32 = vrot.slane %v476_v28, 1  ;;  %v481_v39 = vrot.slane %v479_v29, 2  ;;  %v484_v40 = vrot.slane %v482_v30, 3 }
  0x3f   : > { %v1463_v41 = vpack.c.b16 %v1443_v31, %v1443_v31  ;;  %v669_v42 = vunpack.c.l.bf16 %v463_v20  ;;  %v670_v43 = vunpack.c.l.bf16 %v466_v34  ;;  %v671_v44 = vunpack.c.l.bf16 %v469_v24 }
  0x40   : > { %v672_v45 = vunpack.c.l.bf16 %v472_v25  ;;  %v673_v46 = vunpack.c.l.bf16 %v475_v26  ;;  %v674_v47 = vunpack.c.l.bf16 %v478_v32  ;;  %v675_v48 = vunpack.c.l.bf16 %v481_v39 }
  0x41   : > { %1479 = vst.msk [vmem:[#allocation2 + $0x4c] sm:$0xf] %vm1222_vm3, %v1463_v41  ;;  %v676_v49 = vunpack.c.l.bf16 %v484_v40  ;;  %v878_v50 = vsel %vm709_vm6, %v669_v42, -inf  ;;  %v885_v51 = vsel %vm709_vm6, %v670_v43, -inf  ;;  %v892_v52 = vsel %vm709_vm6, %v671_v44, -inf }
  0x42   : > { %v879_v53 = vrot.slane %v878_v50, 4  ;;  %v886_v54 = vrot.slane %v885_v51, 4  ;;  %v893_v55 = vrot.slane %v892_v52, 4  ;;  %v899_v56 = vsel %vm709_vm6, %v672_v45, -inf }
  0x43   : > { %v900_v57 = vrot.slane %v899_v56, 4  ;;  %v906_v58 = vsel %vm709_vm6, %v673_v46, -inf  ;;  %v913_v59 = vsel %vm709_vm6, %v674_v47, -inf  ;;  %v920_v60 = vsel %vm709_vm6, %v675_v48, -inf }
  0x44   : > { %v880_v61 = vmax.f32 %v878_v50, %v879_v53  ;;  %v887_v62 = vmax.f32 %v885_v51, %v886_v54  ;;  %v894_v63 = vmax.f32 %v892_v52, %v893_v55  ;;  %v907_v0 = vrot.slane %v906_v58, 4 }
  0x45   : > { %v901_v1 = vmax.f32 %v899_v56, %v900_v57  ;;  %v914_v2 = vrot.slane %v913_v59, 4  ;;  %v921_v3 = vrot.slane %v920_v60, 4  ;;  %v927_v4 = vsel %vm709_vm6, %v676_v49, -inf }
  0x46   : > { %v881_v5 = vrot.slane %v880_v61, 2  ;;  %v888_v7 = vrot.slane %v887_v62, 2  ;;  %v895_v8 = vrot.slane %v894_v63, 2  ;;  %v908_v9 = vmax.f32 %v906_v58, %v907_v0  ;;  %v1255_v58 = vld [vmem:[#allocation2 + $0x38] sm:$0x1] }
  0x47   : > { %v902_v10 = vrot.slane %v901_v1, 2  ;;  %v915_v11 = vmax.f32 %v913_v59, %v914_v2  ;;  %v922_v12 = vmax.f32 %v920_v60, %v921_v3  ;;  %v928_v13 = vrot.slane %v927_v4, 4 }
  0x48   : > { %v3602_v15 = vld [vmem:[#allocation2 + $0x48] sm:$0xff]   ;;  %v882_v16 = vmax.f32 %v880_v61, %v881_v5  ;;  %v889_v17 = vmax.f32 %v887_v62, %v888_v7  ;;  %v896_v18 = vmax.f32 %v894_v63, %v895_v8  ;;  %v909_v33 = vrot.slane %v908_v9, 2  ;;  %v3255_v61 = vld [vmem:[%s3498_s9 + $0x40] sm:$0xff]  }
  0x49   : > { %1703 = vrot.lane.b32.xlu0 %v3602_v15, %s3402_s10  ;;  %v903_v19 = vmax.f32 %v901_v1, %v902_v10  ;;  %v916_v20 = vrot.slane %v915_v11, 2  ;;  %v923_v21 = vrot.slane %v922_v12, 2  ;;  %v929_v22 = vmax.f32 %v927_v4, %v928_v13  ;;  %v3620_v7 = vld [vmem:[%s3498_s9 + $0x48] sm:$0xff]  }
  0x4a   : > { %v883_v34 = vrot.slane %v882_v16, 1  ;;  %v890_v23 = vrot.slane %v889_v17, 1  ;;  %v897_v35 = vrot.slane %v896_v18, 1  ;;  %v910_v36 = vmax.f32 %v908_v9, %v909_v33 }
  0x4b   : > { %v904_v24 = vrot.slane %v903_v19, 1  ;;  %v917_v25 = vmax.f32 %v915_v11, %v916_v20  ;;  %v924_v26 = vmax.f32 %v922_v12, %v923_v21  ;;  %v930_v27 = vrot.slane %v929_v22, 2  ;;  %v1249_v11 = vld [vmem:[#allocation2 + $0x20] sm:$0x1] }
  0x4c   : > { %v884_v28 = vmax.f32 %v882_v16, %v883_v34  ;;  %v891_v29 = vmax.f32 %v889_v17, %v890_v23  ;;  %v898_v30 = vmax.f32 %v896_v18, %v897_v35  ;;  %v911_v31 = vrot.slane %v910_v36, 1 }
  0x4d   : > { %v905_v32 = vmax.f32 %v903_v19, %v904_v24  ;;  %v918_v39 = vrot.slane %v917_v25, 1  ;;  %v925_v40 = vrot.slane %v924_v26, 1  ;;  %v931_v41 = vmax.f32 %v929_v22, %v930_v27 }
  0x4e   : > { %v912_v42 = vmax.f32 %v910_v36, %v911_v31  ;;  %v1182_v43 = vpack.c.bf16 %v884_v28, %v884_v28  ;;  %v1183_v44 = vpack.c.bf16 %v891_v29, %v891_v29  ;;  %v1184_v45 = vpack.c.bf16 %v898_v30, %v898_v30 }
  0x4f   : > { %v919_v46 = vmax.f32 %v917_v25, %v918_v39  ;;  %v926_v47 = vmax.f32 %v924_v26, %v925_v40  ;;  %v932_v48 = vrot.slane %v931_v41, 1  ;;  %v1185_v49 = vpack.c.bf16 %v905_v32, %v905_v32 }
  0x50   : > { %v1186_v50 = vpack.c.bf16 %v912_v42, %v912_v42  ;;  %v1358_v51 = vunpack.c.l.b16 %v1182_v43  ;;  %v1359_v52 = vunpack.c.l.b16 %v1183_v44  ;;  %v1360_v53 = vunpack.c.l.b16 %v1184_v45 }
  0x51   : > { %v933_v54 = vmax.f32 %v931_v41, %v932_v48  ;;  %v1187_v55 = vpack.c.bf16 %v919_v46, %v919_v46  ;;  %v1188_v56 = vpack.c.bf16 %v926_v47, %v926_v47  ;;  %v1361_v57 = vunpack.c.l.b16 %v1185_v49 }
  0x52   : > { %v1362_v59 = vunpack.c.l.b16 %v1186_v50  ;;  %v1423_v60 = vsel %vm389_vm2, %v1359_v52, %v1358_v51  ;;  %v1256_v4 = vsel %vm3610_vm13, 0, %v1255_v58  ;;  %v300_v5 = vmax.f32 %v3543_v37, %v3546_v38 }
  0x53   : > { %v1189_v62 = vpack.c.bf16 %v933_v54, %v933_v54  ;;  %v1363_v63 = vunpack.c.l.b16 %v1187_v55  ;;  %v1364_v0 = vunpack.c.l.b16 %v1188_v56  ;;  %v1424_v1 = vsel %vm393_vm4, %v1360_v53, %v1423_v60  ;;  %1257 = vst [vmem:[#allocation2 + $0x38] sm:$0x1] %v1256_v4 }
  0x54   : > { %v1425_v3 = vsel %vm397_vm5, %v1361_v57, %v1424_v1  ;;  %v339_v10 = vpack.c.bf16 %v3577_v14, %v3577_v14  ;;  %v3178_v12 = vunpack.c.l.bf16 %v3255_v61  ;;  %v340_v16 = vpack.c.bf16 %v300_v5, %v300_v5 }
  0x55   : > { %v1365_v8 = vunpack.c.l.b16 %v1189_v62  ;;  %v1426_v9 = vsel %vm1401_vm7, %v1362_v59, %v1425_v3  ;;  %v1250_v17 = vsel %vm3610_vm13, 0, %v1249_v11  ;;  %v3179_v18 = vunpack.c.h.bf16 %v3255_v61 }
  0x56   : > { %v1427_v13 = vsel %vm1403_vm8, %v1363_v63, %v1426_v9  ;;  %v371_v38 = vrot.slane %v339_v10, 3  ;;  %1251 = vst [vmem:[#allocation2 + $0x20] sm:$0x1] %v1250_v17  ;;  %v3182_v33 = vunpack.c.l.bf16 %v3620_v7  ;;  %v3183_v19 = vunpack.c.h.bf16 %v3620_v7 }
  0x57   : > { %v1428_v37 = vsel %vm1405_vm9, %v1364_v0, %v1427_v13  ;;  %v372_v14 = vrot.slane %v340_v16, 3  ;;  %v3633_v21 = vsel %vm288_vm0, %v3178_v12, -inf  ;;  %v3636_v22 = vsel %vm288_vm0, %v3179_v18, -inf }
  0x58   : > { %v1429_v20 = vsel %vm1407_vm10, %v1365_v8, %v1428_v37  ;;  %v415_v23 = vsel %vm385_vm1, %v339_v10, %v371_v38  ;;  %v416_v35 = vsel %vm389_vm2, %v339_v10, %v371_v38  ;;  %v419_v36 = vsel %vm393_vm4, %v339_v10, %v371_v38 }
  0x59   : > { %v1461_v34 = vpack.c.b16 %v1429_v20, %v1429_v20  ;;  %v418_v24 = vrot.slane %v416_v35, 1  ;;  %v421_v25 = vrot.slane %v419_v36, 2  ;;  %v422_v26 = vsel %vm397_vm5, %v339_v10, %v371_v38 }
  0x5a   : > { %v427_v27 = vsel %vm385_vm1, %v340_v16, %v372_v14  ;;  %v424_v28 = vrot.slane %v422_v26, 3  ;;  %v428_v29 = vsel %vm389_vm2, %v340_v16, %v372_v14  ;;  %v431_v30 = vsel %vm393_vm4, %v340_v16, %v372_v14  ;;  %v1496_v32 = vld [vmem:[#allocation2 + $0x38] sm:$0x1] }
  0x5b   : > { %1477 = vst.msk [vmem:[#allocation2 + $0x34] sm:$0xf] %vm1222_vm3, %v1461_v34  ;;  %v434_v31 = vsel %vm397_vm5, %v340_v16, %v372_v14  ;;  %v430_v39 = vrot.slane %v428_v29, 1  ;;  %v433_v40 = vrot.slane %v431_v30, 2  ;;  %v653_v42 = vunpack.c.l.bf16 %v415_v23 }
  0x5c   : > { %v436_v41 = vrot.slane %v434_v31, 3  ;;  %v1652_v43 = vunpack.c.l.b16 %v1496_v32  ;;  %v654_v44 = vunpack.c.l.bf16 %v418_v24  ;;  %v655_v45 = vunpack.c.l.bf16 %v421_v25 }
  0x5d   : > { %v656_v46 = vunpack.c.l.bf16 %v424_v28  ;;  %v657_v47 = vunpack.c.l.bf16 %v427_v27  ;;  %v658_v48 = vunpack.c.l.bf16 %v430_v39  ;;  %v659_v49 = vunpack.c.l.bf16 %v433_v40 }
  0x5e   : > { %v660_v50 = vunpack.c.l.bf16 %v436_v41  ;;  %v766_v51 = vsel %vm709_vm6, %v653_v42, -inf  ;;  %v773_v52 = vsel %vm709_vm6, %v654_v44, -inf  ;;  %v780_v53 = vsel %vm709_vm6, %v655_v45, -inf }
  0x5f   : > { %v787_v54 = vsel %vm709_vm6, %v656_v46, -inf  ;;  %v767_v55 = vrot.slane %v766_v51, 4  ;;  %v774_v56 = vrot.slane %v773_v52, 4  ;;  %v781_v57 = vrot.slane %v780_v53, 4 }
  0x60   : > { %v788_v58 = vrot.slane %v787_v54, 4  ;;  %v794_v59 = vsel %vm709_vm6, %v657_v47, -inf  ;;  %v801_v60 = vsel %vm709_vm6, %v658_v48, -inf  ;;  %v808_v61 = vsel %vm709_vm6, %v659_v49, -inf }
  0x61   : > { %v815_v62 = vsel %vm709_vm6, %v660_v50, -inf  ;;  %v768_v0 = vmax.f32 %v766_v51, %v767_v55  ;;  %v775_v1 = vmax.f32 %v773_v52, %v774_v56  ;;  %v782_v3 = vmax.f32 %v780_v53, %v781_v57  ;;  %v3666_v56 = vld [vmem:[#allocation2 + $0x20] sm:$0x1] }
  0x62   : > { %v3264_v63 = vld [vmem:[#allocation2 + $0x30] sm:$0xff]   ;;  %v789_v4 = vmax.f32 %v787_v54, %v788_v58  ;;  %v795_v8 = vrot.slane %v794_v59, 4  ;;  %v802_v9 = vrot.slane %v801_v60, 4  ;;  %v809_v10 = vrot.slane %v808_v61, 4 }
  0x63   : > { %1763 = vrot.lane.b32.xlu1 %v3264_v63, %s3403_s11  ;;  %1699 = vrot.lane.b32.xlu2 %v3264_v63, %s3402_s10  ;;  %v3657_v5 = vunpack.c.h.b16 %v3264_v63  ;;  %v769_v11 = vrot.slane %v768_v0, 2  ;;  %v776_v12 = vrot.slane %v775_v1, 2  ;;  %v783_v13 = vrot.slane %v782_v3, 2 }
  0x64   : > { %v790_v16 = vrot.slane %v789_v4, 2  ;;  %v796_v18 = vmax.f32 %v794_v59, %v795_v8  ;;  %v803_v37 = vmax.f32 %v801_v60, %v802_v9  ;;  %v810_v38 = vmax.f32 %v808_v61, %v809_v10  ;;  %v3252_v10 = vld [vmem:[%s3498_s9 + $0x28] sm:$0xff]  }
  0x65   : > { %v1660_v17 = vpack.c.b16 %v1652_v43, %v3657_v5  ;;  %v770_v20 = vmax.f32 %v768_v0, %v769_v11  ;;  %v777_v14 = vmax.f32 %v775_v1, %v776_v12  ;;  %v784_v34 = vmax.f32 %v782_v3, %v783_v13  ;;  %v3251_v1 = vld [vmem:[%s3498_s9 + $0x20] sm:$0xff]  }
  0x66   : > { %v791_v23 = vmax.f32 %v789_v4, %v790_v16  ;;  %v797_v36 = vrot.slane %v796_v18, 2  ;;  %v804_v24 = vrot.slane %v803_v37, 2  ;;  %v811_v25 = vrot.slane %v810_v38, 2 }
  0x67   : > { %v3660_v35 = vrot.slane %v1660_v17, 5  ;;  %v771_v26 = vrot.slane %v770_v20, 1  ;;  %v778_v27 = vrot.slane %v777_v14, 1  ;;  %v785_v28 = vrot.slane %v784_v34, 1 }
  0x68   : > { %v792_v29 = vrot.slane %v791_v23, 1  ;;  %v798_v30 = vmax.f32 %v796_v18, %v797_v36  ;;  %v805_v31 = vmax.f32 %v803_v37, %v804_v24  ;;  %v812_v32 = vmax.f32 %v810_v38, %v811_v25 }
  0x69   : > { %1744 = vrot.lane.b32.xlu0 %v3660_v35, %s3404_s12  ;;  %v816_v39 = vrot.slane %v815_v62, 4  ;;  %v772_v40 = vmax.f32 %v770_v20, %v771_v26  ;;  %v779_v41 = vmax.f32 %v777_v14, %v778_v27  ;;  %v786_v42 = vmax.f32 %v784_v34, %v785_v28 }
  0x6a   : > { %v793_v43 = vmax.f32 %v791_v23, %v792_v29  ;;  %v799_v44 = vrot.slane %v798_v30, 1  ;;  %v806_v45 = vrot.slane %v805_v31, 1  ;;  %v813_v46 = vrot.slane %v812_v32, 1  ;;  %v1258_v29 = vld [vmem:[#allocation2 + $0x44] sm:$0x1] }
  0x6b   : > { %1767 = vrot.lane.b32.xlu2 %v3602_v15, %s3403_s11  ;;  %v817_v47 = vmax.f32 %v815_v62, %v816_v39  ;;  %v1166_v48 = vpack.c.bf16 %v772_v40, %v772_v40  ;;  %v1167_v49 = vpack.c.bf16 %v779_v41, %v779_v41  ;;  %v1168_v50 = vpack.c.bf16 %v786_v42, %v786_v42 }
  0x6c   : > { %v1169_v51 = vpack.c.bf16 %v793_v43, %v793_v43  ;;  %v800_v52 = vmax.f32 %v798_v30, %v799_v44  ;;  %v807_v53 = vmax.f32 %v805_v31, %v806_v45  ;;  %v814_v54 = vmax.f32 %v812_v32, %v813_v46 }
  0x6d   : > { %v818_v55 = vrot.slane %v817_v47, 2  ;;  %v1342_v57 = vunpack.c.l.b16 %v1166_v48  ;;  %v1343_v58 = vunpack.c.l.b16 %v1167_v49  ;;  %v1344_v59 = vunpack.c.l.b16 %v1168_v50 }
  0x6e   : > { %v1345_v60 = vunpack.c.l.b16 %v1169_v51  ;;  %v1170_v63 = vpack.c.bf16 %v800_v52, %v800_v52  ;;  %v1171_v0 = vpack.c.bf16 %v807_v53, %v807_v53  ;;  %v1172_v62 = vpack.c.bf16 %v814_v54, %v814_v54 }
  0x6f   : > { %v819_v61 = vmax.f32 %v817_v47, %v818_v55  ;;  %v1409_v3 = vsel %vm389_vm2, %v1343_v58, %v1342_v57  ;;  %v1650_v4 = vunpack.c.l.b16 %v3666_v56  ;;  %v314_v8 = vsel %vm288_vm0, %v3182_v33, -inf }
  0x70   : > { %v317_v9 = vsel %vm288_vm0, %v3183_v19, -inf  ;;  %v1346_v12 = vunpack.c.l.b16 %v1170_v63  ;;  %v1347_v13 = vunpack.c.l.b16 %v1171_v0  ;;  %v1348_v16 = vunpack.c.l.b16 %v1172_v62 }
  0x71   : > { %v820_v11 = vrot.slane %v819_v61, 1  ;;  %v1410_v17 = vsel %vm393_vm4, %v1344_v59, %v1409_v3  ;;  %v315_v18 = vmax.f32 %v3633_v21, %v314_v8  ;;  %v318_v37 = vmax.f32 %v3636_v22, %v317_v9 }
  0x72   : > { %v3162_v38 = vunpack.c.l.bf16 %v3251_v1  ;;  %v1411_v14 = vsel %vm397_vm5, %v1345_v60, %v1410_v17  ;;  %v3163_v33 = vunpack.c.h.bf16 %v3251_v1  ;;  %v3166_v34 = vunpack.c.l.bf16 %v3252_v10 }
  0x73   : > { %v821_v20 = vmax.f32 %v819_v61, %v820_v11  ;;  %v1412_v7 = vsel %vm1401_vm7, %v1346_v12, %v1411_v14  ;;  %v345_v19 = vpack.c.bf16 %v315_v18, %v315_v18  ;;  %v346_v23 = vpack.c.bf16 %v318_v37, %v318_v37 }
  0x74   : > { %v3167_v36 = vunpack.c.h.bf16 %v3252_v10  ;;  %v1413_v25 = vsel %vm1403_vm8, %v1347_v13, %v1412_v7  ;;  %v301_v26 = vsel %vm288_vm0, %v3162_v38, -inf  ;;  %v302_v21 = vsel %vm288_vm0, %v3166_v34, -inf }
  0x75   : > { %v1173_v24 = vpack.c.bf16 %v821_v20, %v821_v20  ;;  %v1414_v22 = vsel %vm1405_vm9, %v1348_v16, %v1413_v25  ;;  %v377_v27 = vrot.slane %v345_v19, 3  ;;  %v378_v28 = vrot.slane %v346_v23, 3 }
  0x76   : > { %v3687_v30 = vmax.f32 %v301_v26, %v302_v21  ;;  %v1259_v32 = vsel %vm3610_vm13, 0, %v1258_v29  ;;  %v3692_v39 = vsel %vm288_vm0, %v3163_v33, -inf  ;;  %v3695_v40 = vsel %vm288_vm0, %v3167_v36, -inf }
  0x77   : > { %v1349_v31 = vunpack.c.l.b16 %v1173_v24  ;;  %v487_v41 = vsel %vm385_vm1, %v345_v19, %v377_v27  ;;  %v488_v42 = vsel %vm389_vm2, %v345_v19, %v377_v27  ;;  %v491_v43 = vsel %vm393_vm4, %v345_v19, %v377_v27  ;;  %1260 = vst [vmem:[#allocation2 + $0x44] sm:$0x1] %v1259_v32 }
  0x78   : > { %v494_v44 = vsel %vm397_vm5, %v345_v19, %v377_v27  ;;  %v490_v46 = vrot.slane %v488_v42, 1  ;;  %v493_v47 = vrot.slane %v491_v43, 2  ;;  %v499_v50 = vsel %vm385_vm1, %v346_v23, %v378_v28 }
  0x79   : > { %v1415_v45 = vsel %vm1407_vm10, %v1349_v31, %v1414_v22  ;;  %v496_v48 = vrot.slane %v494_v44, 3  ;;  %v500_v51 = vsel %vm389_vm2, %v346_v23, %v378_v28  ;;  %v503_v52 = vsel %vm393_vm4, %v346_v23, %v378_v28 }
  0x7a   : > { %v1459_v49 = vpack.c.b16 %v1415_v45, %v1415_v45  ;;  %v502_v53 = vrot.slane %v500_v51, 1  ;;  %v505_v54 = vrot.slane %v503_v52, 2  ;;  %v506_v55 = vsel %vm397_vm5, %v346_v23, %v378_v28 }
  0x7b   : > { %v677_v57 = vunpack.c.l.bf16 %v487_v41  ;;  %v508_v58 = vrot.slane %v506_v55, 3  ;;  %v678_v59 = vunpack.c.l.bf16 %v490_v46  ;;  %v679_v60 = vunpack.c.l.bf16 %v493_v47 }
  0x7c   : > { %1475 = vst.msk [vmem:[#allocation2 + $0x1c] sm:$0xf] %vm1222_vm3, %v1459_v49  ;;  %v680_v61 = vunpack.c.l.bf16 %v496_v48  ;;  %v681_v63 = vunpack.c.l.bf16 %v499_v50  ;;  %v682_v0 = vunpack.c.l.bf16 %v502_v53  ;;  %v683_v62 = vunpack.c.l.bf16 %v505_v54 }
  0x7d   : > { %v934_v1 = vsel %vm709_vm6, %v677_v57, -inf  ;;  %v684_v3 = vunpack.c.l.bf16 %v508_v58  ;;  %v941_v9 = vsel %vm709_vm6, %v678_v59, -inf  ;;  %v948_v10 = vsel %vm709_vm6, %v679_v60, -inf }
  0x7e   : > { %v935_v8 = vrot.slane %v934_v1, 4  ;;  %v942_v11 = vrot.slane %v941_v9, 4  ;;  %v949_v12 = vrot.slane %v948_v10, 4  ;;  %v955_v13 = vsel %vm709_vm6, %v680_v61, -inf }
  0x7f   : > { %v962_v16 = vsel %vm709_vm6, %v681_v63, -inf  ;;  %v956_v18 = vrot.slane %v955_v13, 4  ;;  %v969_v38 = vsel %vm709_vm6, %v682_v0, -inf  ;;  %v976_v34 = vsel %vm709_vm6, %v683_v62, -inf }
  0x80   : > { %v936_v17 = vmax.f32 %v934_v1, %v935_v8  ;;  %v963_v37 = vrot.slane %v962_v16, 4  ;;  %v943_v20 = vmax.f32 %v941_v9, %v942_v11  ;;  %v950_v14 = vmax.f32 %v948_v10, %v949_v12 }
  0x81   : > { %v970_v33 = vrot.slane %v969_v38, 4  ;;  %v957_v19 = vmax.f32 %v955_v13, %v956_v18  ;;  %v977_v36 = vrot.slane %v976_v34, 4  ;;  %v983_v22 = vsel %vm709_vm6, %v684_v3, -inf }
  0x82   : > { %v937_v7 = vrot.slane %v936_v17, 2  ;;  %v964_v23 = vmax.f32 %v962_v16, %v963_v37  ;;  %v944_v25 = vrot.slane %v943_v20, 2  ;;  %v951_v26 = vrot.slane %v950_v14, 2 }
  0x83   : > { %v3263_v24 = vld [vmem:[#allocation2 + $0x18] sm:$0xff]   ;;  %v971_v21 = vmax.f32 %v969_v38, %v970_v33  ;;  %v958_v29 = vrot.slane %v957_v19, 2  ;;  %v978_v43 = vmax.f32 %v976_v34, %v977_v36  ;;  %v984_v61 = vrot.slane %v983_v22, 4 }
  0x84   : > { %v3715_v27 = vunpack.c.h.b16 %v3263_v24  ;;  %v938_v28 = vmax.f32 %v936_v17, %v937_v7  ;;  %v965_v31 = vrot.slane %v964_v23, 2  ;;  %v945_v32 = vmax.f32 %v943_v20, %v944_v25 }
  0x85   : > { %v952_v41 = vmax.f32 %v950_v14, %v951_v26  ;;  %v972_v42 = vrot.slane %v971_v21, 2  ;;  %v959_v46 = vmax.f32 %v957_v19, %v958_v29  ;;  %v979_v51 = vrot.slane %v978_v43, 2 }
  0x86   : > { %v1658_v44 = vpack.c.b16 %v1650_v4, %v3715_v27  ;;  %v939_v45 = vrot.slane %v938_v28, 1  ;;  %v966_v47 = vmax.f32 %v964_v23, %v965_v31  ;;  %v946_v48 = vrot.slane %v945_v32, 1  ;;  %v3728_v23 = vld [vmem:[#allocation2 + $0x44] sm:$0x1] }
  0x87   : > { %v953_v49 = vrot.slane %v952_v41, 1  ;;  %v973_v50 = vmax.f32 %v971_v21, %v972_v42  ;;  %v960_v54 = vrot.slane %v959_v46, 1  ;;  %v980_v60 = vmax.f32 %v978_v43, %v979_v51 }
  0x88   : > { %v3720_v52 = vrot.slane %v1658_v44, 5  ;;  %v940_v53 = vmax.f32 %v938_v28, %v939_v45  ;;  %v967_v55 = vrot.slane %v966_v47, 1  ;;  %v947_v57 = vmax.f32 %v945_v32, %v946_v48 }
  0x89   : > { %v954_v58 = vmax.f32 %v952_v41, %v953_v49  ;;  %v974_v59 = vrot.slane %v973_v50, 1  ;;  %v961_v56 = vmax.f32 %v959_v46, %v960_v54  ;;  %v981_v62 = vrot.slane %v980_v60, 1 }
  0x8a   : > { %1676 = vrot.lane.b32.xlu1 %v3720_v52, %s3405_s13  ;;  %v968_v4 = vmax.f32 %v966_v47, %v967_v55  ;;  %v1190_v63 = vpack.c.bf16 %v940_v53, %v940_v53  ;;  %v1191_v1 = vpack.c.bf16 %v947_v57, %v947_v57  ;;  %v985_v8 = vmax.f32 %v983_v22, %v984_v61 }
  0x8b   : > { %v975_v0 = vmax.f32 %v973_v50, %v974_v59  ;;  %v1192_v3 = vpack.c.bf16 %v954_v58, %v954_v58  ;;  %v1193_v9 = vpack.c.bf16 %v961_v56, %v961_v56  ;;  %v982_v12 = vmax.f32 %v980_v60, %v981_v62 }
  0x8c   : > { %v1194_v10 = vpack.c.bf16 %v968_v4, %v968_v4  ;;  %v1366_v11 = vunpack.c.l.b16 %v1190_v63  ;;  %v1367_v16 = vunpack.c.l.b16 %v1191_v1  ;;  %v986_v18 = vrot.slane %v985_v8, 2 }
  0x8d   : > { %v1195_v13 = vpack.c.bf16 %v975_v0, %v975_v0  ;;  %v1368_v17 = vunpack.c.l.b16 %v1192_v3  ;;  %v1369_v37 = vunpack.c.l.b16 %v1193_v9  ;;  %v1196_v20 = vpack.c.bf16 %v982_v12, %v982_v12 }
  0x8e   : > { %v1370_v38 = vunpack.c.l.b16 %v1194_v10  ;;  %v1430_v33 = vsel %vm389_vm2, %v1367_v16, %v1366_v11  ;;  %v306_v34 = vmax.f32 %v3692_v39, %v3695_v40  ;;  %v987_v7 = vmax.f32 %v985_v8, %v986_v18 }
  0x8f   : > { %v1371_v14 = vunpack.c.l.b16 %v1195_v13  ;;  %v1431_v19 = vsel %vm393_vm4, %v1368_v17, %v1430_v33  ;;  %v341_v36 = vpack.c.bf16 %v3687_v30, %v3687_v30  ;;  %v1372_v24 = vunpack.c.l.b16 %v1196_v20 }
  0x90   : > { %v1432_v25 = vsel %vm397_vm5, %v1369_v37, %v1431_v19  ;;  %v342_v26 = vpack.c.bf16 %v306_v34, %v306_v34  ;;  %v988_v21 = vrot.slane %v987_v7, 1  ;;  %v1653_v39 = vunpack.c.l.b16 %v3728_v23  ;;  %v1261_v23 = vld [vmem:[#allocation2 + $0x50] sm:$0x1] }
  0x91   : > { %v1433_v22 = vsel %vm1401_vm7, %v1370_v38, %v1432_v25  ;;  %v373_v28 = vrot.slane %v341_v36, 3 }
  0x92   : > { %v1434_v29 = vsel %vm1403_vm8, %v1371_v14, %v1433_v22  ;;  %v374_v40 = vrot.slane %v342_v26, 3  ;;  %v989_v31 = vmax.f32 %v987_v7, %v988_v21 }
  0x93   : > { %v1435_v32 = vsel %vm1405_vm9, %v1372_v24, %v1434_v29  ;;  %v439_v41 = vsel %vm385_vm1, %v341_v36, %v373_v28  ;;  %v440_v30 = vsel %vm389_vm2, %v341_v36, %v373_v28  ;;  %v443_v43 = vsel %vm393_vm4, %v341_v36, %v373_v28 }
  0x94   : > { %v442_v42 = vrot.slane %v440_v30, 1  ;;  %v446_v44 = vsel %vm397_vm5, %v341_v36, %v373_v28  ;;  %v451_v45 = vsel %vm385_vm1, %v342_v26, %v374_v40  ;;  %v1197_v46 = vpack.c.bf16 %v989_v31, %v989_v31 }
  0x95   : > { %v445_v47 = vrot.slane %v443_v43, 2  ;;  %v448_v48 = vrot.slane %v446_v44, 3  ;;  %v452_v49 = vsel %vm389_vm2, %v342_v26, %v374_v40  ;;  %v455_v51 = vsel %vm393_vm4, %v342_v26, %v374_v40 }
  0x96   : > { %v454_v50 = vrot.slane %v452_v49, 1  ;;  %v458_v53 = vsel %vm397_vm5, %v342_v26, %v374_v40  ;;  %v661_v54 = vunpack.c.l.bf16 %v439_v41  ;;  %v1373_v55 = vunpack.c.l.b16 %v1197_v46 }
  0x97   : > { %v457_v57 = vrot.slane %v455_v51, 2  ;;  %v460_v58 = vrot.slane %v458_v53, 3  ;;  %v662_v59 = vunpack.c.l.bf16 %v442_v42  ;;  %v663_v60 = vunpack.c.l.bf16 %v445_v47 }
  0x98   : > { %v664_v56 = vunpack.c.l.bf16 %v448_v48  ;;  %v665_v4 = vunpack.c.l.bf16 %v451_v45  ;;  %v666_v61 = vunpack.c.l.bf16 %v454_v50  ;;  %v1436_v63 = vsel %vm1407_vm10, %v1373_v55, %v1435_v32 }
  0x99   : > { %v667_v0 = vunpack.c.l.bf16 %v457_v57  ;;  %v668_v62 = vunpack.c.l.bf16 %v460_v58  ;;  %v822_v1 = vsel %vm709_vm6, %v661_v54, -inf  ;;  %v1462_v3 = vpack.c.b16 %v1436_v63, %v1436_v63 }
  0x9a   : > { %v823_v8 = vrot.slane %v822_v1, 4  ;;  %v829_v9 = vsel %vm709_vm6, %v662_v59, -inf  ;;  %v836_v10 = vsel %vm709_vm6, %v663_v60, -inf  ;;  %v843_v13 = vsel %vm709_vm6, %v664_v56, -inf }
  0x9b   : > { %v830_v11 = vrot.slane %v829_v9, 4  ;;  %v837_v12 = vrot.slane %v836_v10, 4  ;;  %v850_v16 = vsel %vm709_vm6, %v665_v4, -inf  ;;  %1478 = vst.msk [vmem:[#allocation2 + $0x40] sm:$0xf] %vm1222_vm3, %v1462_v3  ;;  %v844_v18 = vrot.slane %v843_v13, 4 }
  0x9c   : > { %v824_v17 = vmax.f32 %v822_v1, %v823_v8  ;;  %v851_v37 = vrot.slane %v850_v16, 4  ;;  %v857_v38 = vsel %vm709_vm6, %v666_v61, -inf  ;;  %v864_v34 = vsel %vm709_vm6, %v667_v0, -inf }
  0x9d   : > { %v831_v20 = vmax.f32 %v829_v9, %v830_v11  ;;  %v838_v14 = vmax.f32 %v836_v10, %v837_v12  ;;  %v858_v33 = vrot.slane %v857_v38, 4  ;;  %v845_v19 = vmax.f32 %v843_v13, %v844_v18  ;;  %v1252_v13 = vld [vmem:[#allocation2 + $0x2c] sm:$0x1] }
  0x9e   : > { %v825_v7 = vrot.slane %v824_v17, 2  ;;  %v852_v36 = vmax.f32 %v850_v16, %v851_v37  ;;  %v865_v24 = vrot.slane %v864_v34, 4  ;;  %v871_v22 = vsel %vm709_vm6, %v668_v62, -inf }
  0x9f   : > { %v832_v25 = vrot.slane %v831_v20, 2  ;;  %v839_v26 = vrot.slane %v838_v14, 2  ;;  %v859_v21 = vmax.f32 %v857_v38, %v858_v33  ;;  %v846_v29 = vrot.slane %v845_v19, 2  ;;  %v3259_v33 = vld [vmem:[%s3498_s9 + $0x60] sm:$0xff]  }
  0xa0   : > { %v826_v28 = vmax.f32 %v824_v17, %v825_v7  ;;  %v853_v40 = vrot.slane %v852_v36, 2  ;;  %v866_v31 = vmax.f32 %v864_v34, %v865_v24  ;;  %v872_v42 = vrot.slane %v871_v22, 4 }
  0xa1   : > { %v833_v32 = vmax.f32 %v831_v20, %v832_v25  ;;  %v840_v41 = vmax.f32 %v838_v14, %v839_v26  ;;  %v860_v30 = vrot.slane %v859_v21, 2  ;;  %v847_v44 = vmax.f32 %v845_v19, %v846_v29 }
  0xa2   : > { %v827_v43 = vrot.slane %v826_v28, 1  ;;  %v854_v45 = vmax.f32 %v852_v36, %v853_v40  ;;  %v867_v46 = vrot.slane %v866_v31, 2  ;;  %v3755_v47 = vld [vmem:[#allocation2 + $0x3c] sm:$0xff]   ;;  %v873_v51 = vmax.f32 %v871_v22, %v872_v42 }
  0xa3   : > { %v834_v48 = vrot.slane %v833_v32, 1  ;;  %v841_v49 = vrot.slane %v840_v41, 1  ;;  %v861_v50 = vmax.f32 %v859_v21, %v860_v30  ;;  %v3758_v53 = vunpack.c.h.b16 %v3755_v47  ;;  %v3260_v21 = vld [vmem:[%s3498_s9 + $0x68] sm:$0xff]  }
  0xa4   : > { %v828_v54 = vmax.f32 %v826_v28, %v827_v43  ;;  %v848_v55 = vrot.slane %v847_v44, 1  ;;  %v855_v57 = vrot.slane %v854_v45, 1  ;;  %v868_v56 = vmax.f32 %v866_v31, %v867_v46 }
  0xa5   : > { %v835_v58 = vmax.f32 %v833_v32, %v834_v48  ;;  %v842_v59 = vmax.f32 %v840_v41, %v841_v49  ;;  %v862_v60 = vrot.slane %v861_v50, 1  ;;  %v1661_v4 = vpack.c.b16 %v1653_v39, %v3758_v53 }
  0xa6   : > { %v849_v61 = vmax.f32 %v847_v44, %v848_v55  ;;  %v856_v63 = vmax.f32 %v854_v45, %v855_v57  ;;  %v874_v0 = vrot.slane %v873_v51, 2  ;;  %v869_v1 = vrot.slane %v868_v56, 1 }
  0xa7   : > { %v863_v62 = vmax.f32 %v861_v50, %v862_v60  ;;  %v1174_v3 = vpack.c.bf16 %v828_v54, %v828_v54  ;;  %v1175_v8 = vpack.c.bf16 %v835_v58, %v835_v58  ;;  %v3763_v9 = vrot.slane %v1661_v4, 5 }
  0xa8   : > { %v875_v10 = vmax.f32 %v873_v51, %v874_v0  ;;  %v1176_v11 = vpack.c.bf16 %v842_v59, %v842_v59  ;;  %v1177_v12 = vpack.c.bf16 %v849_v61, %v849_v61  ;;  %v870_v16 = vmax.f32 %v868_v56, %v869_v1 }
  0xa9   : > { %v1178_v17 = vpack.c.bf16 %v856_v63, %v856_v63  ;;  %v1179_v18 = vpack.c.bf16 %v863_v62, %v863_v62  ;;  %v1350_v37 = vunpack.c.l.b16 %v1174_v3  ;;  %1810 = vrot.lane.b32.xlu0 %v3763_v9, %s3406_s14  ;;  %v1351_v38 = vunpack.c.l.b16 %v1175_v8 }
  0xaa   : > { %v876_v39 = vrot.slane %v875_v10, 1  ;;  %v1352_v20 = vunpack.c.l.b16 %v1176_v11  ;;  %v1353_v14 = vunpack.c.l.b16 %v1177_v12  ;;  %v1180_v34 = vpack.c.bf16 %v870_v16, %v870_v16 }
  0xab   : > { %v1354_v7 = vunpack.c.l.b16 %v1178_v17  ;;  %v1253_v19 = vsel %vm3610_vm13, 0, %v1252_v13  ;;  %v1355_v24 = vunpack.c.l.b16 %v1179_v18  ;;  %v1416_v25 = vsel %vm389_vm2, %v1351_v38, %v1350_v37 }
  0xac   : > { %v877_v36 = vmax.f32 %v875_v10, %v876_v39  ;;  %1254 = vst [vmem:[#allocation2 + $0x2c] sm:$0x1] %v1253_v19  ;;  %v1262_v26 = vsel %vm3610_vm13, 0, %v1261_v23  ;;  %v1356_v22 = vunpack.c.l.b16 %v1180_v34  ;;  %v1417_v28 = vsel %vm393_vm4, %v1352_v20, %v1416_v25 }
  0xad   : > { %1263 = vst [vmem:[#allocation2 + $0x50] sm:$0x1] %v1262_v26  ;;  %v3194_v29 = vunpack.c.l.bf16 %v3259_v33  ;;  %v1418_v31 = vsel %vm397_vm5, %v1353_v14, %v1417_v28  ;;  %v3195_v32 = vunpack.c.h.bf16 %v3259_v33  ;;  %v3198_v30 = vunpack.c.l.bf16 %v3260_v21 }
  0xae   : > { %v1181_v40 = vpack.c.bf16 %v877_v36, %v877_v36  ;;  %v1419_v41 = vsel %vm1401_vm7, %v1354_v7, %v1418_v31  ;;  %v3199_v42 = vunpack.c.h.bf16 %v3260_v21  ;;  %v3787_v58 = vunpack.c.h.b16 %v3602_v15 }
  0xaf   : > { %v325_v43 = vsel %vm288_vm0, %v3194_v29, -inf  ;;  %v1420_v45 = vsel %vm1403_vm8, %v1355_v24, %v1419_v41  ;;  %v328_v46 = vsel %vm288_vm0, %v3195_v32, -inf  ;;  %v326_v49 = vsel %vm288_vm0, %v3198_v30, -inf }
  0xb0   : > { %v1357_v44 = vunpack.c.l.b16 %v1181_v40  ;;  %v1421_v48 = vsel %vm1405_vm9, %v1356_v22, %v1420_v45  ;;  %v329_v50 = vsel %vm288_vm0, %v3199_v42, -inf  ;;  %v327_v54 = vmax.f32 %v325_v43, %v326_v49 }
  0xb1   : > { %1680 = vrot.lane.b32.xlu0 %v3660_v35, %s3405_s13  ;;  %v330_v55 = vmax.f32 %v328_v46, %v329_v50  ;;  %v1556_v59 = vpack.c.b16 %v3657_v5, %v3657_v5  ;;  %v1554_v60 = vpack.c.b16 %v3715_v27, %v3715_v27  ;;  %v3810_v33 = vpack.c.b16 %v3758_v53, %v3758_v53 }
  0xb2   : > { %v1422_v51 = vsel %vm1407_vm10, %v1357_v44, %v1421_v48  ;;  %v349_v61 = vpack.c.bf16 %v327_v54, %v327_v54 }
  0xb3   : > { %v1460_v57 = vpack.c.b16 %v1422_v51, %v1422_v51  ;;  %v1493_v56 = vld [vmem:[#allocation2 + $0x2c] sm:$0x1]  ;;  %v350_v63 = vpack.c.bf16 %v330_v55, %v330_v55  ;;  %v1593_v62 = vshrl.u32 %v1556_v59, 16  ;;  %v1596_v1 = vshll.u32 %v1556_v59, 16 }
  0xb4   : > { %v1502_v4 = vld [vmem:[#allocation2 + $0x50] sm:$0x1]  ;;  %v1577_v3 = vshrl.u32 %v1554_v60, 16  ;;  %v1580_v8 = vshll.u32 %v1554_v60, 16  ;;  %v381_v10 = vrot.slane %v349_v61, 3  ;;  %v1651_v12 = vunpack.c.l.b16 %v1493_v56 }
  0xb5   : > { %1476 = vst.msk [vmem:[#allocation2 + $0x28] sm:$0xf] %vm1222_vm3, %v1460_v57  ;;  %v1654_v0 = vunpack.c.l.b16 %v1502_v4  ;;  %v382_v15 = vrot.slane %v350_v63, 3  ;;  %v3795_v5 = vrot.slane %v1593_v62, 4  ;;  %v3799_v16 = vrot.slane %v1596_v1, 5 }
  0xb6   : > { %v536_v27 = vsel %vm389_vm2, %v349_v61, %v381_v10  ;;  %v539_v13 = vsel %vm393_vm4, %v349_v61, %v381_v10  ;;  %v1579_v17 = vrot.slane %v1577_v3, 4  ;;  %v1582_v18 = vrot.slane %v1580_v8, 5 }
  0xb7   : > { %v1662_v11 = vpack.c.b16 %v1654_v0, %v3787_v58  ;;  %v538_v37 = vrot.slane %v536_v27, 1  ;;  %v535_v23 = vsel %vm385_vm1, %v349_v61, %v381_v10  ;;  %v541_v39 = vrot.slane %v539_v13, 2 }
  0xb8   : > { %v542_v38 = vsel %vm397_vm5, %v349_v61, %v381_v10  ;;  %v548_v20 = vsel %vm389_vm2, %v350_v63, %v382_v15  ;;  %v551_v7 = vsel %vm393_vm4, %v350_v63, %v382_v15  ;;  %v547_v36 = vsel %vm385_vm1, %v350_v63, %v382_v15 }
  0xb9   : > { %1746 = vrot.lane.b32.xlu0 %v3763_v9, %s3404_s12  ;;  %v3806_v14 = vrot.slane %v1662_v11, 5  ;;  %v544_v34 = vrot.slane %v542_v38, 3  ;;  %v550_v24 = vrot.slane %v548_v20, 1  ;;  %v553_v25 = vrot.slane %v551_v7, 2 }
  0xba   : > { %v554_v26 = vsel %vm397_vm5, %v350_v63, %v382_v15  ;;  %v693_v22 = vunpack.c.l.bf16 %v535_v23  ;;  %v694_v28 = vunpack.c.l.bf16 %v538_v37  ;;  %v3818_v29 = vor.u32 %v1582_v18, %v1579_v17 }
  0xbb   : > { %v1601_v53 = vshrl.u32 %v3810_v33, 16  ;;  %v556_v40 = vrot.slane %v554_v26, 3  ;;  %v695_v31 = vunpack.c.l.bf16 %v541_v39  ;;  %v696_v41 = vunpack.c.l.bf16 %v544_v34 }
  0xbc   : > { %v3813_v19 = vld [vmem:[#allocation2 + $0x24] sm:$0xff]   ;;  %v697_v30 = vunpack.c.l.bf16 %v547_v36  ;;  %v1604_v42 = vshll.u32 %v3810_v33, 16  ;;  %v698_v44 = vunpack.c.l.bf16 %v550_v24  ;;  %v699_v45 = vunpack.c.l.bf16 %v553_v25 }
  0xbd   : > { %v1535_v21 = vunpack.c.h.b16 %v3813_v19  ;;  %1697 = vrot.lane.b32.xlu2 %v3813_v19, %s3402_s10  ;;  %v700_v48 = vunpack.c.l.bf16 %v556_v40  ;;  %v1046_v49 = vsel %vm709_vm6, %v693_v22, -inf  ;;  %v1053_v50 = vsel %vm709_vm6, %v694_v28, -inf }
  0xbe   : > { %v1047_v55 = vrot.slane %v1046_v49, 4  ;;  %v1054_v57 = vrot.slane %v1053_v50, 4  ;;  %v1060_v59 = vsel %vm709_vm6, %v695_v31, -inf  ;;  %v1067_v60 = vsel %vm709_vm6, %v696_v41, -inf }
  0xbf   : > { %v1659_v32 = vpack.c.b16 %v1651_v12, %v1535_v21  ;;  %v1555_v43 = vpack.c.b16 %v1535_v21, %v1535_v21  ;;  %v1074_v56 = vsel %vm709_vm6, %v697_v30, -inf  ;;  %v1081_v4 = vsel %vm709_vm6, %v698_v44, -inf }
  0xc0   : > { %v1048_v0 = vmax.f32 %v1046_v49, %v1047_v55  ;;  %v1055_v62 = vmax.f32 %v1053_v50, %v1054_v57  ;;  %v1061_v1 = vrot.slane %v1060_v59, 4  ;;  %v1068_v3 = vrot.slane %v1067_v60, 4 }
  0xc1   : > { %v3824_v46 = vrot.slane %v1659_v32, 5  ;;  %1628 = vrot.lane.b32.xlu0 %v3818_v29, %s3407_s15  ;;  %v1585_v51 = vshrl.u32 %v1555_v43, 16  ;;  %v1588_v54 = vshll.u32 %v1555_v43, 16  ;;  %v1075_v8 = vrot.slane %v1074_v56, 4 }
  0xc2   : > { %v1082_v10 = vrot.slane %v1081_v4, 4  ;;  %v1049_v11 = vrot.slane %v1048_v0, 2  ;;  %v1056_v12 = vrot.slane %v1055_v62, 2  ;;  %v1088_v27 = vsel %vm709_vm6, %v699_v45, -inf }
  0xc3   : > { %1678 = vrot.lane.b32.xlu1 %v3824_v46, %s3405_s13  ;;  %v1587_v61 = vrot.slane %v1585_v51, 4  ;;  %v1590_v63 = vrot.slane %v1588_v54, 5  ;;  %v1062_v13 = vmax.f32 %v1060_v59, %v1061_v1  ;;  %v1069_v17 = vmax.f32 %v1067_v60, %v1068_v3  ;;  %v3145_v3 = vld [vmem:[%s3498_s9] sm:$0xff]  }
  0xc4   : > { %v1076_v18 = vmax.f32 %v1074_v56, %v1075_v8  ;;  %v1083_v37 = vmax.f32 %v1081_v4, %v1082_v10  ;;  %v1050_v23 = vmax.f32 %v1048_v0, %v1049_v11  ;;  %v1057_v39 = vmax.f32 %v1055_v62, %v1056_v12 }
  0xc5   : > { %v3836_v15 = vor.u32 %v1590_v63, %v1587_v61  ;;  %v1089_v38 = vrot.slane %v1088_v27, 4  ;;  %v1095_v20 = vsel %vm709_vm6, %v700_v48, -inf  ;;  %1765 = vrot.lane.b32.xlu2 %v3755_v47, %s3403_s11  ;;  %v1063_v34 = vrot.slane %v1062_v13, 2 }
  0xc6   : > { %v1070_v7 = vrot.slane %v1069_v17, 2  ;;  %v1077_v36 = vrot.slane %v1076_v18, 2  ;;  %v1084_v24 = vrot.slane %v1083_v37, 2  ;;  %v1051_v25 = vrot.slane %v1050_v23, 1 }
  0xc7   : > { %v1058_v26 = vrot.slane %v1057_v39, 1  ;;  %v1090_v21 = vmax.f32 %v1088_v27, %v1089_v38  ;;  %v1096_v22 = vrot.slane %v1095_v20, 4  ;;  %v3848_v28 = vpack.c.b16 %v3787_v58, %v3787_v58  ;;  %v1264_v27 = vld [vmem:[#allocation2 + $0x5c] sm:$0x1] }
  0xc8   : > { %v1064_v40 = vmax.f32 %v1062_v13, %v1063_v34  ;;  %v1071_v31 = vmax.f32 %v1069_v17, %v1070_v7  ;;  %v1078_v32 = vmax.f32 %v1076_v18, %v1077_v36  ;;  %v3852_v41 = vor.u32 %v3799_v16, %v3795_v5  ;;  %v3261_v7 = vld [vmem:[%s3498_s9 + $0x70] sm:$0xff]  }
  0xc9   : > { %1630 = vrot.lane.b32.xlu0 %v3836_v15, %s3407_s15  ;;  %v3854_v30 = vrot.slane %v1601_v53, 4  ;;  %v1085_v43 = vmax.f32 %v1083_v37, %v1084_v24  ;;  %v1091_v44 = vrot.slane %v1090_v21, 2  ;;  %v1052_v45 = vmax.f32 %v1050_v23, %v1051_v25  ;;  %v3248_v23 = vld [vmem:[%s3498_s9 + $0x8] sm:$0xff]  }
  0xca   : > { %v1059_v48 = vmax.f32 %v1057_v39, %v1058_v26  ;;  %v1065_v49 = vrot.slane %v1064_v40, 1  ;;  %v1072_v50 = vrot.slane %v1071_v31, 1  ;;  %v1097_v58 = vmax.f32 %v1095_v20, %v1096_v22 }
  0xcb   : > { %1682 = vrot.lane.b32.xlu1 %v3763_v9, %s3405_s13  ;;  %v1079_v9 = vrot.slane %v1078_v32, 1  ;;  %v1086_v51 = vrot.slane %v1085_v43, 1  ;;  %v1092_v54 = vmax.f32 %v1090_v21, %v1091_v44  ;;  %v3858_v55 = vrot.slane %v1604_v42, 5 }
  0xcc   : > { %v1609_v57 = vshrl.u32 %v3848_v28, 16  ;;  %v1066_v5 = vmax.f32 %v1064_v40, %v1065_v49  ;;  %v1073_v16 = vmax.f32 %v1071_v31, %v1072_v50  ;;  %v1098_v56 = vrot.slane %v1097_v58, 2 }
  0xcd   : > { %v1080_v53 = vmax.f32 %v1078_v32, %v1079_v9  ;;  %v1087_v59 = vmax.f32 %v1085_v43, %v1086_v51  ;;  %v1093_v60 = vrot.slane %v1092_v54, 1  ;;  %1701 = vrot.lane.b32.xlu2 %v3755_v47, %s3402_s10  ;;  %v1612_v4 = vshll.u32 %v3848_v28, 16 }
  0xce   : > { %v1206_v61 = vpack.c.bf16 %v1052_v45, %v1052_v45  ;;  %v1207_v63 = vpack.c.bf16 %v1059_v48, %v1059_v48  ;;  %v1208_v0 = vpack.c.bf16 %v1066_v5, %v1066_v5  ;;  %v1099_v42 = vmax.f32 %v1097_v58, %v1098_v56  ;;  %v3262_v45 = vld [vmem:[%s3498_s9 + $0x78] sm:$0xff]   ;;  %s215_s9 = sand.u32 1, %s3391_s19  }
  0xcf   : > { %v1094_v33 = vmax.f32 %v1092_v54, %v1093_v60  ;;  %v1209_v62 = vpack.c.bf16 %v1073_v16, %v1073_v16  ;;  %v1210_v1 = vpack.c.bf16 %v1080_v53, %v1080_v53  ;;  %v1211_v8 = vpack.c.bf16 %v1087_v59, %v1087_v59  ;;  %s2999_s22 = scalar_lea.sflag [#allocation5], %s215_s9 }
  0xd0   : > { %v1382_v10 = vunpack.c.l.b16 %v1206_v61  ;;  %v1383_v11 = vunpack.c.l.b16 %v1207_v63  ;;  %v1384_v12 = vunpack.c.l.b16 %v1208_v0  ;;  %v1100_v13 = vrot.slane %v1099_v42, 1 }
  0xd1   : > { %1722 = vrot.lane.b32.xlu0 %v3836_v15, %s3408_s16  ;;  %v1212_v17 = vpack.c.bf16 %v1094_v33, %v1094_v33  ;;  %v1385_v18 = vunpack.c.l.b16 %v1209_v62  ;;  %v1386_v37 = vunpack.c.l.b16 %v1210_v1  ;;  %v1387_v39 = vunpack.c.l.b16 %v1211_v8 }
  0xd2   : > { %v1444_v38 = vsel %vm389_vm2, %v1383_v11, %v1382_v10  ;;  %v1265_v20 = vsel %vm3610_vm13, 0, %v1264_v27  ;;  %v3146_v34 = vunpack.c.l.bf16 %v3145_v3  ;;  %v1101_v36 = vmax.f32 %v1099_v42, %v1100_v13  ;;  %v3904_v11 = vld [vmem:[#allocation2] sm:$0xff]  }
  0xd3   : > { %1748 = vrot.lane.b32.xlu1 %v3806_v14, %s3404_s12  ;;  %v1388_v24 = vunpack.c.l.b16 %v1212_v17  ;;  %v1445_v25 = vsel %vm393_vm4, %v1384_v12, %v1444_v38  ;;  %1266 = vst [vmem:[#allocation2 + $0x5c] sm:$0x1] %v1265_v20  ;;  %v3147_v26 = vunpack.c.h.bf16 %v3145_v3  ;;  %v3150_v22 = vunpack.c.l.bf16 %v3248_v23 }
  0xd4   : > { %v1446_v21 = vsel %vm397_vm5, %v1385_v18, %v1445_v25  ;;  %v3151_v28 = vunpack.c.h.bf16 %v3248_v23  ;;  %v289_v40 = vsel %vm288_vm0, %v3146_v34, -inf  ;;  %v1213_v31 = vpack.c.bf16 %v1101_v36, %v1101_v36 }
  0xd5   : > { %v1447_v32 = vsel %vm1401_vm7, %v1386_v37, %v1446_v21  ;;  %v292_v43 = vsel %vm288_vm0, %v3147_v26, -inf  ;;  %v3202_v44 = vunpack.c.l.bf16 %v3261_v7  ;;  %1742 = vrot.lane.b32.xlu2 %v3824_v46, %s3404_s12  ;;  %v290_v49 = vsel %vm288_vm0, %v3150_v22, -inf }
  0xd6   : > { %v1448_v48 = vsel %vm1403_vm8, %v1387_v39, %v1447_v32  ;;  %v293_v50 = vsel %vm288_vm0, %v3151_v28, -inf  ;;  %v3203_v9 = vunpack.c.h.bf16 %v3261_v7  ;;  %v1389_v51 = vunpack.c.l.b16 %v1213_v31 }
  0xd7   : > { %v1449_v54 = vsel %vm1405_vm9, %v1388_v24, %v1448_v48  ;;  %v291_v58 = vmax.f32 %v289_v40, %v290_v49  ;;  %v294_v5 = vmax.f32 %v292_v43, %v293_v50  ;;  %v1611_v16 = vrot.slane %v1609_v57, 4 }
  0xd8   : > { %v1614_v53 = vrot.slane %v1612_v4, 5  ;;  %v3206_v59 = vunpack.c.l.bf16 %v3262_v45  ;;  %v3207_v60 = vunpack.c.h.bf16 %v3262_v45  ;;  %v1450_v56 = vsel %vm1407_vm10, %v1389_v51, %v1449_v54 }
  0xd9   : > { %1788 = vrot.lane.b32.xlu0 %v3852_v41, %s3409_s17  ;;  %v337_v61 = vpack.c.bf16 %v291_v58, %v291_v58  ;;  %v338_v63 = vpack.c.bf16 %v294_v5, %v294_v5  ;;  %v1464_v0 = vpack.c.b16 %v1450_v56, %v1450_v56  ;;  %v331_v62 = vsel %vm288_vm0, %v3202_v44, -inf }
  0xda   : > { %v334_v1 = vsel %vm288_vm0, %v3203_v9, -inf  ;;  %v3895_v3 = vor.u32 %v3858_v55, %v3854_v30  ;;  %v3897_v8 = vor.u32 %v1614_v53, %v1611_v16  ;;  %v3900_v57 = vld [vmem:[#allocation2 + $0x5c] sm:$0x1]  ;;  %v332_v4 = vsel %vm288_vm0, %v3206_v59, -inf }
  0xdb   : > { %1724 = vrot.lane.b32.xlu1 %v3852_v41, %s3408_s16  ;;  %v369_v33 = vrot.slane %v337_v61, 3  ;;  %v370_v42 = vrot.slane %v338_v63, 3  ;;  %1480 = vst.msk [vmem:[#allocation2 + $0x58] sm:$0xf] %vm1222_vm3, %v1464_v0  ;;  %v335_v10 = vsel %vm288_vm0, %v3207_v60, -inf  ;;  %v3913_v55 = vunpack.c.h.b16 %v3904_v11 }
  0xdc   : > { %v1655_v23 = vunpack.c.l.b16 %v3900_v57  ;;  %v3924_v40 = vmax.f32 %v331_v62, %v332_v4  ;;  %v3926_v31 = vmax.f32 %v334_v1, %v335_v10 }
  0xdd   : > { %v388_v12 = vsel %vm385_vm1, %v337_v61, %v369_v33  ;;  %v390_v27 = vsel %vm389_vm2, %v337_v61, %v369_v33  ;;  %v394_v13 = vsel %vm393_vm4, %v337_v61, %v369_v33  ;;  %v398_v30 = vsel %vm397_vm5, %v337_v61, %v369_v33  ;;  %1808 = vrot.lane.b32.xlu2 %v3660_v35, %s3406_s14 }
  0xde   : > { %v392_v17 = vrot.slane %v390_v27, 1  ;;  %v396_v18 = vrot.slane %v394_v13, 2  ;;  %v400_v37 = vrot.slane %v398_v30, 3  ;;  %v404_v39 = vsel %vm389_vm2, %v338_v63, %v370_v42 }
  0xdf   : > { %v407_v38 = vsel %vm393_vm4, %v338_v63, %v370_v42  ;;  %v410_v20 = vsel %vm397_vm5, %v338_v63, %v370_v42  ;;  %v1552_v35 = vpack.c.b16 %v3913_v55, %v3913_v55  ;;  %v403_v34 = vsel %vm385_vm1, %v338_v63, %v370_v42 }
  0xe0   : > { %v406_v7 = vrot.slane %v404_v39, 1  ;;  %v409_v36 = vrot.slane %v407_v38, 2  ;;  %v645_v24 = vunpack.c.l.bf16 %v388_v12  ;;  %v646_v25 = vunpack.c.l.bf16 %v392_v17 }
  0xe1   : > { %v647_v26 = vunpack.c.l.bf16 %v396_v18  ;;  %v648_v21 = vunpack.c.l.bf16 %v400_v37  ;;  %v1561_v22 = vshrl.u32 %v1552_v35, 16  ;;  %v412_v28 = vrot.slane %v410_v20, 3 }
  0xe2   : > { %v3928_v32 = vld [vmem:[#allocation2 + $0x54] sm:$0xff]   ;;  %v1564_v43 = vshll.u32 %v1552_v35, 16  ;;  %v649_v44 = vunpack.c.l.bf16 %v403_v34  ;;  %v710_v45 = vsel %vm709_vm6, %v645_v24, -inf  ;;  %v717_v48 = vsel %vm709_vm6, %v646_v25, -inf }
  0xe3   : > { %1790 = vrot.lane.b32.xlu1 %v3895_v3, %s3409_s17  ;;  %v3933_v49 = vunpack.c.h.b16 %v3928_v32  ;;  %v650_v50 = vunpack.c.l.bf16 %v406_v7  ;;  %v651_v9 = vunpack.c.l.bf16 %v409_v36  ;;  %v711_v51 = vrot.slane %v710_v45, 4  ;;  %1769 = vrot.lane.b32.xlu0 %v3928_v32, %s3403_s11 }
  0xe4   : > { %v718_v54 = vrot.slane %v717_v48, 4  ;;  %v724_v58 = vsel %vm709_vm6, %v647_v26, -inf  ;;  %v731_v5 = vsel %vm709_vm6, %v648_v21, -inf  ;;  %v3939_v16 = vrot.slane %v1561_v22, 4 }
  0xe5   : > { %1634 = vrot.lane.b32.xlu2 %v3895_v3, %s3407_s15  ;;  %v1559_v53 = vpack.c.b16 %v3933_v49, %v3933_v49  ;;  %v652_v59 = vunpack.c.l.bf16 %v412_v28  ;;  %v712_v60 = vmax.f32 %v710_v45, %v711_v51  ;;  %v725_v61 = vrot.slane %v724_v58, 4 }
  0xe6   : > { %v719_v56 = vmax.f32 %v717_v48, %v718_v54  ;;  %v732_v63 = vrot.slane %v731_v5, 4  ;;  %v3947_v0 = vrot.slane %v1564_v43, 5  ;;  %v738_v62 = vsel %vm709_vm6, %v649_v44, -inf }
  0xe7   : > { %v1617_v33 = vshrl.u32 %v1559_v53, 16  ;;  %v1620_v42 = vshll.u32 %v1559_v53, 16  ;;  %v713_v1 = vrot.slane %v712_v60, 2  ;;  %v726_v10 = vmax.f32 %v724_v58, %v725_v61  ;;  %v1246_v58 = vld [vmem:[#allocation2 + $0x14] sm:$0x1] }
  0xe8   : > { %v720_v4 = vrot.slane %v719_v56, 2  ;;  %v733_v12 = vmax.f32 %v731_v5, %v732_v63  ;;  %v739_v30 = vrot.slane %v738_v62, 4  ;;  %v745_v17 = vsel %vm709_vm6, %v650_v50, -inf }
  0xe9   : > { %v1619_v27 = vrot.slane %v1617_v33, 4  ;;  %v1622_v13 = vrot.slane %v1620_v42, 5  ;;  %v714_v18 = vmax.f32 %v712_v60, %v713_v1  ;;  %v727_v37 = vrot.slane %v726_v10, 2  ;;  %v1228_v42 = vld [vmem:[#allocation2 + $0x8] sm:$0x1] }
  0xea   : > { %v734_v39 = vrot.slane %v733_v12, 2  ;;  %v740_v20 = vmax.f32 %v738_v62, %v739_v30  ;;  %v746_v35 = vrot.slane %v745_v17, 4  ;;  %v752_v34 = vsel %vm709_vm6, %v651_v9, -inf }
  0xeb   : > { %1632 = vrot.lane.b32.xlu1 %v3852_v41, %s3407_s15  ;;  %v721_v41 = vmax.f32 %v719_v56, %v720_v4  ;;  %v3951_v38 = vor.u32 %v1622_v13, %v1619_v27  ;;  %v715_v7 = vrot.slane %v714_v18, 1  ;;  %v728_v24 = vmax.f32 %v726_v10, %v727_v37  ;;  %1812 = vrot.lane.b32.xlu0 %v3806_v14, %s3406_s14 }
  0xec   : > { %v735_v25 = vmax.f32 %v733_v12, %v734_v39  ;;  %v741_v26 = vrot.slane %v740_v20, 2  ;;  %v747_v21 = vmax.f32 %v745_v17, %v746_v35  ;;  %v753_v22 = vrot.slane %v752_v34, 4 }
  0xed   : > { %v722_v36 = vrot.slane %v721_v41, 1  ;;  %1728 = vrot.lane.b32.xlu2 %v3897_v8, %s3408_s16  ;;  %v759_v28 = vsel %vm709_vm6, %v652_v59, -inf  ;;  %v716_v43 = vmax.f32 %v714_v18, %v715_v7  ;;  %v729_v45 = vrot.slane %v728_v24, 1 }
  0xee   : > { %v736_v48 = vrot.slane %v735_v25, 1  ;;  %v742_v50 = vmax.f32 %v740_v20, %v741_v26  ;;  %v748_v9 = vrot.slane %v747_v21, 2  ;;  %v754_v51 = vmax.f32 %v752_v34, %v753_v22 }
  0xef   : > { %v723_v44 = vmax.f32 %v721_v41, %v722_v36  ;;  %v760_v54 = vrot.slane %v759_v28, 4  ;;  %v730_v5 = vmax.f32 %v728_v24, %v729_v45  ;;  %v1158_v60 = vpack.c.bf16 %v716_v43, %v716_v43 }
  0xf0   : > { %v737_v53 = vmax.f32 %v735_v25, %v736_v48  ;;  %v743_v59 = vrot.slane %v742_v50, 1  ;;  %v749_v61 = vmax.f32 %v747_v21, %v748_v9  ;;  %v755_v63 = vrot.slane %v754_v51, 2 }
  0xf1   : > { %v1159_v56 = vpack.c.bf16 %v723_v44, %v723_v44  ;;  %v761_v33 = vmax.f32 %v759_v28, %v760_v54  ;;  %v1160_v62 = vpack.c.bf16 %v730_v5, %v730_v5  ;;  %v1334_v4 = vunpack.c.l.b16 %v1158_v60 }
  0xf2   : > { %v1161_v1 = vpack.c.bf16 %v737_v53, %v737_v53  ;;  %v744_v10 = vmax.f32 %v742_v50, %v743_v59  ;;  %v750_v12 = vrot.slane %v749_v61, 1  ;;  %v756_v27 = vmax.f32 %v754_v51, %v755_v63 }
  0xf3   : > { %1726 = vrot.lane.b32.xlu1 %v3895_v3, %s3408_s16  ;;  %v1247_v3 = vsel %vm3610_vm13, 0, %v1246_v58  ;;  %v762_v13 = vrot.slane %v761_v33, 2  ;;  %v1335_v30 = vunpack.c.l.b16 %v1159_v56  ;;  %v1336_v17 = vunpack.c.l.b16 %v1160_v62  ;;  %1638 = vrot.lane.b32.xlu0 %v3951_v38, %s3407_s15 }
  0xf4   : > { %1248 = vst [vmem:[#allocation2 + $0x14] sm:$0x1] %v1247_v3  ;;  %v1337_v18 = vunpack.c.l.b16 %v1161_v1  ;;  %v1229_v41 = vsel %vm3610_vm13, 0, %v1228_v42  ;;  %v751_v37 = vmax.f32 %v749_v61, %v750_v12  ;;  %v757_v39 = vrot.slane %v756_v27, 1 }
  0xf5   : > { %1794 = vrot.lane.b32.xlu2 %v3951_v38, %s3409_s17  ;;  %v763_v20 = vmax.f32 %v761_v33, %v762_v13  ;;  %v1162_v35 = vpack.c.bf16 %v744_v10, %v744_v10  ;;  %1230 = vst [vmem:[#allocation2 + $0x8] sm:$0x1] %v1229_v41  ;;  %v1663_v34 = vpack.c.b16 %v1655_v23, %v3933_v49 }
  0xf6   : > { %v1398_v7 = vsel %vm389_vm2, %v1335_v30, %v1334_v4  ;;  %v351_v36 = vpack.c.bf16 %v3924_v40, %v3924_v40  ;;  %v352_v24 = vpack.c.bf16 %v3926_v31, %v3926_v31  ;;  %v758_v25 = vmax.f32 %v756_v27, %v757_v39 }
  0xf7   : > { %v764_v26 = vrot.slane %v763_v20, 1  ;;  %v1163_v21 = vpack.c.bf16 %v751_v37, %v751_v37  ;;  %v1338_v22 = vunpack.c.l.b16 %v1162_v35  ;;  %v1567_v57 = vor.u32 %v3947_v0, %v3939_v16 }
  0xf8   : > { %v1399_v23 = vsel %vm393_vm4, %v1336_v17, %v1398_v7  ;;  %v383_v49 = vrot.slane %v351_v36, 3  ;;  %v384_v40 = vrot.slane %v352_v24, 3  ;;  %v1164_v43 = vpack.c.bf16 %v758_v25, %v758_v25  ;;  %v4012_v25 = vpop.permute.xlu2 %1699 }
  0xf9   : > { %v765_v28 = vmax.f32 %v763_v20, %v764_v26  ;;  %v1339_v31 = vunpack.c.l.b16 %v1163_v21  ;;  %v1400_v44 = vsel %vm397_vm5, %v1337_v18, %v1399_v23  ;;  %v3983_v45 = vrot.slane %v1663_v34, 5 }
  0xfa   : > { %v1402_v48 = vsel %vm1401_vm7, %v1338_v22, %v1400_v44  ;;  %v560_v50 = vsel %vm389_vm2, %v351_v36, %v383_v49  ;;  %v563_v9 = vsel %vm393_vm4, %v351_v36, %v383_v49  ;;  %v1340_v54 = vunpack.c.l.b16 %v1164_v43 }
  0xfb   : > { %1792 = vrot.lane.b32.xlu1 %v3897_v8, %s3409_s17  ;;  %v1165_v51 = vpack.c.bf16 %v765_v28, %v765_v28  ;;  %v1404_v58 = vsel %vm1403_vm8, %v1339_v31, %v1402_v48  ;;  %v559_v5 = vsel %vm385_vm1, %v351_v36, %v383_v49  ;;  %v3990_v53 = vld [vmem:[#allocation2 + $0x14] sm:$0x1]  ;;  %v562_v56 = vrot.slane %v560_v50, 1  ;;  %1684 = vrot.lane.b32.xlu0 %v3806_v14, %s3405_s13 }
  0xfc   : > { %v1484_v60 = vld [vmem:[#allocation2 + $0x8] sm:$0x1]  ;;  %v565_v59 = vrot.slane %v563_v9, 2  ;;  %v566_v61 = vsel %vm397_vm5, %v351_v36, %v383_v49  ;;  %v571_v63 = vsel %vm385_vm1, %v352_v24, %v384_v40  ;;  %v1406_v42 = vsel %vm1405_vm9, %v1340_v54, %v1404_v58 }
  0xfd   : > { %1636 = vrot.lane.b32.xlu2 %v3897_v8, %s3407_s15  ;;  %v1341_v33 = vunpack.c.l.b16 %v1165_v51  ;;  %v1648_v62 = vunpack.c.l.b16 %v1484_v60  ;;  %v568_v1 = vrot.slane %v566_v61, 3  ;;  %v572_v3 = vsel %vm389_vm2, %v352_v24, %v384_v40 }
  0xfe   : > { %v575_v4 = vsel %vm393_vm4, %v352_v24, %v384_v40  ;;  %v578_v10 = vsel %vm397_vm5, %v352_v24, %v384_v40  ;;  %v701_v12 = vunpack.c.l.bf16 %v559_v5  ;;  %v1649_v27 = vunpack.c.l.b16 %v3990_v53 }
  0xff   : > { %v1408_v8 = vsel %vm1407_vm10, %v1341_v33, %v1406_v42  ;;  %v574_v13 = vrot.slane %v572_v3, 1  ;;  %v577_v30 = vrot.slane %v575_v4, 2  ;;  %v580_v18 = vrot.slane %v578_v10, 3  ;;  %v4026_v42 = vpop.permute.xlu0 %1703 }
 0x100   : > { %v1458_v17 = vpack.c.b16 %v1408_v8, %v1408_v8  ;;  %v702_v41 = vunpack.c.l.bf16 %v562_v56  ;;  %v703_v37 = vunpack.c.l.bf16 %v565_v59  ;;  %v4007_v39 = vpack.c.b16 %v1648_v62, %v3913_v55 }
 0x101   : > { %v704_v20 = vunpack.c.l.bf16 %v568_v1  ;;  %v705_v35 = vunpack.c.l.bf16 %v571_v63  ;;  %v706_v34 = vunpack.c.l.bf16 %v574_v13  ;;  %v707_v7 = vunpack.c.l.bf16 %v577_v30 }
 0x102   : > { %1474 = vst.msk [vmem:[#allocation2 + $0x10] sm:$0xf] %vm1222_vm3, %v1458_v17  ;;  %v708_v14 = vunpack.c.l.bf16 %v580_v18  ;;  %v1102_v36 = vsel %vm709_vm6, %v701_v12, -inf  ;;  %v1109_v24 = vsel %vm709_vm6, %v702_v41, -inf  ;;  %v1116_v22 = vsel %vm709_vm6, %v703_v37, -inf  ;;  %v4031_v41 = vpop.permute.xlu2 %1767 }
 0x103   : > { %1814 = vrot.lane.b32.xlu1 %v3983_v45, %s3406_s14  ;;  %v1103_v26 = vrot.slane %v1102_v36, 4  ;;  %v1110_v21 = vrot.slane %v1109_v24, 4  ;;  %v1123_v55 = vsel %vm709_vm6, %v704_v20, -inf  ;;  %v1117_v23 = vrot.slane %v1116_v22, 4 }
 0x104   : > { %v1124_v49 = vrot.slane %v1123_v55, 4  ;;  %v1130_v40 = vsel %vm709_vm6, %v705_v35, -inf  ;;  %v1137_v28 = vsel %vm709_vm6, %v706_v34, -inf  ;;  %v1144_v51 = vsel %vm709_vm6, %v707_v7, -inf }
 0x105   : > { %v1104_v43 = vmax.f32 %v1102_v36, %v1103_v26  ;;  %v1111_v31 = vmax.f32 %v1109_v24, %v1110_v21  ;;  %v1131_v44 = vrot.slane %v1130_v40, 4  ;;  %v1138_v48 = vrot.slane %v1137_v28, 4 }
 0x106   : > { %v1118_v50 = vmax.f32 %v1116_v22, %v1117_v23  ;;  %v1125_v9 = vmax.f32 %v1123_v55, %v1124_v49  ;;  %v1151_v54 = vsel %vm709_vm6, %v708_v14, -inf  ;;  %v1145_v61 = vrot.slane %v1144_v51, 4 }
 0x107   : > { %v1105_v58 = vrot.slane %v1104_v43, 2  ;;  %v1112_v5 = vrot.slane %v1111_v31, 2  ;;  %v1132_v53 = vmax.f32 %v1130_v40, %v1131_v44  ;;  %v1139_v60 = vmax.f32 %v1137_v28, %v1138_v48 }
 0x108   : > { %v1119_v56 = vrot.slane %v1118_v50, 2  ;;  %v1126_v59 = vrot.slane %v1125_v9, 2  ;;  %v1152_v63 = vrot.slane %v1151_v54, 4  ;;  %v1146_v22 = vmax.f32 %v1144_v51, %v1145_v61 }
 0x109   : > { %v4024_v33 = vld [vmem:[#allocation2 + $0xc] sm:$0xff]   ;;  %v1106_v62 = vmax.f32 %v1104_v43, %v1105_v58  ;;  %v1113_v1 = vmax.f32 %v1111_v31, %v1112_v5  ;;  %v1133_v3 = vrot.slane %v1132_v53, 2  ;;  %v1140_v4 = vrot.slane %v1139_v60, 2  ;;  %v1267_v5 = vld [vmem:[#allocation2 + $0x68] sm:$0x1] }
 0x10a   : > { %v1531_v10 = vunpack.c.h.b16 %v4024_v33  ;;  %v1120_v16 = vmax.f32 %v1118_v50, %v1119_v56  ;;  %v1127_v0 = vmax.f32 %v1125_v9, %v1126_v59  ;;  %v1153_v49 = vmax.f32 %v1151_v54, %v1152_v63  ;;  %v4039_v59 = vpop.permute.xlu0 %1744 }
 0x10b   : > { %1624 = vrot.lane.b32.xlu1 %v1567_v57, %s3407_s15  ;;  %v1107_v57 = vrot.slane %v1106_v62, 1  ;;  %v1114_v12 = vrot.slane %v1113_v1, 1  ;;  %v1134_v8 = vmax.f32 %v1132_v53, %v1133_v3  ;;  %v1141_v13 = vmax.f32 %v1139_v60, %v1140_v4 }
 0x10c   : > { %v4029_v30 = vpack.c.b16 %v1649_v27, %v1531_v10  ;;  %v1553_v17 = vpack.c.b16 %v1531_v10, %v1531_v10  ;;  %v1121_v18 = vrot.slane %v1120_v16, 1  ;;  %v1128_v35 = vrot.slane %v1127_v0, 1 }
 0x10d   : > { %v1108_v37 = vmax.f32 %v1106_v62, %v1107_v57  ;;  %v1115_v20 = vmax.f32 %v1113_v1, %v1114_v12  ;;  %v1135_v34 = vrot.slane %v1134_v8, 1  ;;  %v1142_v27 = vrot.slane %v1141_v13, 1 }
 0x10e   : > { %v1665_v7 = vrot.slane %v4029_v30, 5  ;;  %v1569_v14 = vshrl.u32 %v1553_v17, 16  ;;  %v1572_v36 = vshll.u32 %v1553_v17, 16  ;;  %v1122_v24 = vmax.f32 %v1120_v16, %v1121_v18 }
 0x10f   : > { %v1129_v26 = vmax.f32 %v1127_v0, %v1128_v35  ;;  %v1136_v21 = vmax.f32 %v1134_v8, %v1135_v34  ;;  %v1214_v40 = vpack.c.bf16 %v1108_v37, %v1108_v37  ;;  %v1143_v28 = vmax.f32 %v1141_v13, %v1142_v27 }
 0x110   : > { %1674 = vrot.lane.b32.xlu0 %v1665_v7, %s3405_s13  ;;  %v1571_v55 = vrot.slane %v1569_v14, 4  ;;  %v1574_v23 = vrot.slane %v1572_v36, 5  ;;  %v1147_v43 = vrot.slane %v1146_v22, 2  ;;  %v1215_v31 = vpack.c.bf16 %v1115_v20, %v1115_v20 }
 0x111   : > { %v1216_v44 = vpack.c.bf16 %v1122_v24, %v1122_v24  ;;  %v1154_v50 = vrot.slane %v1153_v49, 2  ;;  %v1217_v9 = vpack.c.bf16 %v1129_v26, %v1129_v26  ;;  %v1218_v58 = vpack.c.bf16 %v1136_v21, %v1136_v21  ;;  %v4059_v24 = vpop.permute.xlu1 %1763 }
 0x112   : > { %v1575_v48 = vor.u32 %v1574_v23, %v1571_v55  ;;  %v1148_v53 = vmax.f32 %v1146_v22, %v1147_v43  ;;  %v1219_v60 = vpack.c.bf16 %v1143_v28, %v1143_v28  ;;  %v1390_v51 = vunpack.c.l.b16 %v1214_v40 }
 0x113   : > { %1686 = vrot.lane.b32.xlu1 %v3983_v45, %s3405_s13  ;;  %v1391_v56 = vunpack.c.l.b16 %v1215_v31  ;;  %v1155_v61 = vmax.f32 %v1153_v49, %v1154_v50  ;;  %v1392_v54 = vunpack.c.l.b16 %v1216_v44  ;;  %v1393_v63 = vunpack.c.l.b16 %v1217_v9 }
 0x114   : > { %1626 = vrot.lane.b32.xlu2 %v1575_v48, %s3407_s15  ;;  %v1394_v62 = vunpack.c.l.b16 %v1218_v58  ;;  %v1149_v1 = vrot.slane %v1148_v53, 1  ;;  %v1268_v4 = vsel %vm3610_vm13, 0, %v1267_v5  ;;  %v1395_v16 = vunpack.c.l.b16 %v1219_v60  ;;  %v1234_v58 = vld [vmem:[#allocation2 + $0x74] sm:$0x1]  ;;  %s3412_s15 = smov 48  }
 0x115   : > { %v1451_v3 = vsel %vm389_vm2, %v1391_v56, %v1390_v51  ;;  %v1156_v10 = vrot.slane %v1155_v61, 1  ;;  %1269 = vst [vmem:[#allocation2 + $0x68] sm:$0x1] %v1268_v4  ;;  %v1664_v13 = vrot.slane %v4007_v39, 5  ;;  %v4063_v39 = vld [vmem:[#allocation2 + $0x18] sm:$0xff]   ;;  %v1235_v5 = vsel %vm3610_vm13, 0, %v1234_v58 }
 0x116   : > { %v1452_v0 = vsel %vm393_vm4, %v1392_v54, %v1451_v3  ;;  %v1150_v12 = vmax.f32 %v1148_v53, %v1149_v1  ;;  %1236 = vst [vmem:[#allocation2 + $0x74] sm:$0x1] %v1235_v5  ;;  %v1510_v1 = vld [vmem:[#allocation2 + $0x6c] sm:$0xff]   ;;  %vm1878_vm1 = vcmask 130048   ;;  %vm2158_vm2 = vcmask 1041408  }
 0x117   : > { %v4048_v57 = vpop.permute.xlu2 %1697  ;;  %v1453_v8 = vsel %vm397_vm5, %v1393_v63, %v1452_v0  ;;  %v1157_v17 = vmax.f32 %v1155_v61, %v1156_v10  ;;  %v1757_v4 = vunpack.c.h.b16 %v1510_v1  ;;  %vm1912_vm4 = vcmask 195584  }
 0x118   : > { %1693 = vrot.lane.b32.xlu0 %v4024_v33, %s3402_s10  ;;  %v1454_v18 = vsel %vm1401_vm7, %v1394_v62, %v1453_v8  ;;  %v1220_v37 = vpack.c.bf16 %v1150_v12, %v1150_v12  ;;  %vm1929_vm5 = vcmask 228352   ;;  %vm1946_vm6 = vcmask 261120  }
 0x119   : > { %v1221_v20 = vpack.c.bf16 %v1157_v17, %v1157_v17  ;;  %v1455_v35 = vsel %vm1403_vm8, %v1395_v16, %v1454_v18  ;;  %v1677_v49 = vpop.permute.xlu1 %1676  ;;  %v1775_v8 = vpack.c.b16 %v1757_v4, %v1757_v4  ;;  %v2113_v18 = vld [vmem:[%s4673_s1 + $0x10] sm:$0x3]  ;;  %vm2003_vm7 = vsmask.f32 4368 }
 0x11a   : > { %v1396_v34 = vunpack.c.l.b16 %v1220_v37  ;;  %v2139_v37 = vunpack.c.l.b16 %v2113_v18  ;;  %vm4155_vm8 = vmor %vm1226_vm12, %vm2003_vm7  ;;  %vm2672_vm13 = vcmask 326656  }
 0x11b   : > { %1705 = vrot.lane.b32.xlu1 %v3928_v32, %s3402_s10  ;;  %v4056_v14 = vpop.permute.xlu0 %1810  ;;  %v1397_v36 = vunpack.c.l.b16 %v1221_v20  ;;  %v1777_v20 = vshrl.u32 %v1775_v8, 16 }
 0x11c   : > { %1672 = vrot.lane.b32.xlu2 %v1664_v13, %s3405_s13  ;;  %v1456_v26 = vsel %vm1405_vm9, %v1396_v34, %v1455_v35  ;;  %v1508_v23 = vld [vmem:[#allocation2 + $0x68] sm:$0x1]  ;;  %v2142_v35 = vpack.c.b16 %v2139_v37, %v2139_v37  ;;  %v1780_v34 = vshll.u32 %v1775_v8, 16  ;;  %vm2145_vm9 = vcmask 293888  }
 0x11d   : > { %v1457_v21 = vsel %vm1407_vm10, %v1397_v36, %v1456_v26  ;;  %v1735_v40 = vunpack.c.l.b16 %v1508_v23  ;;  %v1511_v16 = vld [vmem:[#allocation2 + $0x74] sm:$0x1]  ;;  %vm2199_vm10 = vcmask 60416  }
 0x11e   : > { %v1465_v27 = vpack.c.b16 %v1457_v21, %v1457_v21  ;;  %v1801_v13 = vunpack.c.l.b16 %v1511_v16  ;;  %2200 = vst.msk [vmem:[#allocation3] sm:$0xf] %vm2199_vm10, %v3401_v6 }
 0x11f   : > { %v4067_v22 = vpop.permute.xlu2 %1765  ;;  %2201 = vst.msk [vmem:[#allocation3 + $0x4] sm:$0xf] %vm2199_vm10, %v3401_v6 }
 0x120   : > { %1481 = vst.msk [vmem:[#allocation2 + $0x64] sm:$0xf] %vm1222_vm3, %v1465_v27  ;;  %v1802_v36 = vpack.c.b16 %v1801_v13, %v1757_v4  ;;  %vm1895_vm3 = vcmask 162816   ;;  %v2160_v27 = vsel %vm2158_vm2, %v2142_v35, 0  ;;  %vm2706_vm2 = vcmask 457728  }
 0x121   : > { %3271 = vmatpush.bf16.msra.mxu3 %v2160_v27  ;;  %2167 = vmatpush.bf16.msra.mxu0 %v2160_v27  ;;  %2208 = vst.msk [vmem:[#allocation3 + $0x6c] sm:$0xf] %vm2199_vm10, %v3401_v6 }
 0x122   : > { %2209 = vst.msk [vmem:[#allocation3 + $0x70] sm:$0xf] %vm2199_vm10, %v3401_v6 }
 0x123   : > { %1695 = vrot.lane.b32.xlu1 %v4063_v39, %s3402_s10  ;;  %v4070_v55 = vpop.permute.xlu0 %1680  ;;  %2214 = vst.msk [vmem:[#allocation3 + $0xc] sm:$0xf] %vm2199_vm10, %v3401_v6 }
 0x124   : > { %2215 = vst.msk [vmem:[#allocation3 + $0x18] sm:$0xf] %vm2199_vm10, %v3401_v6 }
 0x125   : > { %2216 = vst.msk [vmem:[#allocation3 + $0x24] sm:$0xf] %vm2199_vm10, %v3401_v6 }
 0x126   : > { %2217 = vst.msk [vmem:[#allocation3 + $0x30] sm:$0xf] %vm2199_vm10, %v3401_v6 }
 0x127   : > { %v3266_v28 = vld [vmem:[#allocation2 + $0x60] sm:$0xff]   ;;  %v4074_v44 = vpop.permute.xlu2 %1701  ;;  %2218 = vst.msk [vmem:[#allocation3 + $0x3c] sm:$0xf] %vm2199_vm10, %v3401_v6 }
 0x128   : > { %v3227_v43 = vunpack.c.h.b16 %v3266_v28  ;;  %1707 = vrot.lane.b32.xlu2 %v3266_v28, %s3402_s10  ;;  %2219 = vst.msk [vmem:[#allocation3 + $0x48] sm:$0xf] %vm2199_vm10, %v3401_v6  ;;  %s3410_s10 = smov 56  }
 0x129   : > { %2220 = vst.msk [vmem:[#allocation3 + $0x54] sm:$0xf] %vm2199_vm10, %v3401_v6 }
 0x12a   : > { %v1709_v31 = vpack.c.b16 %v3227_v43, %v3227_v43  ;;  %v4076_v50 = vpack.c.b16 %v1735_v40, %v3227_v43  ;;  %2221 = vst.msk [vmem:[#allocation3 + $0x60] sm:$0xf] %vm2199_vm10, %v3401_v6 }
 0x12b   : > { %1718 = vrot.lane.b32.xlu1 %v1575_v48, %s3408_s16  ;;  %v4078_v9 = vpop.permute.xlu0 %1746 }
 0x12c   : > { %v1711_v53 = vshrl.u32 %v1709_v31, 16  ;;  %v1714_v60 = vshll.u32 %v1709_v31, 16  ;;  %v1737_v48 = vrot.slane %v4076_v50, 5 }
 0x12e   : > { %v1713_v51 = vrot.slane %v1711_v53, 4  ;;  %v1716_v56 = vrot.slane %v1714_v60, 5 }
 0x12f   : > { %v1743_v63 = vpop.permute.xlu2 %1742 }
 0x130   : > { %v4086_v61 = vor.u32 %v1716_v56, %v1713_v51  ;;  %1730 = vrot.lane.b32.xlu2 %v3951_v38, %s3408_s16 }
 0x132   : > { %1732 = vrot.lane.b32.xlu0 %v4086_v61, %s3408_s16 }
 0x133   : > { %1752 = vrot.lane.b32.xlu1 %v1737_v48, %s3404_s12  ;;  %v1629_v2 = vpop.permute.xlu0 %1628 }
 0x134   : > { %v1828_v38 = vsel %vm288_vm0, %v4063_v39, %v1629_v2 }
 0x135   : > { %v1679_v54 = vpop.permute.xlu1 %1678 }
 0x137   : > { %v1809_v10 = vpop.permute.xlu2 %1808 }
 0x138   : > { %1720 = vrot.lane.b32.xlu2 %v3818_v29, %s3408_s16 }
 0x13a   : > { %1750 = vrot.lane.b32.xlu0 %v3983_v45, %s3404_s12  ;;  %v1850_v45 = vsel %vm1844_vm14, %v1828_v38, %v1677_v49  ;;  %v1779_v49 = vrot.slane %v1777_v20, 4 }
 0x13b   : > { %1771 = vrot.lane.b32.xlu1 %v3266_v28, %s3403_s11  ;;  %v1631_v3 = vpop.permute.xlu0 %1630  ;;  %v1803_v28 = vrot.slane %v1802_v36, 5 }
 0x13c   : > { %v1831_v12 = vsel %vm288_vm0, %v3813_v19, %v1631_v3 }
 0x13d   : > { %v4095_v62 = vpop.permute.xlu1 %1682  ;;  %v1852_v30 = vsel %vm1844_vm14, %v1831_v12, %v1679_v54 }
 0x13e   : > { %v1869_v26 = vsel %vm1861_vm15, %v1852_v30, %v4012_v25  ;;  %v1782_v25 = vrot.slane %v1780_v34, 5 }
 0x13f   : > { %v4125_v23 = vpop.permute.xlu2 %1634 }
 0x140   : > { %1738 = vrot.lane.b32.xlu2 %v1665_v7, %s3404_s12  ;;  %v1867_v7 = vsel %vm1861_vm15, %v1850_v45, %v4048_v57  ;;  %v1783_v56 = vor.u32 %v1782_v25, %v1779_v49 }
 0x142   : > { %1740 = vrot.lane.b32.xlu0 %v3720_v52, %s3404_s12  ;;  %s3411_s12 = smov 64  }
 0x143   : > { %1761 = vrot.lane.b32.xlu1 %v3813_v19, %s3403_s11  ;;  %v1723_v17 = vpop.permute.xlu0 %1722 }
 0x144   : > { %v1884_v19 = vsel %vm1878_vm1, %v1867_v7, %v1723_v17 }
 0x145   : > { %v4106_v0 = vpop.permute.xlu1 %1748  ;;  %v1901_v21 = vsel %vm1895_vm3, %v1884_v19, %v1743_v63 }
 0x146   : > { %v1918_v43 = vsel %vm1912_vm4, %v1901_v21, %v4059_v24 }
 0x147   : > { %v1729_v3 = vpop.permute.xlu2 %1728 }
 0x148   : > { %1773 = vrot.lane.b32.xlu2 %v1510_v1, %s3403_s11 }
 0x14a   : > { %1759 = vrot.lane.b32.xlu0 %v4063_v39, %s3403_s11  ;;  %v3137_v39 = vld [vmem:[%s4673_s1] sm:$0xff] }
 0x14b   : > { %1784 = vrot.lane.b32.xlu1 %v3818_v29, %s3409_s17  ;;  %v3138_v29 = vld [vmem:[%s4673_s1 + $0x8] sm:$0xff]  ;;  %v1789_v31 = vpop.permute.xlu0 %1788 }
 0x14c   : > { %v1935_v5 = vsel %vm1929_vm5, %v1918_v43, %v1789_v31  ;;  %3272 = vmatpush.bf16.msra.mxu3 %v3138_v29  ;;  %2168 = vmatpush.bf16.msra.mxu0 %v3138_v29 }
 0x14d   : > { %v1725_v57 = vpop.permute.xlu1 %1724  ;;  %v1952_v53 = vsel %vm1946_vm6, %v1935_v5, %v1809_v10 }
 0x14e   : > { %v1886_v40 = vsel %vm1878_vm1, %v1869_v26, %v1725_v57  ;;  %v1975_v60 = vunpack.c.l.b16 %v1952_v53  ;;  %v1976_v51 = vunpack.c.h.b16 %v1952_v53 }
 0x14f   : > { %v1903_v58 = vsel %vm1895_vm3, %v1886_v40, %v4039_v59  ;;  %v1795_v19 = vpop.permute.xlu2 %1794 }
 0x150   : > { %v1920_v24 = vsel %vm1912_vm4, %v1903_v58, %v4067_v22  ;;  %v1992_v59 = vpack.c.b16 %v1976_v51, %v1976_v51  ;;  %1796 = vrot.lane.b32.xlu2 %v4086_v61, %s3409_s17  ;;  %v1991_v2 = vpack.c.b16 %v1975_v60, %v1975_v60  ;;  %3273 = vmatpush.bf16.msra.mxu3 %v3137_v39 }
 0x151   : > { %2169 = vmatpush.bf16.msra.mxu0 %v3137_v39 }
 0x152   : > { %v2037_v1 = vshrl.u32 %v1992_v59, 16  ;;  %1798 = vrot.lane.b32.xlu0 %v1783_v56, %s3409_s17  ;;  %v2032_v16 = vshrl.u32 %v1991_v2, 16  ;;  %v2040_v45 = vshll.u32 %v1992_v59, 16 }
 0x153   : > { %1818 = vrot.lane.b32.xlu1 %v1803_v28, %s3406_s14 }
 0x154   : > { %v2039_v38 = vrot.slane %v2037_v1, 7  ;;  %v3085_v18 = vrot.slane %v2032_v16, 11 }
 0x155   : > { %v1791_v54 = vpop.permute.xlu1 %1790  ;;  %v1770_v21 = vpop.permute.xlu0 %1769 }
 0x156   : > { %v1937_v63 = vsel %vm1929_vm5, %v1920_v24, %v1791_v54  ;;  %v2042_v8 = vor.u32 %v2040_v45, %v2039_v38 }
 0x157   : > { %v1954_v4 = vsel %vm1946_vm6, %v1937_v63, %v4056_v14  ;;  %v3335_v14 = vld [vmem:[#allocation2 + $0x30] sm:$0xff]  }
 0x158   : > { %v1977_v10 = vunpack.c.l.b16 %v1954_v4  ;;  %v1978_v22 = vunpack.c.h.b16 %v1954_v4  ;;  %1786 = vrot.lane.b32.xlu2 %v3836_v15, %s3409_s17  ;;  %v2043_v20 = vsel %vm4155_vm8, %v3085_v18, %v2042_v8  ;;  %s3413_s17 = smov 40  }
 0x159   : > { %v2120_v27 = vunpack.c.l.b16 %v2043_v20 }
 0x15a   : > { %v1993_v12 = vpack.c.b16 %v1977_v10, %v1977_v10  ;;  %v1994_v61 = vpack.c.b16 %v1978_v22, %v1978_v22  ;;  %1816 = vrot.lane.b32.xlu0 %v1737_v48, %s3406_s14 }
 0x15c   : > { %v2050_v13 = vshrl.u32 %v1994_v61, 16  ;;  %v2045_v30 = vshrl.u32 %v1993_v12, 16  ;;  %v2053_v35 = vshll.u32 %v1994_v61, 16 }
 0x15d   : > { %v1633_v17 = vpop.permute.xlu1 %1632  ;;  %v1813_v43 = vpop.permute.xlu0 %1812 }
 0x15e   : > { %v1834_v37 = vsel %vm288_vm0, %v3335_v14, %v1633_v17  ;;  %v2052_v15 = vrot.slane %v2050_v13, 7  ;;  %v3086_v34 = vrot.slane %v2045_v30, 11 }
 0x15f   : > { %v1854_v26 = vsel %vm1844_vm14, %v1834_v37, %v4070_v55  ;;  %v1837_v55 = vsel %vm288_vm0, %v3755_v47, %v4125_v23 }
 0x160   : > { %v2055_v36 = vor.u32 %v2053_v35, %v2052_v15  ;;  %1804 = vrot.lane.b32.xlu2 %v3720_v52, %s3406_s14  ;;  %v1871_v57 = vsel %vm1861_vm15, %v1854_v26, %v4074_v44  ;;  %v4184_v44 = vpop.permute.xlu2 %1636  ;;  %v1856_v28 = vsel %vm1844_vm14, %v1837_v55, %v4095_v62 }
 0x161   : > { %v1873_v47 = vsel %vm1861_vm15, %v1856_v28, %v4026_v42 }
 0x162   : > { %v2056_v50 = vsel %vm4155_vm8, %v3086_v34, %v2055_v36  ;;  %1806 = vrot.lane.b32.xlu0 %v3824_v46, %s3406_s14  ;;  %v1890_v46 = vsel %vm1878_vm1, %v1873_v47, %v1729_v3 }
 0x163   : > { %v2121_v48 = vunpack.c.l.b16 %v2056_v50  ;;  %v1907_v5 = vsel %vm1895_vm3, %v1890_v46, %v4106_v0 }
 0x164   : > { %v1924_v53 = vsel %vm1912_vm4, %v1907_v5, %v1770_v21 }
 0x165   : > { %v1727_v49 = vpop.permute.xlu1 %1726  ;;  %v2127_v29 = vpack.c.b16 %v2121_v48, %v2120_v27  ;;  %v1941_v56 = vsel %vm1929_vm5, %v1924_v53, %v1795_v19  ;;  %v1639_v30 = vpop.permute.xlu0 %1638 }
 0x166   : > { %v1888_v40 = vsel %vm1878_vm1, %v1871_v57, %v1727_v49 }
 0x167   : > { %v1905_v25 = vsel %vm1895_vm3, %v1888_v40, %v4078_v9  ;;  %3100 = vmatmul.msk.bf16.vlgmr.msra.gmra.mxu3 %vm2145_vm9, %v2127_v29 }
 0x168   : > { %v1922_v52 = vsel %vm1912_vm4, %v1905_v25, %v4031_v41 }
 0x16d   : > { %v1793_v23 = vpop.permute.xlu1 %1792  ;;  %v1685_v35 = vpop.permute.xlu0 %1684 }
 0x16e   : > { %v1939_v31 = vsel %vm1929_vm5, %v1922_v52, %v1793_v23  ;;  %v4196_v60 = vpop.permute.xlu2 %1626 }
 0x16f   : > { %v1956_v9 = vsel %vm1946_vm6, %v1939_v31, %v1813_v43  ;;  %v1843_v31 = vsel %vm288_vm0, %v3928_v32, %v1639_v30 }
 0x170   : > { %v1979_v58 = vunpack.c.l.b16 %v1956_v9  ;;  %v1980_v41 = vunpack.c.h.b16 %v1956_v9 }
 0x172   : > { %v1996_v39 = vpack.c.b16 %v1980_v41, %v1980_v41  ;;  %v1995_v62 = vpack.c.b16 %v1979_v58, %v1979_v58 }
 0x174   : > { %v2063_v51 = vshrl.u32 %v1996_v39, 16  ;;  %v2058_v63 = vshrl.u32 %v1995_v62, 16  ;;  %v2066_v1 = vshll.u32 %v1996_v39, 16 }
 0x175   : > { %v1815_v42 = vpop.permute.xlu1 %1814 }
 0x176   : > { %v1958_v24 = vsel %vm1946_vm6, %v1941_v56, %v1815_v42  ;;  %v2065_v59 = vrot.slane %v2063_v51, 7  ;;  %v3087_v22 = vrot.slane %v2058_v63, 11  ;;  %v1673_v61 = vpop.permute.xlu2 %1672  ;;  %v3336_v42 = vld [vmem:[#allocation2 + $0x48] sm:$0xff]  }
 0x177   : > { %v1981_v54 = vunpack.c.l.b16 %v1958_v24  ;;  %v1982_v2 = vunpack.c.h.b16 %v1958_v24  ;;  %v1840_v32 = vsel %vm288_vm0, %v3336_v42, %v4184_v44 }
 0x178   : > { %v2068_v0 = vor.u32 %v2066_v1, %v2065_v59  ;;  %v1858_v24 = vsel %vm1844_vm14, %v1840_v32, %v1685_v35 }
 0x179   : > { %v1997_v3 = vpack.c.b16 %v1981_v54, %v1981_v54  ;;  %v1998_v4 = vpack.c.b16 %v1982_v2, %v1982_v2 }
 0x17a   : > { %v2069_v8 = vsel %vm4155_vm8, %v3087_v22, %v2068_v0 }
 0x17b   : > { %v2071_v38 = vshrl.u32 %v1997_v3, 16  ;;  %v2076_v10 = vshrl.u32 %v1998_v4, 16  ;;  %v2079_v45 = vshll.u32 %v1998_v4, 16  ;;  %v2122_v18 = vunpack.c.l.b16 %v2069_v8 }
 0x17c   : > { %v1825_v8 = vsel %vm288_vm0, %v4024_v33, %v4196_v60 }
 0x17d   : > { %v2078_v16 = vrot.slane %v2076_v10, 7  ;;  %v1625_v12 = vpop.permute.xlu1 %1624  ;;  %v3088_v13 = vrot.slane %v2071_v38, 11 }
 0x17e   : > { %v1822_v47 = vsel %vm288_vm0, %v3904_v11, %v1625_v12  ;;  %vm2202_vm0 = vcmask 57344  }
 0x17f   : > { %v2081_v17 = vor.u32 %v2079_v45, %v2078_v16  ;;  %v1846_v9 = vsel %vm1844_vm14, %v1822_v47, %v1673_v61  ;;  %vm4291_vm11 = vmand %vm2202_vm0, %vm1226_vm12  ;;  %vm2949_vm12 = vcmask 1043456  }
 0x181   : > { %v2082_v14 = vsel %vm4155_vm8, %v3088_v13, %v2081_v17 }
 0x182   : > { %v2123_v37 = vunpack.c.l.b16 %v2082_v14  ;;  %v1708_v15 = vpop.permute.xlu2 %1707  ;;  %v1675_v26 = vpop.permute.xlu0 %1674 }
 0x183   : > { %v1848_v17 = vsel %vm1844_vm14, %v1825_v8, %v1675_v26 }
 0x184   : > { %v2128_v19 = vpack.c.b16 %v2123_v37, %v2122_v18 }
 0x185   : > { %v1687_v20 = vpop.permute.xlu1 %1686 }
 0x186   : > { %3101 = vmatmul.msk.bf16.gmra.mxu3 %vm2145_vm9, %v2128_v19  ;;  %v1860_v58 = vsel %vm1844_vm14, %v1843_v31, %v1687_v20 }
 0x187   : > { %v1877_v39 = vsel %vm1861_vm15, %v1860_v58, %v1708_v15 }
 0x18a   : > { %v1731_v36 = vpop.permute.xlu2 %1730  ;;  %v1694_v48 = vpop.permute.xlu0 %1693 }
 0x18b   : > { %v1863_v5 = vsel %vm1861_vm15, %v1846_v9, %v1694_v48 }
 0x18d   : > { %v1706_v34 = vpop.permute.xlu1 %1705 }
 0x18e   : > { %v1875_v63 = vsel %vm1861_vm15, %v1858_v24, %v1706_v34 }
 0x18f   : > { %v1892_v44 = vsel %vm1878_vm1, %v1875_v63, %v1731_v36 }
 0x192   : > { %v4205_v27 = vpop.permute.xlu2 %1720 }
 0x195   : > { %v1696_v21 = vpop.permute.xlu1 %1695 }
 0x196   : > { %v1865_v30 = vsel %vm1861_vm15, %v1848_v17, %v1696_v21  ;;  %vm2689_vm15 = vcmask 392192  }
 0x197   : > { %v1882_v36 = vsel %vm1878_vm1, %v1865_v30, %v4205_v27  ;;  %v2231_v30 = vld [vmem:[#allocation3 + $0x38] sm:$0x1] }
 0x19a   : > { %v1739_v57 = vpop.permute.xlu2 %1738 }
 0x19d   : > { %v1719_v50 = vpop.permute.xlu1 %1718 }
 0x19e   : > { %v1880_v53 = vsel %vm1878_vm1, %v1863_v5, %v1719_v50 }
 0x19f   : > { %v1897_v11 = vsel %vm1895_vm3, %v1880_v53, %v1739_v57 }
 0x1a2   : > { %v1774_v29 = vpop.permute.xlu2 %1773 }
 0x1a4   : > { %v1733_v40 = vpop.permute.xlu0 %1732 }
 0x1a5   : > { %v1753_v49 = vpop.permute.xlu1 %1752  ;;  %v1894_v62 = vsel %vm1878_vm1, %v1877_v39, %v1733_v40 }
 0x1a6   : > { %v1911_v51 = vsel %vm1895_vm3, %v1894_v62, %v1753_v49 }
 0x1a7   : > { %v1928_v1 = vsel %vm1912_vm4, %v1911_v51, %v1774_v29 }
 0x1aa   : > { %v1797_v52 = vpop.permute.xlu2 %1796 }
 0x1ac   : > { %v1751_v25 = vpop.permute.xlu0 %1750 }
 0x1ad   : > { %v1772_v55 = vpop.permute.xlu1 %1771  ;;  %v1909_v16 = vsel %vm1895_vm3, %v1892_v44, %v1751_v25 }
 0x1ae   : > { %v1926_v45 = vsel %vm1912_vm4, %v1909_v16, %v1772_v55 }
 0x1af   : > { %v1943_v14 = vsel %vm1929_vm5, %v1926_v45, %v1797_v52 }
 0x1b2   : > { %v4211_v23 = vpop.permute.xlu2 %1786 }
 0x1b4   : > { %v1741_v43 = vpop.permute.xlu0 %1740 }
 0x1b5   : > { %v4207_v28 = vpop.permute.xlu1 %1761  ;;  %v1899_v21 = vsel %vm1895_vm3, %v1882_v36, %v1741_v43  ;;  %vm2723_vm3 = vcmask 523264  }
 0x1b6   : > { %v1916_v49 = vsel %vm1912_vm4, %v1899_v21, %v4207_v28 }
 0x1b7   : > { %v1933_v52 = vsel %vm1929_vm5, %v1916_v49, %v4211_v23 }
 0x1ba   : > { %v1805_v54 = vpop.permute.xlu2 %1804 }
 0x1bc   : > { %v1760_v41 = vpop.permute.xlu0 %1759 }
 0x1bd   : > { %v1785_v46 = vpop.permute.xlu1 %1784  ;;  %v1914_v56 = vsel %vm1912_vm4, %v1897_v11, %v1760_v41 }
 0x1be   : > { %v1931_v59 = vsel %vm1929_vm5, %v1914_v56, %v1785_v46 }
 0x1bf   : > { %v1948_v0 = vsel %vm1946_vm6, %v1931_v59, %v1805_v54 }
 0x1c0   : > { %v1972_v12 = vunpack.c.h.b16 %v1948_v0  ;;  %v1971_v26 = vunpack.c.l.b16 %v1948_v0 }
 0x1c2   : > { %v1988_v19 = vpack.c.b16 %v1972_v12, %v1972_v12  ;;  %v1987_v25 = vpack.c.b16 %v1971_v26, %v1971_v26  ;;  %v2228_v12 = vld [vmem:[#allocation3 + $0x2c] sm:$0x1] }
 0x1c3   : > { %v2229_v8 = vsel %vm4291_vm11, 0, %v2228_v12 }
 0x1c4   : > { %v1799_v3 = vpop.permute.xlu0 %1798  ;;  %v2011_v40 = vshrl.u32 %v1988_v19, 16  ;;  %v2006_v23 = vshrl.u32 %v1987_v25, 16  ;;  %v2014_v62 = vshll.u32 %v1988_v19, 16  ;;  %2230 = vst [vmem:[#allocation3 + $0x2c] sm:$0x1] %v2229_v8 }
 0x1c5   : > { %v1819_v2 = vpop.permute.xlu1 %1818  ;;  %v1945_v4 = vsel %vm1929_vm5, %v1928_v1, %v1799_v3  ;;  %vm2936_vm5 = vcmask 588800  }
 0x1c6   : > { %v1962_v38 = vsel %vm1946_vm6, %v1945_v4, %v1819_v2  ;;  %v2013_v31 = vrot.slane %v2011_v40, 7  ;;  %v3083_v2 = vrot.slane %v2006_v23, 11  ;;  %v2204_v40 = vld [vmem:[#allocation3 + $0x8] sm:$0x1] }
 0x1c7   : > { %v1985_v10 = vunpack.c.l.b16 %v1962_v38  ;;  %v1986_v22 = vunpack.c.h.b16 %v1962_v38 }
 0x1c8   : > { %v2016_v56 = vor.u32 %v2014_v62, %v2013_v31 }
 0x1c9   : > { %v2002_v61 = vpack.c.b16 %v1986_v22, %v1986_v22  ;;  %v2001_v13 = vpack.c.b16 %v1985_v10, %v1985_v10  ;;  %v4287_v22 = vld [vmem:[%s4674_s2] ss:$0 sm:$0xff] }
 0x1ca   : > { %v2017_v4 = vsel %vm4155_vm8, %v3083_v2, %v2016_v56 }
 0x1cb   : > { %v2102_v18 = vshrl.u32 %v2002_v61, 16  ;;  %v2097_v20 = vshrl.u32 %v2001_v13, 16  ;;  %v2105_v15 = vshll.u32 %v2002_v61, 16  ;;  %v2118_v38 = vunpack.c.l.b16 %v2017_v4  ;;  %v2243_v4 = vld [vmem:[#allocation3 + $0x68] sm:$0x1] }
 0x1cc   : > { %v1817_v37 = vpop.permute.xlu0 %1816 }
 0x1cd   : > { %v2104_v33 = vrot.slane %v2102_v18, 7  ;;  %v1960_v60 = vsel %vm1946_vm6, %v1943_v14, %v1817_v37  ;;  %v3090_v27 = vrot.slane %v2097_v20, 11  ;;  %v2232_v37 = vsel %vm4291_vm11, 0, %v2231_v30 }
 0x1ce   : > { %v1983_v35 = vunpack.c.l.b16 %v1960_v60  ;;  %v1984_v34 = vunpack.c.h.b16 %v1960_v60  ;;  %2233 = vst [vmem:[#allocation3 + $0x38] sm:$0x1] %v2232_v37  ;;  %v2234_v60 = vld [vmem:[#allocation3 + $0x44] sm:$0x1] }
 0x1cf   : > { %v2107_v50 = vor.u32 %v2105_v15, %v2104_v33  ;;  %v2235_v20 = vsel %vm4291_vm11, 0, %v2234_v60  ;;  %v2237_v15 = vld [vmem:[#allocation3 + $0x50] sm:$0x1] }
 0x1d0   : > { %v1999_v48 = vpack.c.b16 %v1983_v35, %v1983_v35  ;;  %v2000_v57 = vpack.c.b16 %v1984_v34, %v1984_v34  ;;  %2236 = vst [vmem:[#allocation3 + $0x44] sm:$0x1] %v2235_v20  ;;  %v2238_v35 = vsel %vm4291_vm11, 0, %v2237_v15 }
 0x1d1   : > { %v2108_v46 = vsel %vm4155_vm8, %v3090_v27, %v2107_v50  ;;  %2239 = vst [vmem:[#allocation3 + $0x50] sm:$0x1] %v2238_v35  ;;  %v4311_v27 = vld [vmem:[#allocation3] sm:$0xff]  }
 0x1d2   : > { %v2084_v29 = vshrl.u32 %v1999_v48, 16  ;;  %v2089_v55 = vshrl.u32 %v2000_v57, 16  ;;  %v2092_v47 = vshll.u32 %v2000_v57, 16  ;;  %v2125_v39 = vunpack.c.l.b16 %v2108_v46  ;;  %v2290_v46 = vld [vmem:[#allocation3 + $0x6c] sm:$0xff]  }
 0x1d4   : > { %v2091_v43 = vrot.slane %v2089_v55, 7  ;;  %v1807_v28 = vpop.permute.xlu0 %1806  ;;  %v3089_v58 = vrot.slane %v2084_v29, 11  ;;  %v2205_v29 = vsel %vm4291_vm11, 0, %v2204_v40  ;;  %v3231_v55 = vunpack.c.h.b16 %v4311_v27 }
 0x1d5   : > { %v1950_v9 = vsel %vm1946_vm6, %v1933_v52, %v1807_v28  ;;  %2206 = vst [vmem:[#allocation3 + $0x8] sm:$0x1] %v2205_v29  ;;  %v2210_v52 = vld [vmem:[#allocation3 + $0x74] sm:$0x1] }
 0x1d6   : > { %v2094_v41 = vor.u32 %v2092_v47, %v2091_v43  ;;  %v1973_v5 = vunpack.c.l.b16 %v1950_v9  ;;  %v1974_v53 = vunpack.c.h.b16 %v1950_v9  ;;  %v2332_v25 = vpack.c.b16 %v3231_v55, %v3231_v55 }
 0x1d7   : > { %v2211_v43 = vsel %vm4291_vm11, 0, %v2210_v52 }
 0x1d8   : > { %v1989_v11 = vpack.c.b16 %v1973_v5, %v1973_v5  ;;  %v1990_v51 = vpack.c.b16 %v1974_v53, %v1974_v53  ;;  %v2095_v42 = vsel %vm4155_vm8, %v3089_v58, %v2094_v41  ;;  %v2341_v47 = vshrl.u32 %v2332_v25, 16  ;;  %2212 = vst [vmem:[#allocation3 + $0x74] sm:$0x1] %v2211_v43 }
 0x1d9   : > { %v2124_v32 = vunpack.c.l.b16 %v2095_v42  ;;  %v2344_v28 = vshll.u32 %v2332_v25, 16  ;;  %v2537_v58 = vunpack.c.h.b16 %v2290_v46  ;;  %v2273_v25 = vld [vmem:[#allocation3 + $0x2c] sm:$0x1] }
 0x1da   : > { %v2019_v24 = vshrl.u32 %v1989_v11, 16  ;;  %v2024_v59 = vshrl.u32 %v1990_v51, 16  ;;  %v2027_v6 = vshll.u32 %v1990_v51, 16  ;;  %v2343_v31 = vrot.slane %v2341_v47, 4 }
 0x1db   : > { %v2129_v54 = vpack.c.b16 %v2125_v39, %v2124_v32  ;;  %v2346_v9 = vrot.slane %v2344_v28, 5  ;;  %v2555_v23 = vpack.c.b16 %v2537_v58, %v2537_v58  ;;  %v2240_v39 = vld [vmem:[#allocation3 + $0x5c] sm:$0x1]  ;;  %v2222_v32 = vld [vmem:[#allocation3 + $0x14] sm:$0x1]  ;;  %v2431_v47 = vunpack.c.l.b16 %v2273_v25 }
 0x1dc   : > { %v2026_v63 = vrot.slane %v2024_v59, 7  ;;  %v3084_v1 = vrot.slane %v2019_v24, 11  ;;  %v2264_v41 = vld [vmem:[#allocation3 + $0x8] sm:$0x1]  ;;  %v2241_v62 = vsel %vm4291_vm11, 0, %v2240_v39  ;;  %v2223_v24 = vsel %vm4291_vm11, 0, %v2222_v32 }
 0x1dd   : > { %3102 = vmatmul.msk.bf16.gmra.mxu3 %vm2145_vm9, %v2129_v54  ;;  %v2347_v5 = vor.u32 %v2346_v9, %v2343_v31  ;;  %v2428_v53 = vunpack.c.l.b16 %v2264_v41  ;;  %v2557_v51 = vshrl.u32 %v2555_v23, 16  ;;  %v2560_v42 = vshll.u32 %v2555_v23, 16  ;;  %2242 = vst [vmem:[#allocation3 + $0x5c] sm:$0x1] %v2241_v62 }
 0x1de   : > { %v2029_v3 = vor.u32 %v2027_v6, %v2026_v63  ;;  %2224 = vst [vmem:[#allocation3 + $0x14] sm:$0x1] %v2223_v24 }
 0x1df   : > { %2404 = vrot.lane.b32.xlu1 %v2347_v5, %s3405_s13  ;;  %v2436_v11 = vpack.c.b16 %v2428_v53, %v3231_v55  ;;  %v2291_v56 = vld [vmem:[#allocation3 + $0x74] sm:$0x1]  ;;  %v2559_v54 = vrot.slane %v2557_v51, 4  ;;  %v2562_v2 = vrot.slane %v2560_v42, 5 }
 0x1e0   : > { %v2030_v0 = vsel %vm4155_vm8, %v3084_v1, %v2029_v3  ;;  %v2581_v63 = vunpack.c.l.b16 %v2291_v56 }
 0x1e1   : > { %v2119_v44 = vunpack.c.l.b16 %v2030_v0  ;;  %v2444_v59 = vrot.slane %v2436_v11, 5  ;;  %v2563_v6 = vor.u32 %v2562_v2, %v2559_v54  ;;  %v2225_v0 = vld [vmem:[#allocation3 + $0x20] sm:$0x1]  ;;  %v2276_v54 = vld [vmem:[#allocation3 + $0x38] sm:$0x1] }
 0x1e2   : > { %v2582_v1 = vpack.c.b16 %v2581_v63, %v2537_v58 }
 0x1e3   : > { %v2126_v10 = vpack.c.b16 %v2119_v44, %v2118_v38  ;;  %2452 = vrot.lane.b32.xlu2 %v2444_v59, %s3408_s16  ;;  %2578 = vrot.lane.b32.xlu0 %v2563_v6, %s3410_s10  ;;  %v2244_v38 = vsel %vm4291_vm11, 0, %v2243_v4  ;;  %v2226_v44 = vsel %vm4291_vm11, 0, %v2225_v0  ;;  %v2432_v6 = vunpack.c.l.b16 %v2276_v54 }
 0x1e4   : > { %v2583_v3 = vrot.slane %v2582_v1, 5  ;;  %2245 = vst [vmem:[#allocation3 + $0x68] sm:$0x1] %v2244_v38 }
 0x1e5   : > { %3099 = vmatmul.msk.bf16.vlgmr.msra.gmra.mxu0 %vm2145_vm9, %v2126_v10  ;;  %2227 = vst [vmem:[#allocation3 + $0x20] sm:$0x1] %v2226_v44 }
 0x1e7   : > { %2598 = vrot.lane.b32.xlu1 %v2583_v3, %s3411_s12 }
 0x1ea   : > { %v2176_v16 = vpop.f32.mrf.mxu3 }
 0x1eb   : > { %v2177_v61 = vadd.f32 %v4287_v22, %v2176_v16  ;;  %2553 = vrot.lane.b32.xlu2 %v2290_v46, %s3412_s15 }
 0x1ec   : > { %v2270_v43 = vld [vmem:[#allocation3 + $0x20] sm:$0x1] }
 0x1ed   : > { %v2193_v13 = vmax.f32 %v2177_v61, 0.0  ;;  %v2430_v46 = vunpack.c.l.b16 %v2270_v43 }
 0x1ef   : > { %v2248_v17 = vpack.c.bf16 %v2193_v13, %v2193_v13 }
 0x1f1   : > { %2256 = vst.msk [vmem:[#allocation3 + $0x28] sm:$0xf] %vm2199_vm10, %v2248_v17 }
 0x1f2   : > { %v2178_v18 = vpop.f32.mrf.mxu3 }
 0x1f3   : > { %v2179_v14 = vadd.f32 %v4287_v22, %v2178_v18 }
 0x1f5   : > { %v2194_v19 = vmax.f32 %v2179_v14, 0.0 }
 0x1f7   : > { %v2249_v33 = vpack.c.bf16 %v2194_v19, %v2194_v19 }
 0x1f8   : > { %v4349_v55 = vld [vmem:[#allocation3 + $0x24] sm:$0xff]  }
 0x1f9   : > { %2257 = vst.msk [vmem:[#allocation3 + $0x34] sm:$0xf] %vm2199_vm10, %v2249_v33  ;;  %v2267_v33 = vld [vmem:[#allocation3 + $0x14] sm:$0x1]  ;;  %v2315_v52 = vunpack.c.h.b16 %v4349_v55 }
 0x1fa   : > { %v2429_v35 = vunpack.c.l.b16 %v2267_v33 }
 0x1fb   : > { %v2439_v31 = vpack.c.b16 %v2431_v47, %v2315_v52  ;;  %v2335_v5 = vpack.c.b16 %v2315_v52, %v2315_v52 }
 0x1fd   : > { %v2447_v58 = vrot.slane %v2439_v31, 5  ;;  %v2365_v53 = vshrl.u32 %v2335_v5, 16  ;;  %v2368_v23 = vshll.u32 %v2335_v5, 16 }
 0x1ff   : > { %v2367_v62 = vrot.slane %v2365_v53, 4  ;;  %v2370_v11 = vrot.slane %v2368_v23, 5 }
 0x200   : > { %v4365_v39 = vld [vmem:[#allocation3 + $0x30] sm:$0xff]  }
 0x201   : > { %v2371_v42 = vor.u32 %v2370_v11, %v2367_v62  ;;  %v3239_v63 = vunpack.c.h.b16 %v4365_v39 }
 0x203   : > { %v2440_v1 = vpack.c.b16 %v2432_v6, %v3239_v63  ;;  %v2336_v3 = vpack.c.b16 %v3239_v63, %v3239_v63 }
 0x205   : > { %v4380_v4 = vrot.slane %v2440_v1, 5  ;;  %v2373_v0 = vshrl.u32 %v2336_v3, 16  ;;  %v2376_v38 = vshll.u32 %v2336_v3, 16  ;;  %v2288_v1 = vld [vmem:[#allocation3 + $0x68] sm:$0x1] }
 0x207   : > { %v2375_v44 = vrot.slane %v2373_v0, 4 }
 0x209   : > { %v2181_v34 = vpop.f32.mrf.mxu3 }
 0x20a   : > { %v2182_v36 = vadd.f32 %v4287_v22, %v2181_v34 }
 0x20c   : > { %v2195_v26 = vmax.f32 %v2182_v36, 0.0 }
 0x20e   : > { %v2250_v21 = vpack.c.bf16 %v2195_v26, %v2195_v26 }
 0x210   : > { %2258 = vst.msk [vmem:[#allocation3 + $0x40] sm:$0xf] %vm2199_vm10, %v2250_v21 }
 0x211   : > { %v2183_v50 = vpop.f32.mrf.mxu3 }
 0x212   : > { %v2184_v48 = vadd.f32 %v4287_v22, %v2183_v50 }
 0x214   : > { %v2196_v57 = vmax.f32 %v2184_v48, 0.0 }
 0x216   : > { %v2251_v49 = vpack.c.bf16 %v2196_v57, %v2196_v57 }
 0x218   : > { %2259 = vst.msk [vmem:[#allocation3 + $0x4c] sm:$0xf] %vm2199_vm10, %v2251_v49 }
 0x251   : > { %v4427_v43 = vpop.permute.xlu1 %2404 }
 0x255   : > { %v4437_v31 = vpop.permute.xlu0 %2578 }
 0x260   : > { %v2186_v10 = vpop.f32.mrf.mxu3 }
 0x261   : > { %v2187_v16 = vadd.f32 %v4287_v22, %v2186_v10  ;;  %v2378_v10 = vrot.slane %v2376_v38, 5  ;;  %v2515_v38 = vunpack.c.l.b16 %v2288_v1 }
 0x262   : > { %v2171_v12 = vpop.f32.mrf.mxu0 }
 0x263   : > { %v2197_v61 = vmax.f32 %v2187_v16, 0.0  ;;  %v2172_v8 = vadd.f32 %v4287_v22, %v2171_v12  ;;  %v4384_v16 = vld [vmem:[#allocation3 + $0x3c] sm:$0xff]   ;;  %v2279_v12 = vld [vmem:[#allocation3 + $0x44] sm:$0x1] }
 0x265   : > { %v2252_v13 = vpack.c.bf16 %v2197_v61, %v2197_v61  ;;  %v2191_v17 = vmax.f32 %v2172_v8, 0.0  ;;  %v4389_v61 = vor.u32 %v2378_v10, %v2375_v44  ;;  %v2319_v8 = vunpack.c.h.b16 %v4384_v16  ;;  %v2892_v44 = vld [vmem:[%s4675_s3 + $0x20] sm:$0xf] }
 0x267   : > { %2260 = vst.msk [vmem:[#allocation3 + $0x58] sm:$0xf] %vm2199_vm10, %v2252_v13  ;;  %v2246_v18 = vpack.c.bf16 %v2191_v17, %v2191_v17  ;;  %v2433_v13 = vunpack.c.l.b16 %v2279_v12 }
 0x268   : > { %v2188_v30 = vpop.f32.mrf.mxu3 }
 0x269   : > { %2254 = vst.msk [vmem:[#allocation3 + $0x10] sm:$0xf] %vm2199_vm10, %v2246_v18  ;;  %v2189_v45 = vadd.f32 %v4287_v22, %v2188_v30  ;;  %v2441_v17 = vpack.c.b16 %v2433_v13, %v2319_v8  ;;  %v2337_v18 = vpack.c.b16 %v2319_v8, %v2319_v8  ;;  %v2926_v13 = vunpack.c.l.b16 %v2892_v44 }
 0x26a   : > { %v2173_v14 = vpop.f32.mrf.mxu0 }
 0x26b   : > { %v2198_v37 = vmax.f32 %v2189_v45, 0.0  ;;  %v2174_v19 = vadd.f32 %v4287_v22, %v2173_v14  ;;  %v4398_v30 = vrot.slane %v2441_v17, 5  ;;  %v2381_v45 = vshrl.u32 %v2337_v18, 16 }
 0x26c   : > { %v2384_v14 = vshll.u32 %v2337_v18, 16 }
 0x26d   : > { %v2253_v60 = vpack.c.bf16 %v2198_v37, %v2198_v37  ;;  %v2192_v20 = vmax.f32 %v2174_v19, 0.0  ;;  %v4402_v37 = vld [vmem:[#allocation3 + $0x48] sm:$0xff]   ;;  %v4404_v19 = vpop.permute.xlu2 %2452  ;;  %v2383_v33 = vrot.slane %v2381_v45, 4  ;;  %v2931_v45 = vpack.c.b16 %v2926_v13, %v2926_v13 }
 0x26e   : > { %v4429_v47 = vld [vmem:[#allocation3 + $0x54] sm:$0xff]  }
 0x26f   : > { %2261 = vst.msk [vmem:[#allocation3 + $0x64] sm:$0xf] %vm2199_vm10, %v2253_v60  ;;  %v2247_v15 = vpack.c.bf16 %v2192_v20, %v2192_v20  ;;  %v2386_v60 = vrot.slane %v2384_v14, 5  ;;  %v2282_v20 = vld [vmem:[#allocation3 + $0x50] sm:$0x1] }
 0x270   : > { %v4338_v34 = vld [vmem:[#allocation3 + $0xc] sm:$0xff]  }
 0x271   : > { %2255 = vst.msk [vmem:[#allocation3 + $0x1c] sm:$0xf] %vm2199_vm10, %v2247_v15  ;;  %v2311_v36 = vunpack.c.h.b16 %v4338_v34  ;;  %2473 = vrot.lane.b32.xlu0 %v4338_v34, %s3403_s11  ;;  %v3243_v15 = vunpack.c.h.b16 %v4402_v37 }
 0x273   : > { %v2437_v26 = vpack.c.b16 %v2429_v35, %v2311_v36  ;;  %v2333_v21 = vpack.c.b16 %v2311_v36, %v2311_v36  ;;  %v4411_v35 = vor.u32 %v2386_v60, %v2383_v33  ;;  %v2434_v36 = vunpack.c.l.b16 %v2282_v20 }
 0x274   : > { %v2951_v20 = vsel %vm2949_vm12, %v2931_v45, 0 }
 0x275   : > { %v2445_v50 = vrot.slane %v2437_v26, 5  ;;  %v2349_v22 = vshrl.u32 %v2333_v21, 16  ;;  %v2352_v48 = vshll.u32 %v2333_v21, 16  ;;  %v2338_v26 = vpack.c.b16 %v3243_v15, %v3243_v15  ;;  %2956 = vmatpush.bf16.msra.mxu1 %v2951_v20  ;;  %3274 = vmatpush.bf16.msra.mxu2 %v2951_v20 }
 0x276   : > { %v2442_v21 = vpack.c.b16 %v2434_v36, %v3243_v15  ;;  %v3142_v36 = vld [vmem:[%s4675_s3 + $0x18] sm:$0xff] }
 0x277   : > { %2518 = vrot.lane.b32.xlu1 %v2445_v50, %s3413_s17  ;;  %v2351_v57 = vrot.slane %v2349_v22, 4  ;;  %v2354_v49 = vrot.slane %v2352_v48, 5  ;;  %v2389_v22 = vshrl.u32 %v2338_v26, 16  ;;  %v2392_v48 = vshll.u32 %v2338_v26, 16 }
 0x278   : > { %v4347_v29 = vld [vmem:[#allocation3 + $0x18] sm:$0xff]  }
 0x279   : > { %v2355_v40 = vor.u32 %v2354_v49, %v2351_v57  ;;  %2454 = vrot.lane.b32.xlu0 %v2445_v50, %s3408_s16  ;;  %v3235_v28 = vunpack.c.h.b16 %v4347_v29  ;;  %v4417_v50 = vpop.permute.xlu2 %2553  ;;  %v2450_v57 = vrot.slane %v2442_v21, 5  ;;  %v2391_v49 = vrot.slane %v2389_v22, 4  ;;  %2957 = vmatpush.bf16.msra.mxu1 %v3142_v36 }
 0x27a   : > { %3275 = vmatpush.bf16.msra.mxu2 %v3142_v36 }
 0x27b   : > { %2406 = vrot.lane.b32.xlu2 %v2355_v40, %s3405_s13  ;;  %v2438_v9 = vpack.c.b16 %v2430_v46, %v3235_v28  ;;  %v2334_v51 = vpack.c.b16 %v3235_v28, %v3235_v28  ;;  %v2323_v28 = vunpack.c.h.b16 %v4429_v47 }
 0x27d   : > { %v2446_v41 = vrot.slane %v2438_v9, 5  ;;  %v2357_v32 = vshrl.u32 %v2334_v51, 16  ;;  %v2360_v56 = vshll.u32 %v2334_v51, 16  ;;  %v2285_v9 = vld [vmem:[#allocation3 + $0x5c] sm:$0x1]  ;;  %v2339_v5 = vpack.c.b16 %v2323_v28, %v2323_v28  ;;  %v3270_v51 = vld [vmem:[#allocation3 + $0x60] sm:$0xff]  }
 0x27e   : > { %v3247_v54 = vunpack.c.h.b16 %v3270_v51 }
 0x27f   : > { %2475 = vrot.lane.b32.xlu1 %v4347_v29, %s3403_s11  ;;  %v2359_v24 = vrot.slane %v2357_v32, 4  ;;  %v2362_v59 = vrot.slane %v2360_v56, 5  ;;  %v2397_v62 = vshrl.u32 %v2339_v5, 16  ;;  %v2400_v11 = vshll.u32 %v2339_v5, 16 }
 0x280   : > { %v2489_v3 = vpack.c.b16 %v3247_v54, %v3247_v54  ;;  %v2516_v18 = vpack.c.b16 %v2515_v38, %v3247_v54 }
 0x281   : > { %2539 = vrot.lane.b32.xlu0 %v4347_v29, %s3412_s15  ;;  %v2363_v2 = vor.u32 %v2362_v59, %v2359_v24  ;;  %v2399_v24 = vrot.slane %v2397_v62, 4  ;;  %v2402_v59 = vrot.slane %v2400_v11, 5 }
 0x282   : > { %v2491_v12 = vshrl.u32 %v2489_v3, 16  ;;  %v2494_v8 = vshll.u32 %v2489_v3, 16  ;;  %v2517_v15 = vrot.slane %v2516_v18, 5 }
 0x283   : > { %2498 = vrot.lane.b32.xlu2 %v2355_v40, %s3406_s14  ;;  %v2394_v40 = vrot.slane %v2392_v48, 5  ;;  %v2403_v63 = vor.u32 %v2402_v59, %v2399_v24  ;;  %v3141_v48 = vld [vmem:[%s4675_s3 + $0x10] sm:$0xff] }
 0x284   : > { %v2493_v33 = vrot.slane %v2491_v12, 4  ;;  %v2496_v60 = vrot.slane %v2494_v8, 5  ;;  %2958 = vmatpush.bf16.msra.mxu1 %v3141_v48  ;;  %3276 = vmatpush.bf16.msra.mxu2 %v3141_v48 }
 0x285   : > { %v2395_v25 = vor.u32 %v2394_v40, %v2391_v49  ;;  %v2602_v49 = vsel %vm1844_vm14, %v4311_v27, %v4427_v43  ;;  %v3140_v40 = vld [vmem:[%s4675_s3 + $0x8] sm:$0xff]  ;;  %v3139_v43 = vld [vmem:[%s4675_s3] sm:$0xff] }
 0x286   : > { %v2497_v21 = vor.u32 %v2496_v60, %v2493_v33 }
 0x287   : > { %2541 = vrot.lane.b32.xlu1 %v4349_v55, %s3412_s15 }
 0x288   : > { %2959 = vmatpush.bf16.msra.mxu1 %v3140_v40  ;;  %3277 = vmatpush.bf16.msra.mxu2 %v3140_v40 }
 0x289   : > { %2522 = vrot.lane.b32.xlu0 %v2447_v58, %s3413_s17 }
 0x28b   : > { %2477 = vrot.lane.b32.xlu2 %v4349_v55, %s3403_s11 }
 0x28c   : > { %2960 = vmatpush.bf16.msra.mxu1 %v3139_v43  ;;  %3278 = vmatpush.bf16.msra.mxu2 %v3139_v43 }
 0x28f   : > { %2584 = vrot.lane.b32.xlu1 %v2446_v41, %s3411_s12 }
 0x291   : > { %2479 = vrot.lane.b32.xlu0 %v4365_v39, %s3403_s11 }
 0x293   : > { %2586 = vrot.lane.b32.xlu2 %v2447_v58, %s3411_s12 }
 0x297   : > { %2456 = vrot.lane.b32.xlu1 %v2446_v41, %s3408_s16 }
 0x299   : > { %2566 = vrot.lane.b32.xlu0 %v2371_v42, %s3410_s10 }
 0x29b   : > { %2458 = vrot.lane.b32.xlu2 %v2447_v58, %s3408_s16  ;;  %v4441_v58 = vpop.permute.xlu1 %2598 }
 0x29f   : > { %2410 = vrot.lane.b32.xlu1 %v2371_v42, %s3405_s13 }
 0x2a1   : > { %2500 = vrot.lane.b32.xlu0 %v2363_v2, %s3406_s14 }
 0x2a3   : > { %2520 = vrot.lane.b32.xlu2 %v2446_v41, %s3413_s17  ;;  %v2435_v41 = vunpack.c.l.b16 %v2285_v9 }
 0x2a5   : > { %v2443_v23 = vpack.c.b16 %v2435_v41, %v2323_v28 }
 0x2a7   : > { %2502 = vrot.lane.b32.xlu1 %v2371_v42, %s3406_s14  ;;  %v2451_v56 = vrot.slane %v2443_v23, 5 }
 0x2a9   : > { %2408 = vrot.lane.b32.xlu0 %v2363_v2, %s3405_s13 }
 0x2ab   : > { %2543 = vrot.lane.b32.xlu2 %v4365_v39, %s3412_s15 }
 0x2af   : > { %2524 = vrot.lane.b32.xlu1 %v4380_v4, %s3413_s17 }
 0x2b1   : > { %2460 = vrot.lane.b32.xlu0 %v4380_v4, %s3408_s16 }
 0x2b3   : > { %2564 = vrot.lane.b32.xlu2 %v2363_v2, %s3410_s10 }
 0x2b7   : > { %2412 = vrot.lane.b32.xlu1 %v4389_v61, %s3405_s13 }
 0x2b9   : > { %2545 = vrot.lane.b32.xlu0 %v4384_v16, %s3412_s15 }
 0x2bb   : > { %2504 = vrot.lane.b32.xlu2 %v4389_v61, %s3406_s14 }
 0x2bf   : > { %2462 = vrot.lane.b32.xlu1 %v4398_v30, %s3408_s16 }
 0x2c1   : > { %2526 = vrot.lane.b32.xlu0 %v4398_v30, %s3413_s17 }
 0x2c3   : > { %2481 = vrot.lane.b32.xlu2 %v4384_v16, %s3403_s11 }
 0x2c7   : > { %2506 = vrot.lane.b32.xlu1 %v4411_v35, %s3406_s14 }
 0x2c9   : > { %2483 = vrot.lane.b32.xlu0 %v4402_v37, %s3403_s11 }
 0x2cb   : > { %2547 = vrot.lane.b32.xlu2 %v4402_v37, %s3412_s15 }
 0x2cf   : > { %2528 = vrot.lane.b32.xlu1 %v2450_v57, %s3413_s17 }
 0x2d1   : > { %2572 = vrot.lane.b32.xlu0 %v2395_v25, %s3410_s10 }
 0x2d3   : > { %2414 = vrot.lane.b32.xlu2 %v4411_v35, %s3405_s13 }
 0x2d5   : > { %v4424_v52 = vpop.permute.xlu2 %2406 }
 0x2d7   : > { %2592 = vrot.lane.b32.xlu1 %v2450_v57, %s3411_s12 }
 0x2d9   : > { %2416 = vrot.lane.b32.xlu0 %v2395_v25, %s3405_s13 }
 0x2db   : > { %2464 = vrot.lane.b32.xlu2 %v2450_v57, %s3408_s16 }
 0x2dd   : > { %v4434_v46 = vpop.permute.xlu2 %2498 }
 0x2df   : > { %2485 = vrot.lane.b32.xlu1 %v4429_v47, %s3403_s11 }
 0x2e1   : > { %2549 = vrot.lane.b32.xlu0 %v4429_v47, %s3412_s15 }
 0x2e3   : > { %2508 = vrot.lane.b32.xlu2 %v2395_v25, %s3406_s14  ;;  %v2474_v42 = vpop.permute.xlu0 %2473  ;;  %v2625_v25 = vsel %vm1878_vm1, %v2602_v49, %v4404_v19 }
 0x2e4   : > { %v2641_v9 = vsel %vm1912_vm4, %v2625_v25, %v2474_v42 }
 0x2e5   : > { %v4444_v53 = vpop.permute.xlu2 %2477  ;;  %v2657_v19 = vsel %vm1946_vm6, %v2641_v9, %v4434_v46 }
 0x2e7   : > { %2551 = vrot.lane.b32.xlu1 %v3270_v51, %s3412_s15  ;;  %s3080_s15 = sshll.u32 %s215_s9, 6 }
 0x2e9   : > { %v4449_v32 = vpop.permute.xlu1 %2518  ;;  %2466 = vrot.lane.b32.xlu0 %v2451_v56, %s3408_s16 }
 0x2eb   : > { %2594 = vrot.lane.b32.xlu2 %v2451_v56, %s3411_s12  ;;  %v4456_v6 = vpop.permute.xlu0 %2454 }
 0x2ed   : > { %v4452_v2 = vpop.permute.xlu2 %2586 }
 0x2ef   : > { %2574 = vrot.lane.b32.xlu1 %v2403_v63, %s3410_s10 }
 0x2f1   : > { %v4458_v0 = vpop.permute.xlu1 %2475  ;;  %2510 = vrot.lane.b32.xlu0 %v2403_v63, %s3406_s14 }
 0x2f3   : > { %2530 = vrot.lane.b32.xlu2 %v2451_v56, %s3413_s17  ;;  %v2540_v17 = vpop.permute.xlu0 %2539 }
 0x2f5   : > { %v4464_v10 = vpop.permute.xlu2 %2458 }
 0x2f7   : > { %2418 = vrot.lane.b32.xlu1 %v2403_v63, %s3405_s13 }
 0x2f9   : > { %v4468_v14 = vpop.permute.xlu1 %2541  ;;  %2532 = vrot.lane.b32.xlu0 %v2517_v15, %s3413_s17  ;;  %s4619_s17 = scalar_lea.vmem [#allocation4], %s3080_s15 }
 0x2fa   : > { %s3011_s30 = sshll.u32 %s4619_s17, 4  ;;  %s3012_s30 = int_to_ptr.vmem [resolvable:$true] %s3011_s30 }
 0x2fb   : > { %2487 = vrot.lane.b32.xlu2 %v3270_v51, %s3403_s11  ;;  %v4476_v22 = vpop.permute.xlu0 %2522  ;;  %s3351_s11 = sshra.s32 %s3014_s6, 4  ;;  %s3352_s11 = int_to_ptr.hbm [resolvable:$true] %s3351_s11 }
 0x2fc   : > { %s3353_s7 = scalar_lea.hbm %s3352_s11, 64  ;;  %p3358_p0 = scmp.lt.s32.totalorder %s3352_s11, %s4677_s5 }
 0x2fd   : > { %v2521_v26 = vpop.permute.xlu2 %2520  ;;  %p3354_p11 = scmp.ne.s32.totalorder %s3352_s11, %s3353_s7 }
 0x2ff   : > { %2512 = vrot.lane.b32.xlu1 %v2497_v21, %s3406_s14  ;;  %p3355_p12 = pnand %p3354_p11, %p3483_p5 }
 0x301   : > { %v2585_v57 = vpop.permute.xlu1 %2584  ;;  %2596 = vrot.lane.b32.xlu0 %v2517_v15, %s3411_s12  ;;  %p3356_p13 = pneg %p3355_p12 }
 0x303   : > { %2576 = vrot.lane.b32.xlu2 %v2497_v21, %s3410_s10  ;;  %v2480_v27 = vpop.permute.xlu0 %2479 }
 0x305   : > { %v4490_v28 = vpop.permute.xlu2 %2543 }
 0x307   : > { %2568 = vrot.lane.b32.xlu1 %v4389_v61, %s3410_s10  ;;  %v2674_v61 = vsel %vm2672_vm13, %v2657_v19, %v4449_v32  ;;  %v2605_v32 = vsel %vm1844_vm14, %v4338_v34, %v4424_v52 }
 0x308   : > { %v2691_v5 = vsel %vm2689_vm15, %v2674_v61, %v2540_v17  ;;  %v2627_v56 = vsel %vm1878_vm1, %v2605_v32, %v4456_v6 }
 0x309   : > { %v2457_v41 = vpop.permute.xlu1 %2456  ;;  %2588 = vrot.lane.b32.xlu0 %v4380_v4, %s3411_s12  ;;  %v2643_v63 = vsel %vm1912_vm4, %v2627_v56, %v4458_v0 }
 0x30b   : > { %2570 = vrot.lane.b32.xlu2 %v4411_v35, %s3410_s10  ;;  %v2567_v11 = vpop.permute.xlu0 %2566  ;;  %s3357_s10 = scalar_lea.hbm %s4677_s5, 128 }
 0x30c   : > { %p3359_p1 = scmp.lt.s32.totalorder %s3357_s10, %s3353_s7 }
 0x30d   : > { %v2565_v23 = vpop.permute.xlu2 %2564 }
 0x30e   : > { %v2708_v46 = vsel %vm2706_vm2, %v2691_v5, %v2565_v23  ;;  %p3360_p2 = por %p3359_p1, %p3358_p0 }
 0x30f   : > { %v2725_v62 = vsel %vm2723_vm3, %v2708_v46, %v2585_v57  ;;  %2590 = vrot.lane.b32.xlu1 %v4398_v30, %s3411_s12 }
 0x310   : > { %v2749_v35 = vunpack.c.h.b16 %v2725_v62  ;;  %p3361_p3 = pnand %p3360_p2, %p3356_p13 }
 0x311   : > { %v2411_v51 = vpop.permute.xlu1 %2410 }
 0x312   : > { %v2611_v42 = vsel %vm1844_vm14, %v4349_v55, %v2411_v51  ;;  %v2765_v59 = vpack.c.b16 %v2749_v35, %v2749_v35  ;;  %v2748_v55 = vunpack.c.l.b16 %v2725_v62 }
 0x313   : > { %v2631_v4 = vsel %vm1878_vm1, %v2611_v42, %v4464_v10  ;;  %v2501_v1 = vpop.permute.xlu0 %2500 }
 0x314   : > { %v2647_v24 = vsel %vm1912_vm4, %v2631_v4, %v2480_v27  ;;  %v2659_v3 = vsel %vm1946_vm6, %v2643_v63, %v2501_v1  ;;  %v2786_v34 = vshrl.u32 %v2765_v59, 16  ;;  %v2764_v44 = vpack.c.b16 %v2748_v55, %v2748_v55 }
 0x315   : > { %v2505_v30 = vpop.permute.xlu2 %2504  ;;  %v2676_v52 = vsel %vm2672_vm13, %v2659_v3, %v2521_v26  ;;  %v2789_v18 = vshll.u32 %v2765_v59, 16 }
 0x316   : > { %v2663_v54 = vsel %vm1946_vm6, %v2647_v24, %v2505_v30  ;;  %v2693_v6 = vsel %vm2689_vm15, %v2676_v52, %v4468_v14  ;;  %v2788_v8 = vrot.slane %v2786_v34, 7  ;;  %v2781_v17 = vshrl.u32 %v2764_v44, 16 }
 0x317   : > { %v2710_v10 = vsel %vm2706_vm2, %v2693_v6, %v2567_v11 }
 0x318   : > { %v2727_v12 = vsel %vm2723_vm3, %v2710_v10, %v4452_v2  ;;  %v2791_v15 = vor.u32 %v2789_v18, %v2788_v8  ;;  %v3103_v57 = vrot.slane %v2781_v17, 11 }
 0x319   : > { %v2503_v38 = vpop.permute.xlu1 %2502  ;;  %v2750_v13 = vunpack.c.l.b16 %v2727_v12  ;;  %v2751_v0 = vunpack.c.h.b16 %v2727_v12 }
 0x31a   : > { %v2792_v27 = vsel %vm4155_vm8, %v3103_v57, %v2791_v15 }
 0x31b   : > { %v2767_v45 = vpack.c.b16 %v2751_v0, %v2751_v0  ;;  %v2409_v33 = vpop.permute.xlu0 %2408  ;;  %v2766_v60 = vpack.c.b16 %v2750_v13, %v2750_v13  ;;  %v2897_v5 = vunpack.c.l.b16 %v2792_v27 }
 0x31c   : > { %v2608_v20 = vsel %vm1844_vm14, %v4347_v29, %v2409_v33 }
 0x31d   : > { %v2629_v14 = vsel %vm1878_vm1, %v2608_v20, %v2457_v41  ;;  %v2794_v26 = vshrl.u32 %v2766_v60, 16  ;;  %v2799_v21 = vshrl.u32 %v2767_v45, 16  ;;  %v2802_v40 = vshll.u32 %v2767_v45, 16  ;;  %v2482_v9 = vpop.permute.xlu2 %2481 }
 0x31e   : > { %v2645_v2 = vsel %vm1912_vm4, %v2629_v14, %v4444_v53 }
 0x31f   : > { %v2801_v49 = vrot.slane %v2799_v21, 7  ;;  %v2661_v25 = vsel %vm1946_vm6, %v2645_v2, %v2503_v38  ;;  %v3104_v43 = vrot.slane %v2794_v26, 11 }
 0x320   : > { %v2678_v29 = vsel %vm2672_vm13, %v2661_v25, %v4476_v22 }
 0x321   : > { %v2525_v36 = vpop.permute.xlu1 %2524  ;;  %v2804_v19 = vor.u32 %v2802_v40, %v2801_v49  ;;  %v4545_v41 = vsel %vm2689_vm15, %v2678_v29, %v4490_v28 }
 0x322   : > { %v2680_v48 = vsel %vm2672_vm13, %v2663_v54, %v2525_v36 }
 0x323   : > { %v2461_v53 = vpop.permute.xlu0 %2460  ;;  %v2805_v61 = vsel %vm4155_vm8, %v3104_v43, %v2804_v19 }
 0x324   : > { %v2898_v23 = vunpack.c.l.b16 %v2805_v61 }
 0x325   : > { %v2548_v22 = vpop.permute.xlu2 %2547 }
 0x326   : > { %v2905_v62 = vpack.c.b16 %v2898_v23, %v2897_v5 }
 0x328   : > { %3127 = vmatmul.msk.bf16.vlgmr.msra.gmra.mxu1 %vm2936_vm5, %v2905_v62 }
 0x329   : > { %v2413_v46 = vpop.permute.xlu1 %2412 }
 0x32a   : > { %v2614_v59 = vsel %vm1844_vm14, %v4365_v39, %v2413_v46 }
 0x32b   : > { %v2546_v11 = vpop.permute.xlu0 %2545  ;;  %v2633_v30 = vsel %vm1878_vm1, %v2614_v59, %v2461_v53 }
 0x32c   : > { %v4551_v35 = vsel %vm2689_vm15, %v2680_v48, %v2546_v11  ;;  %v2649_v55 = vsel %vm1912_vm4, %v2633_v30, %v2482_v9 }
 0x32d   : > { %v2415_v28 = vpop.permute.xlu2 %2414 }
 0x32e   : > { %v2617_v8 = vsel %vm1844_vm14, %v4384_v16, %v2415_v28 }
 0x331   : > { %v2463_v51 = vpop.permute.xlu1 %2462 }
 0x332   : > { %v2635_v0 = vsel %vm1878_vm1, %v2617_v8, %v2463_v51 }
 0x333   : > { %v2527_v42 = vpop.permute.xlu0 %2526 }
 0x335   : > { %v2465_v24 = vpop.permute.xlu2 %2464 }
 0x339   : > { %v2507_v32 = vpop.permute.xlu1 %2506 }
 0x33a   : > { %v2665_v1 = vsel %vm1946_vm6, %v2649_v55, %v2507_v32 }
 0x33b   : > { %v2484_v4 = vpop.permute.xlu0 %2483  ;;  %v2682_v34 = vsel %vm2672_vm13, %v2665_v1, %v2527_v42 }
 0x33c   : > { %v2699_v38 = vsel %vm2689_vm15, %v2682_v34, %v2548_v22  ;;  %v2651_v18 = vsel %vm1912_vm4, %v2635_v0, %v2484_v4 }
 0x33d   : > { %v2509_v3 = vpop.permute.xlu2 %2508 }
 0x33e   : > { %v2667_v33 = vsel %vm1946_vm6, %v2651_v18, %v2509_v3 }
 0x341   : > { %v2529_v56 = vpop.permute.xlu1 %2528 }
 0x342   : > { %v2684_v15 = vsel %vm2672_vm13, %v2667_v33, %v2529_v56 }
 0x343   : > { %v2573_v54 = vpop.permute.xlu0 %2572 }
 0x344   : > { %v2716_v44 = vsel %vm2706_vm2, %v2699_v38, %v2573_v54 }
 0x345   : > { %v2595_v39 = vpop.permute.xlu2 %2594 }
 0x349   : > { %v2593_v63 = vpop.permute.xlu1 %2592 }
 0x34a   : > { %v2733_v10 = vsel %vm2723_vm3, %v2716_v44, %v2593_v63 }
 0x34b   : > { %v2417_v52 = vpop.permute.xlu0 %2416  ;;  %v2757_v13 = vunpack.c.h.b16 %v2733_v10  ;;  %v2756_v60 = vunpack.c.l.b16 %v2733_v10 }
 0x34c   : > { %v2620_v43 = vsel %vm1844_vm14, %v4402_v37, %v2417_v52 }
 0x34d   : > { %v2773_v45 = vpack.c.b16 %v2757_v13, %v2757_v13  ;;  %v2531_v36 = vpop.permute.xlu2 %2530  ;;  %v2772_v2 = vpack.c.b16 %v2756_v60, %v2756_v60  ;;  %v2637_v62 = vsel %vm1878_vm1, %v2620_v43, %v2465_v24 }
 0x34f   : > { %v2838_v14 = vshrl.u32 %v2773_v45, 16  ;;  %v2833_v25 = vshrl.u32 %v2772_v2, 16  ;;  %v2841_v9 = vshll.u32 %v2773_v45, 16 }
 0x351   : > { %v2486_v6 = vpop.permute.xlu1 %2485  ;;  %v2840_v57 = vrot.slane %v2838_v14, 7  ;;  %v3107_v46 = vrot.slane %v2833_v25, 11 }
 0x352   : > { %v2653_v37 = vsel %vm1912_vm4, %v2637_v62, %v2486_v6 }
 0x353   : > { %v2550_v12 = vpop.permute.xlu0 %2549  ;;  %v2843_v53 = vor.u32 %v2841_v9, %v2840_v57 }
 0x354   : > { %v2701_v26 = vsel %vm2689_vm15, %v2684_v15, %v2550_v12 }
 0x355   : > { %v2488_v22 = vpop.permute.xlu2 %2487  ;;  %v2844_v4 = vsel %vm4155_vm8, %v3107_v46, %v2843_v53 }
 0x356   : > { %v2901_v54 = vunpack.c.l.b16 %v2844_v4 }
 0x359   : > { %v2552_v17 = vpop.permute.xlu1 %2551 }
 0x35b   : > { %v2467_v20 = vpop.permute.xlu0 %2466 }
 0x35d   : > { %v2577_v38 = vpop.permute.xlu2 %2576 }
 0x361   : > { %v2575_v21 = vpop.permute.xlu1 %2574 }
 0x362   : > { %v2718_v16 = vsel %vm2706_vm2, %v2701_v26, %v2575_v21 }
 0x363   : > { %v2735_v48 = vsel %vm2723_vm3, %v2718_v16, %v2595_v39  ;;  %v2511_v19 = vpop.permute.xlu0 %2510 }
 0x364   : > { %v2758_v49 = vunpack.c.l.b16 %v2735_v48  ;;  %v2759_v40 = vunpack.c.h.b16 %v2735_v48  ;;  %v2669_v56 = vsel %vm1946_vm6, %v2653_v37, %v2511_v19 }
 0x365   : > { %v2686_v55 = vsel %vm2672_vm13, %v2669_v56, %v2531_v36  ;;  %v2571_v26 = vpop.permute.xlu2 %2570 }
 0x366   : > { %v2774_v29 = vpack.c.b16 %v2758_v49, %v2758_v49  ;;  %v2775_v27 = vpack.c.b16 %v2759_v40, %v2759_v40  ;;  %v2703_v44 = vsel %vm2689_vm15, %v2686_v55, %v2552_v17 }
 0x367   : > { %v2720_v13 = vsel %vm2706_vm2, %v2703_v44, %v2577_v38 }
 0x368   : > { %v2846_v61 = vshrl.u32 %v2774_v29, 16  ;;  %v2851_v5 = vshrl.u32 %v2775_v27, 16  ;;  %v2854_v51 = vshll.u32 %v2775_v27, 16  ;;  %v2714_v29 = vsel %vm2706_vm2, %v4551_v35, %v2571_v26 }
 0x369   : > { %v2419_v23 = vpop.permute.xlu1 %2418 }
 0x36a   : > { %v2853_v11 = vrot.slane %v2851_v5, 7  ;;  %v2623_v42 = vsel %vm1844_vm14, %v4429_v47, %v2419_v23  ;;  %v3108_v28 = vrot.slane %v2846_v61, 11 }
 0x36b   : > { %v2639_v59 = vsel %vm1878_vm1, %v2623_v42, %v2467_v20  ;;  %v2533_v30 = vpop.permute.xlu0 %2532 }
 0x36c   : > { %v2856_v32 = vor.u32 %v2854_v51, %v2853_v11  ;;  %v2655_v1 = vsel %vm1912_vm4, %v2639_v59, %v2488_v22 }
 0x36e   : > { %v2857_v24 = vsel %vm4155_vm8, %v3108_v28, %v2856_v32 }
 0x36f   : > { %v2902_v63 = vunpack.c.l.b16 %v2857_v24 }
 0x371   : > { %v2513_v47 = vpop.permute.xlu1 %2512  ;;  %v2907_v3 = vpack.c.b16 %v2902_v63, %v2901_v54 }
 0x372   : > { %v2671_v34 = vsel %vm1946_vm6, %v2655_v1, %v2513_v47 }
 0x373   : > { %v2688_v52 = vsel %vm2672_vm13, %v2671_v34, %v2533_v30  ;;  %3129 = vmatmul.msk.bf16.vlgmr.msra.gmra.mxu2 %vm2936_vm5, %v2907_v3  ;;  %v2597_v0 = vpop.permute.xlu0 %2596 }
 0x374   : > { %v2705_v6 = vsel %vm2689_vm15, %v2688_v52, %v4417_v50  ;;  %v2737_v18 = vsel %vm2723_vm3, %v2720_v13, %v2597_v0 }
 0x375   : > { %v2722_v10 = vsel %vm2706_vm2, %v2705_v6, %v4437_v31  ;;  %v2760_v33 = vunpack.c.l.b16 %v2737_v18  ;;  %v2761_v60 = vunpack.c.h.b16 %v2737_v18 }
 0x376   : > { %v2739_v39 = vsel %vm2723_vm3, %v2722_v10, %v4441_v58  ;;  %v3333_v10 = vld [vmem:[%s4676_s4] ss:$0 sm:$0xff] }
 0x377   : > { %v2762_v12 = vunpack.c.l.b16 %v2739_v39  ;;  %v2763_v8 = vunpack.c.h.b16 %v2739_v39  ;;  %v2776_v15 = vpack.c.b16 %v2760_v33, %v2760_v33  ;;  %v2777_v17 = vpack.c.b16 %v2761_v60, %v2761_v60 }
 0x379   : > { %v2779_v45 = vpack.c.b16 %v2763_v8, %v2763_v8  ;;  %v2569_v20 = vpop.permute.xlu1 %2568  ;;  %v2778_v50 = vpack.c.b16 %v2762_v12, %v2762_v12  ;;  %v2864_v31 = vshrl.u32 %v2777_v17, 16  ;;  %v2859_v21 = vshrl.u32 %v2776_v15, 16 }
 0x37a   : > { %v2867_v48 = vshll.u32 %v2777_v17, 16  ;;  %v2712_v57 = vsel %vm2706_vm2, %v4545_v41, %v2569_v20 }
 0x37b   : > { %v2877_v14 = vshrl.u32 %v2779_v45, 16  ;;  %v2872_v36 = vshrl.u32 %v2778_v50, 16  ;;  %v2880_v2 = vshll.u32 %v2779_v45, 16  ;;  %v2866_v16 = vrot.slane %v2864_v31, 7  ;;  %v2589_v49 = vpop.permute.xlu0 %2588 }
 0x37c   : > { %v2729_v40 = vsel %vm2723_vm3, %v2712_v57, %v2589_v49  ;;  %v3109_v61 = vrot.slane %v2859_v21, 11 }
 0x37d   : > { %v2879_v58 = vrot.slane %v2877_v14, 7  ;;  %v3110_v25 = vrot.slane %v2872_v36, 11  ;;  %v2869_v27 = vor.u32 %v2867_v48, %v2866_v16  ;;  %v2752_v43 = vunpack.c.l.b16 %v2729_v40 }
 0x37e   : > { %v2753_v19 = vunpack.c.h.b16 %v2729_v40 }
 0x37f   : > { %v2882_v9 = vor.u32 %v2880_v2, %v2879_v58  ;;  %v2768_v46 = vpack.c.b16 %v2752_v43, %v2752_v43  ;;  %v2870_v11 = vsel %vm4155_vm8, %v3109_v61, %v2869_v27 }
 0x380   : > { %v2769_v41 = vpack.c.b16 %v2753_v19, %v2753_v19  ;;  %v2903_v32 = vunpack.c.l.b16 %v2870_v11 }
 0x381   : > { %v2591_v53 = vpop.permute.xlu1 %2590  ;;  %v2883_v23 = vsel %vm4155_vm8, %v3110_v25, %v2882_v9  ;;  %v2807_v35 = vshrl.u32 %v2768_v46, 16 }
 0x382   : > { %v2731_v5 = vsel %vm2723_vm3, %v2714_v29, %v2591_v53  ;;  %v2812_v51 = vshrl.u32 %v2769_v41, 16  ;;  %v2904_v4 = vunpack.c.l.b16 %v2883_v23  ;;  %v2815_v56 = vshll.u32 %v2769_v41, 16 }
 0x383   : > { %v2754_v62 = vunpack.c.l.b16 %v2731_v5  ;;  %v2755_v22 = vunpack.c.h.b16 %v2731_v5  ;;  %v3105_v63 = vrot.slane %v2807_v35, 11 }
 0x384   : > { %v2814_v37 = vrot.slane %v2812_v51, 7  ;;  %v2908_v30 = vpack.c.b16 %v2904_v4, %v2903_v32 }
 0x385   : > { %v2770_v42 = vpack.c.b16 %v2754_v62, %v2754_v62  ;;  %v2771_v28 = vpack.c.b16 %v2755_v22, %v2755_v22 }
 0x386   : > { %v2817_v54 = vor.u32 %v2815_v56, %v2814_v37  ;;  %3130 = vmatmul.msk.bf16.gmra.mxu2 %vm2936_vm5, %v2908_v30 }
 0x387   : > { %v2820_v59 = vshrl.u32 %v2770_v42, 16  ;;  %v2825_v24 = vshrl.u32 %v2771_v28, 16  ;;  %v2828_v47 = vshll.u32 %v2771_v28, 16 }
 0x388   : > { %v2818_v34 = vsel %vm4155_vm8, %v3105_v63, %v2817_v54 }
 0x389   : > { %v2827_v55 = vrot.slane %v2825_v24, 7  ;;  %v3106_v1 = vrot.slane %v2820_v59, 11  ;;  %v2899_v38 = vunpack.c.l.b16 %v2818_v34 }
 0x38b   : > { %v2830_v3 = vor.u32 %v2828_v47, %v2827_v55 }
 0x38d   : > { %v2831_v52 = vsel %vm4155_vm8, %v3106_v1, %v2830_v3 }
 0x38e   : > { %v2900_v6 = vunpack.c.l.b16 %v2831_v52 }
 0x390   : > { %v2906_v44 = vpack.c.b16 %v2900_v6, %v2899_v38 }
 0x392   : > { %3128 = vmatmul.msk.bf16.gmra.mxu1 %vm2936_vm5, %v2906_v44 }
 0x3a5   : > { %v2962_v39 = vpop.f32.mrf.mxu1 }
 0x3a6   : > { %v2963_v12 = vadd.f32 %v3333_v10, %v2962_v39 }
 0x3a8   : > { %v2982_v8 = vmax.f32 %v2963_v12, 0.0 }
 0x3aa   : > { %2990 = vst.msk [vmem:[%s4619_s17] sm:$0xff] %vm1844_vm14, %v2982_v8 }
 0x3ad   : > { %v2964_v7 = vpop.f32.mrf.mxu1 }
 0x3ae   : > { %v2965_v13 = vadd.f32 %v3333_v10, %v2964_v7 }
 0x3b0   : > { %v2983_v0 = vmax.f32 %v2965_v13, 0.0 }
 0x3b2   : > { %2991 = vst.msk [vmem:[%s4619_s17 + $0x8] sm:$0xff] %vm1844_vm14, %v2983_v0 }
 0x3f6   : > { %v2972_v18 = vpop.f32.mrf.mxu2 }
 0x3f7   : > { %v2973_v45 = vadd.f32 %v3333_v10, %v2972_v18 }
 0x3f9   : > { %v2986_v33 = vmax.f32 %v2973_v45, 0.0 }
 0x3fb   : > { %2994 = vst.msk [vmem:[%s4619_s17 + $0x20] sm:$0xff] %vm1844_vm14, %v2986_v33 }
 0x3fe   : > { %v2974_v60 = vpop.f32.mrf.mxu2 }
 0x3ff   : > { %v2975_v20 = vadd.f32 %v3333_v10, %v2974_v60 }
 0x401   : > { %v2987_v50 = vmax.f32 %v2975_v20, 0.0 }
 0x403   : > { %2995 = vst.msk [vmem:[%s4619_s17 + $0x28] sm:$0xff] %vm1844_vm14, %v2987_v50 }
 0x409   : > { %v2977_v15 = vpop.f32.mrf.mxu2 }
 0x40a   : > { %v2978_v17 = vadd.f32 %v3333_v10, %v2977_v15 }
 0x40c   : > { %v2988_v14 = vmax.f32 %v2978_v17, 0.0 }
 0x40e   : > { %2996 = vst.msk [vmem:[%s4619_s17 + $0x30] sm:$0xff] %vm1844_vm14, %v2988_v14 }
 0x40f   : > { %v2967_v36 = vpop.f32.mrf.mxu1 }
 0x410   : > { %v2968_v31 = vadd.f32 %v3333_v10, %v2967_v36 }
 0x411   : > { %v2979_v21 = vpop.f32.mrf.mxu2 }
 0x412   : > { %v2984_v26 = vmax.f32 %v2968_v31, 0.0  ;;  %v2980_v58 = vadd.f32 %v3333_v10, %v2979_v21 }
 0x414   : > { %2992 = vst.msk [vmem:[%s4619_s17 + $0x10] sm:$0xff] %vm1844_vm14, %v2984_v26  ;;  %v2989_v2 = vmax.f32 %v2980_v58, 0.0 }
 0x416   : > { %2997 = vst.msk [vmem:[%s4619_s17 + $0x38] sm:$0xff] %vm1844_vm14, %v2989_v2 }
 0x417   : > { %v2969_v16 = vpop.f32.mrf.mxu1 }
 0x418   : > { %v2970_v48 = vadd.f32 %v3333_v10, %v2969_v16 }
 0x41a   : > { %v2985_v57 = vmax.f32 %v2970_v48, 0.0 }
 0x41c   : > { %2993 = vst.msk [vmem:[%s4619_s17 + $0x18] sm:$0xff] %vm1844_vm14, %v2985_v57 }
 0x41d   : > { %3364 = shalt.err (!%p3361_p3)
}
 0x41e   : > { %s3414_s9 = smov 128  }
 0x41f   : > { %3279 = dma.vmem_to_hbm [thread:$0]  (%p3483_p5), %s3012_s30, 1024, %s3014_s6, %s2999_s22, %s3414_s9, %s3414_s9, %s3405_s13  }
 0x420 PF: > { %p3285_p4 = scmp.ge.s32.totalorder %s3399_s21, 2  ;;  %s3028_s17 = sand.u32 1, %s3387_s18  }
 0x421   : > { %s3029_s23 = scalar_lea.sflag [#allocation5], %s3028_s17 }
 0x422   : > { %p3282_p7 = pnand %p3285_p4, %p3487_p6 }
 0x424   : > { %p3283_p8 = pneg %p3282_p7 }
 0x426   : > { %3382 = dma.done.wait (%p3283_p8), %s3029_s23, 1024  }
 0x427   : > { %3384 = vsyncadd (%p3283_p8), %s3029_s23, 4294966272  ;;  %p15_p9 = scmp.ge.s32.totalorder %s3470_s24, 4   ;;  %s4686_s18 = smov %s3391_s19 }
 0x428   : > { %s4687_s19 = smov %s3395_s20  ;;  %s4688_s20 = smov %s3481_s27 }
 0x429   : > { %s4689_s21 = smov %s3470_s24  ;;  %17 = sbr.rel (!%p15_p9) target bundleno = 3 (0x3), region = 79 }
 0x42e   :  { %3035 = vsyncpa [#allocation5], 1 }
 0x42f   :  { %3037 = vsyncpa [#allocation5 + $0x1], 1 }

</bundles_post_ra>
